<compile_context>
chip_gen: v7x
topology: tpu7x:2x2x1
jax: 0.10.0
libtpu: 0.0.40
codegen_flags: <defaults>
</compile_context>

<pallas_src>
import functools

import jax
import jax.numpy as jnp
from jax.experimental import pallas as pl
from jax.experimental.pallas import tpu as pltpu


EDGE_TILE = 1024    # edge rows per grid step of the fused EGNN-layer kernel
NODE_TILE = 512     # node rows per (parallel) node-tile of the EGNN-layer kernel
ROW_TILE = 1024     # node rows per grid step of the knn / MLP kernels
_ALIGN = 16         # row padding multiple (bf16 sublane tile = 16, covers f32's 8)


# ----------------------------------------------------------------------------- helpers
def _tiling(n, max_tile):
    """rows -> (padded_rows, tile_rows, num_tiles); tiles are 16-row aligned."""
    n16 = max(_ALIGN, ((n + _ALIGN - 1) // _ALIGN) * _ALIGN)
    if n16 <= max_tile:
        return n16, n16, 1
    n_pad = ((n16 + max_tile - 1) // max_tile) * max_tile
    return n_pad, max_tile, n_pad // max_tile


def _pad_rows(a, rows, value=0):
    pad = rows - a.shape[0]
    if pad <= 0:
        return a
    return jnp.pad(a, ((0, pad), (0, 0)), constant_values=value)


def _res(shape):
    """Resident block: same full block every grid step (stays in VMEM, no re-DMA)."""
    return pl.BlockSpec(shape, lambda *_: (0, 0))


def _row(tile, cols):
    """Row-streamed block (1-D grid)."""
    return pl.BlockSpec((tile, cols), lambda i: (i, 0))


def _detect_vmem_limit():
    # <= 3/4 of physical VMEM (v5e/v6e: 96 MiB of 128, v7x: 48 MiB of 64), capped.
    try:
        cap = pltpu.get_tpu_info().vmem_capacity_bytes
        return int(min(cap * 3 // 4, 100 * 1024 * 1024))
    except Exception:
        return None


_VMEM_LIMIT = _detect_vmem_limit()


def _cparams(sem):
    if _VMEM_LIMIT is None:
        return pltpu.CompilerParams(dimension_semantics=sem)
    return pltpu.CompilerParams(dimension_semantics=sem, vmem_limit_bytes=_VMEM_LIMIT)


def _mm(a, w):
    """bf16 MXU matmul with f32 accumulation (dense MLP layers)."""
    return jnp.dot(a.astype(jnp.bfloat16), w.astype(jnp.bfloat16),
                   preferred_element_type=jnp.float32)


def _silu(v):
    return v * jax.nn.sigmoid(v)


# ----------------------------------------------------------------------------- fused EGNN layer kernel
def _egnn_layer_kernel(e_in_ref, rel_ref, idx_ref, nid_ref, x_ref, h_ref,
                       we1_ref, be1_ref, we2_ref, be2_ref,
                       wx1_ref, bx1_ref, wx2_ref, bx2_ref,
                       wh1h_ref, wh1m_ref, bh1_ref, wh2_ref, bh2_ref,
                       out_ref, acc_ref, *, mdim, compute_coords):
    et = pl.program_id(1)

    @pl.when(et == 0)
    def _():
        acc_ref[...] = jnp.zeros_like(acc_ref)

    # ---- per-edge message net phi_e (2 fused linears, VMEM-resident hidden) ----
    m = _silu(_mm(e_in_ref[...], we1_ref[...]) + be1_ref[...])
    m = _silu(_mm(m, we2_ref[...]) + be2_ref[...])                 # (TE, mdim) f32

    # ---- single node-major one-hot (exact 0/1 in bf16): no transpose, no per-tile iota ----
    tn = nid_ref.shape[0]
    te = idx_ref.shape[1]
    onehot = (jnp.broadcast_to(nid_ref[...], (tn, te)) ==
              jnp.broadcast_to(idx_ref[...], (tn, te))).astype(jnp.bfloat16)

    if compute_coords:
        # per-edge coordinate net phi_x ((TE,1) weight never leaves VMEM)
        cw = _silu(_mm(m, wx1_ref[...]) + bx1_ref[...])
        cw = _mm(cw, wx2_ref[...]) + bx2_ref[...]                  # (TE, 1)
        vx = rel_ref[...] * cw                                     # (TE, v)
        slab = jnp.concatenate([m.astype(jnp.bfloat16),
                                vx.astype(jnp.bfloat16)], axis=-1)  # (TE, mdim+v)
    else:
        slab = m.astype(jnp.bfloat16)                              # (TE, mdim)

    # ---- ONE merged scatter-add: bf16 MXU matmul, f32 accumulation ----
    acc_ref[...] += jnp.dot(onehot, slab, preferred_element_type=jnp.float32)

    # ---- node update phi_h, only after the last edge tile has been accumulated ----
    @pl.when(et == pl.num_programs(1) - 1)
    def _():
        acc = acc_ref[...]
        h = h_ref[...]
        if compute_coords:
            m_agg = acc[:, :mdim]
            x_new = x_ref[...] + acc[:, mdim:]
        else:
            m_agg = acc
            x_new = x_ref[...]                                     # coords discarded downstream
        hid = _silu(_mm(h, wh1h_ref[...]) + _mm(m_agg, wh1m_ref[...]) + bh1_ref[...])
        h_new = h + _mm(hid, wh2_ref[...]) + bh2_ref[...]
        out_ref[...] = jnp.concatenate([x_new, h_new], axis=-1)    # single lane-dense slab


def egnn_layer(p, e_in, rel, scatter_dst, x, h, num_nodes, compute_coords=True):
    e, ke = e_in.shape
    v = rel.shape[1]
    d = h.shape[1]
    hd = p["we1"].shape[1]
    md = p["we2"].shape[1]

    e_pad, te, n_et = _tiling(e, EDGE_TILE)
    n_pad, tn, n_nt = _tiling(num_nodes, NODE_TILE)

    # per-edge streams (e_in in bf16: halves the only per-tile DMA traffic)
    e_in_p = _pad_rows(e_in.astype(jnp.bfloat16), e_pad)
    rel_p = _pad_rows(rel.astype(jnp.float32), e_pad)
    # destinations as a (1, E_pad) lane vector; padded edges -> id that matches no node row
    idx_p = jnp.pad(scatter_dst.astype(jnp.int32), (0, e_pad - e),
                    constant_values=n_pad).reshape(1, e_pad)
    node_ids = jnp.arange(n_pad, dtype=jnp.int32).reshape(n_pad, 1)
    x_p = _pad_rows(x.astype(jnp.float32), n_pad)
    h_p = _pad_rows(h.astype(jnp.float32), n_pad)

    acc_w = md + v if compute_coords else md

    out = pl.pallas_call(
        functools.partial(_egnn_layer_kernel, mdim=md, compute_coords=compute_coords),
        grid=(n_nt, n_et),                                         # (node tiles, edge tiles)
        out_shape=jax.ShapeDtypeStruct((n_pad, v + d), jnp.float32),
        in_specs=[
            pl.BlockSpec((te, ke), lambda nt, et: (et, 0)),        # streamed per-edge inputs
            pl.BlockSpec((te, v), lambda nt, et: (et, 0)),
            pl.BlockSpec((1, te), lambda nt, et: (0, et)),         # dst ids, lane-major
            pl.BlockSpec((tn, 1), lambda nt, et: (nt, 0)),         # resident node-id column
            pl.BlockSpec((tn, v), lambda nt, et: (nt, 0)),         # node tensors (per node tile)
            pl.BlockSpec((tn, d), lambda nt, et: (nt, 0)),
            _res((ke, hd)), _res((1, hd)),                         # phi_e
            _res((hd, md)), _res((1, md)),
            _res((md, hd)), _res((1, hd)),                         # phi_x
            _res((hd, 1)), _res((1, 1)),
            _res((d, hd)), _res((md, hd)), _res((1, hd)),          # phi_h (split weight, no concat)
            _res((hd, d)), _res((1, d)),
        ],
        out_specs=pl.BlockSpec((tn, v + d), lambda nt, et: (nt, 0)),
        scratch_shapes=[pltpu.VMEM((tn, acc_w), jnp.float32)],
        compiler_params=_cparams(("parallel", "arbitrary")),       # node tiles independent,
    )(e_in_p, rel_p, idx_p, node_ids, x_p, h_p,                    # edge axis is a reduction
      p["we1"], p["be1"], p["we2"], p["be2"],
      p["wx1"], p["bx1"], p["wx2"], p["bx2"],
      p["wh1h"], p["wh1m"], p["bh1"], p["wh2"], p["bh2"])
    return out[:num_nodes, :v], out[:num_nodes, v:]


def egnn(layers, src, dst, edge_attr, x, h, scatter_dst, num_nodes, skip_last_coords=False):
    n_layers = len(layers)
    for li, p in enumerate(layers):
        # plain-JAX gather / concat glue (edge feature assembly)
        x_src, x_dst = x[src], x[dst]
        h_src, h_dst = h[src], h[dst]
        rel = x_dst - x_src
        d2 = jnp.sum(rel * rel, axis=-1, keepdims=True)
        e_in = jnp.concatenate([h_dst, h_src, d2, edge_attr], axis=-1)
        cc = not (skip_last_coords and li == n_layers - 1)
        x, h = egnn_layer(p, e_in, rel, scatter_dst, x, h, num_nodes, compute_coords=cc)
    return x, h


# ----------------------------------------------------------------------------- knn_interpolate kernel
def _knn_interp_kernel(py_ref, ay_ref, sqy_ref, by_ref,
                       px_ref, ax_ref, pxT_ref, axT_ref, sqx_ref, bx_ref,
                       o_ref):
    # ||cat(pos_diff, attr_diff)||^2 for every (y, x) pair -- kept in f32.
    # TODO(synk): uses the ||a||^2+||b||^2-2ab expansion (f32); near-coincident points
    # may differ slightly from the reference's direct-difference computation.
    cross = (jnp.dot(py_ref[...], pxT_ref[...], preferred_element_type=jnp.float32)
             + jnp.dot(ay_ref[...], axT_ref[...], preferred_element_type=jnp.float32))
    d2 = sqy_ref[...] + sqx_ref[...] - 2.0 * cross                 # (TN, M)
    same = by_ref[...] == bx_ref[...]                              # batch mask (TN, M)
    w = jnp.where(same, 1.0 / jnp.maximum(d2, 1e-16), 0.0)
    wsum = jnp.maximum(jnp.sum(w, axis=-1, keepdims=True), 1e-30)  # guard empty / pad rows
    inv = pl.reciprocal(wsum)                                      # exact EUP reciprocal, reused
    ypos = jnp.dot(w, px_ref[...], preferred_element_type=jnp.float32) * inv
    yattr = jnp.dot(w, ax_ref[...], preferred_element_type=jnp.float32) * inv
    o_ref[...] = jnp.concatenate([ypos, yattr], axis=-1)           # single lane-dense slab


def knn_interpolate(pos_x, attr_x, pos_y, attr_y, batch_x, batch_y):
    # NOTE: in EHGN_TopK_Sparse, ratio == k == cluster, so the k-NN query selects
    # every pooled node of the same graph -> exactly a batch-masked dense
    # inverse-(pos+attr)-distance interpolation, which this kernel computes.
    m, v = pos_x.shape
    n, d = attr_y.shape
    pos_x = pos_x.astype(jnp.float32)
    attr_x = attr_x.astype(jnp.float32)
    sqx = (jnp.sum(pos_x * pos_x, -1) + jnp.sum(attr_x * attr_x, -1)).reshape(1, m)
    sqy = (jnp.sum(pos_y * pos_y, -1) + jnp.sum(attr_y * attr_y, -1)).reshape(n, 1)
    bx = batch_x.reshape(1, m).astype(jnp.int32)

    n_pad, tn, n_tiles = _tiling(n, ROW_TILE)
    py = _pad_rows(pos_y.astype(jnp.float32), n_pad)
    ay = _pad_rows(attr_y.astype(jnp.float32), n_pad)
    sqy_p = _pad_rows(sqy.astype(jnp.float32), n_pad)
    by_p = _pad_rows(batch_y.reshape(n, 1).astype(jnp.int32), n_pad, value=-1)

    out = pl.pallas_call(
        _knn_interp_kernel,
        grid=(n_tiles,),
        out_shape=jax.ShapeDtypeStruct((n_pad, v + d), jnp.float32),
        in_specs=[_row(tn, v), _row(tn, d), _row(tn, 1), _row(tn, 1),   # streamed query rows
                  _res((m, v)), _res((m, d)), _res((v, m)), _res((d, m)),
                  _res((1, m)), _res((1, m))],                          # resident pooled tensors
        out_specs=_row(tn, v + d),
        compiler_params=_cparams(("parallel",)),                        # query tiles independent
    )(py, ay, sqy_p, by_p,
      pos_x, attr_x, pos_x.T, attr_x.T, sqx.astype(jnp.float32), bx)
    return out[:n, :v], out[:n, v:]


# ----------------------------------------------------------------------------- fused MLP head
def _mlp_kernel(h_ref, w1_ref, b1_ref, w2_ref, b2_ref, w3_ref, b3_ref, o_ref):
    y = jnp.maximum(_mm(h_ref[...], w1_ref[...]) + b1_ref[...], 0.0)
    y = jnp.maximum(_mm(y, w2_ref[...]) + b2_ref[...], 0.0)
    o_ref[...] = _mm(y, w3_ref[...]) + b3_ref[...]


def mlp_forward(p, h):
    # TODO(synk): PyG MLP default batch-norm omitted (synthetic weights; plain Linear+ReLU used).
    n, d = h.shape
    hd = p["w1"].shape[1]
    vd = p["w3"].shape[1]
    n_pad, tn, n_tiles = _tiling(n, ROW_TILE)
    h_p = _pad_rows(h.astype(jnp.bfloat16), n_pad)                 # bf16 stream
    out = pl.pallas_call(
        _mlp_kernel,
        grid=(n_tiles,),
        out_shape=jax.ShapeDtypeStruct((n_pad, vd), jnp.float32),
        in_specs=[_row(tn, d),
                  _res((d, hd)), _res((1, hd)),
                  _res((hd, hd)), _res((1, hd)),
                  _res((hd, vd)), _res((1, vd))],
        out_specs=_row(tn, vd),
        compiler_params=_cparams(("parallel",)),
    )(h_p, p["w1"], p["b1"], p["w2"], p["b2"], p["w3"], p["b3"])
    return out[:n]


# ----------------------------------------------------------------------------- TopK pooling (plain-JAX glue)
def topk_pooling(h, pool_w, k, num_graphs, nodes_per_graph):
    # Lane-dense VPU reduction done in plain JAX (no (N,1) masked-store pallas output).
    # TODO(synk): assumes contiguous, equal-size graphs (ragged batches unsupported).
    wn = pool_w / jnp.linalg.norm(pool_w)
    score = jnp.tanh(h @ wn)                                        # (N,)
    topv, topi = jax.lax.top_k(score.reshape(num_graphs, nodes_per_graph), k)
    perm = (topi + jnp.arange(num_graphs, dtype=jnp.int32)[:, None] * nodes_per_graph).reshape(-1)
    return perm.astype(jnp.int32), topv.reshape(-1)


# ----------------------------------------------------------------------------- parameter init
def _dense_init(key, fan_in, fan_out):
    w = jax.random.normal(key, (fan_in, fan_out), jnp.float32) / jnp.sqrt(jnp.float32(fan_in))
    b = jnp.zeros((1, fan_out), jnp.float32)
    return w, b


def init_egnn(key, num_layers, node_dim, edge_dim, message_dim, hidden_dim):
    layers = []
    for l in range(num_layers):
        ks = jax.random.split(jax.random.fold_in(key, l), 6)
        we1, be1 = _dense_init(ks[0], 2 * node_dim + 1 + edge_dim, hidden_dim)
        we2, be2 = _dense_init(ks[1], hidden_dim, message_dim)
        wx1, bx1 = _dense_init(ks[2], message_dim, hidden_dim)
        wx2, bx2 = _dense_init(ks[3], hidden_dim, 1)
        wh1, bh1 = _dense_init(ks[4], node_dim + message_dim, hidden_dim)
        wh2, bh2 = _dense_init(ks[5], hidden_dim, node_dim)
        layers.append(dict(we1=we1, be1=be1, we2=we2, be2=be2,
                           wx1=wx1, bx1=bx1, wx2=wx2, bx2=bx2,
                           # phi_h input weight split (h-part / m_agg-part): avoids in-kernel concat
                           wh1h=wh1[:node_dim], wh1m=wh1[node_dim:], bh1=bh1,
                           wh2=wh2, bh2=bh2))
    return layers


def init_params(key, num_layers_egnn, node_dim, edge_dim, message_dim,
                hidden_dim, vector_dim, scalar_dim):
    # TODO(synk): scalar_dim is an EGNN-internal hyperparameter whose exact role
    # is not specified in the reference; it is accepted but unused here.
    ks = jax.random.split(key, 8)
    w1, b1 = _dense_init(ks[4], node_dim, hidden_dim)
    w2, b2 = _dense_init(ks[5], hidden_dim, hidden_dim)
    w3, b3 = _dense_init(ks[6], hidden_dim, vector_dim)
    return dict(
        egnn_in=init_egnn(ks[0], num_layers_egnn, node_dim, edge_dim, message_dim, hidden_dim),
        egnn_hidden=init_egnn(ks[1], num_layers_egnn, node_dim, edge_dim, message_dim, hidden_dim),
        egnn_out=init_egnn(ks[2], num_layers_egnn, node_dim, edge_dim, message_dim, hidden_dim),
        pool_w=jax.random.normal(ks[3], (node_dim,), jnp.float32),
        mlp=dict(w1=w1, b1=b1, w2=w2, b2=b2, w3=w3, b3=b3),
    )


# ----------------------------------------------------------------------------- full forward
def ehgn_forward(params, edge_index, edge_attr, x, h, batch_idx,
                 cluster, num_graphs, nodes_per_graph):
    src, dst = edge_index[0], edge_index[1]
    n = h.shape[0]
    x_l, h_l = x, h

    # egnn_in over the full graph (one fused pallas_call per layer)
    x1, h1 = egnn(params["egnn_in"], src, dst, edge_attr, x, h, dst, n)

    # TopKPooling (ratio = cluster nodes per graph)
    perm, score = topk_pooling(h1, params["pool_w"], cluster, num_graphs, nodes_per_graph)
    H = h1[perm] * score[:, None]
    X = x1[perm] * score[:, None]
    m = perm.shape[0]

    # induced-subgraph edge filtering: invalid edges are routed to an
    # out-of-range scatter destination and dropped inside the fused kernel.
    # TODO(synk): edge-list compaction before egnn_hidden skipped (duplicate edges make a
    # safe static bound equal to E, so it would not reduce work here).
    inv = jnp.full((n,), -1, jnp.int32).at[perm].set(jnp.arange(m, dtype=jnp.int32))
    src_a, dst_a = inv[src], inv[dst]
    valid = (src_a >= 0) & (dst_a >= 0)
    src_g = jnp.where(valid, src_a, 0).astype(jnp.int32)
    dst_g = jnp.where(valid, dst_a, 0).astype(jnp.int32)
    dst_scatter = jnp.where(valid, dst_a, m).astype(jnp.int32)

    X2, H2 = egnn(params["egnn_hidden"], src_g, dst_g, edge_attr, X, H, dst_scatter, m)
    batch_a = batch_idx[perm]

    Xx, Hh = knn_interpolate(pos_x=X2, attr_x=H2, pos_y=x_l, attr_y=h_l,
                             batch_x=batch_a, batch_y=batch_idx)

    # asymmetric scaling matches the reference exactly: (x_l + Xx)/2 but h_l + Hh/2.
    # rx is discarded -> last layer of egnn_out skips the coordinate path.
    rx, rh = egnn(params["egnn_out"], src, dst, edge_attr,
                  (x_l + Xx) / 2.0, h_l + Hh / 2.0, dst, n, skip_last_coords=True)
    result_x = (x_l - Xx) / 2.0 * mlp_forward(params["mlp"], rh) + Xx
    return result_x, rh


# ----------------------------------------------------------------------------- main
if __name__ == "__main__":
    key = jax.random.PRNGKey(0)

    num_layers_egnn = 2
    node_dim, edge_dim, message_dim, hidden_dim = 8, 4, 16, 32
    vector_dim, scalar_dim, cluster = 3, 8, 5
    num_graphs, nodes_per_graph = 2, 12
    N = num_graphs * nodes_per_graph
    E_per = 30
    E = num_graphs * E_per

    ks = jax.random.split(key, 8)
    src_list, dst_list = [], []
    for g in range(num_graphs):
        src_list.append(jax.random.randint(jax.random.fold_in(ks[0], g), (E_per,), 0, nodes_per_graph)
                        + g * nodes_per_graph)
        dst_list.append(jax.random.randint(jax.random.fold_in(ks[1], g), (E_per,), 0, nodes_per_graph)
                        + g * nodes_per_graph)
    edge_index = jnp.stack([jnp.concatenate(src_list), jnp.concatenate(dst_list)]).astype(jnp.int32)
    edge_attr = jax.random.normal(ks[2], (E, edge_dim), jnp.float32)
    x = jax.random.normal(ks[3], (N, vector_dim), jnp.float32)
    h = jax.random.normal(ks[4], (N, node_dim), jnp.float32)
    batch_idx = jnp.repeat(jnp.arange(num_graphs, dtype=jnp.int32), nodes_per_graph)

    params = init_params(ks[5], num_layers_egnn, node_dim, edge_dim, message_dim,
                         hidden_dim, vector_dim, scalar_dim)

    forward = jax.jit(ehgn_forward,
                      static_argnames=("cluster", "num_graphs", "nodes_per_graph"))
    result_x, result_h = forward(params, edge_index, edge_attr, x, h, batch_idx,
                                 cluster=cluster, num_graphs=num_graphs,
                                 nodes_per_graph=nodes_per_graph)
    jax.block_until_ready((result_x, result_h))
    assert result_x.shape == (N, vector_dim) and result_h.shape == (N, node_dim)
    assert bool(jnp.all(jnp.isfinite(result_x))) and bool(jnp.all(jnp.isfinite(result_h)))
    print("KERNEL_OK")
</pallas_src>

<mosaic_0001>
module attributes {stable_mosaic.version = 11 : i64} {
  func.func @_egnn_layer_kernel(%arg0: i32, %arg1: i32, %arg2: memref<64x21xbf16, #tpu.memory_space<vmem>>, %arg3: memref<64x3xf32, #tpu.memory_space<vmem>>, %arg4: memref<1x64xi32, #tpu.memory_space<vmem>>, %arg5: memref<32x1xi32, #tpu.memory_space<vmem>>, %arg6: memref<32x3xf32, #tpu.memory_space<vmem>>, %arg7: memref<32x8xf32, #tpu.memory_space<vmem>>, %arg8: memref<21x32xf32, #tpu.memory_space<vmem>>, %arg9: memref<1x32xf32, #tpu.memory_space<vmem>>, %arg10: memref<32x16xf32, #tpu.memory_space<vmem>>, %arg11: memref<1x16xf32, #tpu.memory_space<vmem>>, %arg12: memref<16x32xf32, #tpu.memory_space<vmem>>, %arg13: memref<1x32xf32, #tpu.memory_space<vmem>>, %arg14: memref<32x1xf32, #tpu.memory_space<vmem>>, %arg15: memref<1x1xf32, #tpu.memory_space<vmem>>, %arg16: memref<8x32xf32, #tpu.memory_space<vmem>>, %arg17: memref<16x32xf32, #tpu.memory_space<vmem>>, %arg18: memref<1x32xf32, #tpu.memory_space<vmem>>, %arg19: memref<32x8xf32, #tpu.memory_space<vmem>>, %arg20: memref<1x8xf32, #tpu.memory_space<vmem>>, %arg21: memref<32x11xf32, #tpu.memory_space<vmem>>, %arg22: memref<32x19xf32, #tpu.memory_space<vmem>>) attributes {dimension_semantics = [#tpu.dimension_semantics<parallel>, #tpu.dimension_semantics<arbitrary>], iteration_bounds = array<i64: 1, 1>, scalar_prefetch = 0 : i64, scratch_operands = 1 : i64, tpu.core_type = #tpu.core_type<tc>, window_params = [{transform_indices = @transform_0, window_bounds = array<i64: 64, 21>}, {transform_indices = @transform_1, window_bounds = array<i64: 64, 3>}, {transform_indices = @transform_2, window_bounds = array<i64: 1, 64>}, {transform_indices = @transform_3, window_bounds = array<i64: 32, 1>}, {transform_indices = @transform_4, window_bounds = array<i64: 32, 3>}, {transform_indices = @transform_5, window_bounds = array<i64: 32, 8>}, {pipeline_mode = #tpu.pipeline_mode<synchronous>, transform_indices = @transform_6, window_bounds = array<i64: 21, 32>}, {pipeline_mode = #tpu.pipeline_mode<synchronous>, transform_indices = @transform_7, window_bounds = array<i64: 1, 32>}, {pipeline_mode = #tpu.pipeline_mode<synchronous>, transform_indices = @transform_8, window_bounds = array<i64: 32, 16>}, {pipeline_mode = #tpu.pipeline_mode<synchronous>, transform_indices = @transform_9, window_bounds = array<i64: 1, 16>}, {pipeline_mode = #tpu.pipeline_mode<synchronous>, transform_indices = @transform_10, window_bounds = array<i64: 16, 32>}, {pipeline_mode = #tpu.pipeline_mode<synchronous>, transform_indices = @transform_11, window_bounds = array<i64: 1, 32>}, {pipeline_mode = #tpu.pipeline_mode<synchronous>, transform_indices = @transform_12, window_bounds = array<i64: 32, 1>}, {pipeline_mode = #tpu.pipeline_mode<synchronous>, transform_indices = @transform_13, window_bounds = array<i64: 1, 1>}, {pipeline_mode = #tpu.pipeline_mode<synchronous>, transform_indices = @transform_14, window_bounds = array<i64: 8, 32>}, {pipeline_mode = #tpu.pipeline_mode<synchronous>, transform_indices = @transform_15, window_bounds = array<i64: 16, 32>}, {pipeline_mode = #tpu.pipeline_mode<synchronous>, transform_indices = @transform_16, window_bounds = array<i64: 1, 32>}, {pipeline_mode = #tpu.pipeline_mode<synchronous>, transform_indices = @transform_17, window_bounds = array<i64: 32, 8>}, {pipeline_mode = #tpu.pipeline_mode<synchronous>, transform_indices = @transform_18, window_bounds = array<i64: 1, 8>}, {transform_indices = @transform_19, window_bounds = array<i64: 32, 11>}]} {
    %c0_i32 = arith.constant 0 : i32
    %0 = arith.cmpi eq, %arg1, %c0_i32 : i32
    %1 = arith.extui %0 : i1 to i32
    %c0_i32_0 = arith.constant 0 : i32
    %2 = arith.cmpi ne, %1, %c0_i32_0 : i32
    scf.if %2 {
      %cst_37 = arith.constant 0.000000e+00 : f32
      %72 = vector.broadcast %cst_37 : f32 to vector<32x19xf32>
      %c0_38 = arith.constant 0 : index
      %c0_39 = arith.constant 0 : index
      %73 = vector.load %arg22[%c0_38, %c0_39] : memref<32x19xf32, #tpu.memory_space<vmem>>, vector<32x19xf32>
      tpu.vector_store %arg22[%c0_38, %c0_39], %72 {strides = array<i32>} : memref<32x19xf32, #tpu.memory_space<vmem>>, vector<32x19xf32>,
    } else {
    }
    %c0 = arith.constant 0 : index
    %c0_1 = arith.constant 0 : index
    %3 = vector.load %arg2[%c0, %c0_1] : memref<64x21xbf16, #tpu.memory_space<vmem>>, vector<64x21xbf16>
    %c0_2 = arith.constant 0 : index
    %c0_3 = arith.constant 0 : index
    %4 = vector.load %arg8[%c0_2, %c0_3] : memref<21x32xf32, #tpu.memory_space<vmem>>, vector<21x32xf32>
    %5 = arith.truncf %4 : vector<21x32xf32> to vector<21x32xbf16>
    %cst = arith.constant dense<0.000000e+00> : vector<64x32xf32>
    %6 = tpu.matmul %3, %5, %cst {dimension_numbers = #tpu.dot_dimension_numbers<[1], [0], [0], [1], [0, 0, 1, 1], [], []>} : vector<64x21xbf16>, vector<21x32xbf16>, vector<64x32xf32> -> vector<64x32xf32>
    %c0_4 = arith.constant 0 : index
    %c0_5 = arith.constant 0 : index
    %7 = vector.load %arg9[%c0_4, %c0_5] : memref<1x32xf32, #tpu.memory_space<vmem>>, vector<1x32xf32>
    %8 = vector.broadcast %7 : vector<1x32xf32> to vector<64x32xf32>
    %9 = arith.addf %6, %8 : vector<64x32xf32>
    %10 = arith.negf %9 : vector<64x32xf32>
    %11 = math.exp %10 : vector<64x32xf32>
    %cst_6 = arith.constant 1.000000e+00 : f32
    %12 = vector.broadcast %cst_6 : f32 to vector<64x32xf32>
    %13 = arith.addf %12, %11 : vector<64x32xf32>
    %14 = arith.divf %12, %13 : vector<64x32xf32>
    %15 = arith.mulf %9, %14 : vector<64x32xf32>
    %c0_7 = arith.constant 0 : index
    %c0_8 = arith.constant 0 : index
    %16 = vector.load %arg10[%c0_7, %c0_8] : memref<32x16xf32, #tpu.memory_space<vmem>>, vector<32x16xf32>
    %17 = arith.truncf %15 : vector<64x32xf32> to vector<64x32xbf16>
    %18 = arith.truncf %16 : vector<32x16xf32> to vector<32x16xbf16>
    %cst_9 = arith.constant dense<0.000000e+00> : vector<64x16xf32>
    %19 = tpu.matmul %17, %18, %cst_9 {dimension_numbers = #tpu.dot_dimension_numbers<[1], [0], [0], [1], [0, 0, 1, 1], [], []>} : vector<64x32xbf16>, vector<32x16xbf16>, vector<64x16xf32> -> vector<64x16xf32>
    %c0_10 = arith.constant 0 : index
    %c0_11 = arith.constant 0 : index
    %20 = vector.load %arg11[%c0_10, %c0_11] : memref<1x16xf32, #tpu.memory_space<vmem>>, vector<1x16xf32>
    %21 = vector.broadcast %20 : vector<1x16xf32> to vector<64x16xf32>
    %22 = arith.addf %19, %21 : vector<64x16xf32>
    %23 = arith.negf %22 : vector<64x16xf32>
    %24 = math.exp %23 : vector<64x16xf32>
    %cst_12 = arith.constant 1.000000e+00 : f32
    %25 = vector.broadcast %cst_12 : f32 to vector<64x16xf32>
    %26 = arith.addf %25, %24 : vector<64x16xf32>
    %27 = arith.divf %25, %26 : vector<64x16xf32>
    %28 = arith.mulf %22, %27 : vector<64x16xf32>
    %c0_13 = arith.constant 0 : index
    %c0_14 = arith.constant 0 : index
    %29 = vector.load %arg5[%c0_13, %c0_14] : memref<32x1xi32, #tpu.memory_space<vmem>>, vector<32x1xi32>
    %30 = vector.shape_cast %29 : vector<32x1xi32> to vector<32x1xi32>
    %31 = vector.broadcast %30 : vector<32x1xi32> to vector<32x64xi32>
    %c0_15 = arith.constant 0 : index
    %c0_16 = arith.constant 0 : index
    %32 = vector.load %arg4[%c0_15, %c0_16] : memref<1x64xi32, #tpu.memory_space<vmem>>, vector<1x64xi32>
    %33 = vector.shape_cast %32 : vector<1x64xi32> to vector<1x64xi32>
    %34 = vector.broadcast %33 : vector<1x64xi32> to vector<32x64xi32>
    %35 = arith.cmpi eq, %31, %34 : vector<32x64xi32>
    %36 = arith.extui %35 : vector<32x64xi1> to vector<32x64xi32>
    %37 = arith.sitofp %36 : vector<32x64xi32> to vector<32x64xf32>
    %38 = arith.truncf %37 : vector<32x64xf32> to vector<32x64xbf16>
    %c0_17 = arith.constant 0 : index
    %c0_18 = arith.constant 0 : index
    %39 = vector.load %arg12[%c0_17, %c0_18] : memref<16x32xf32, #tpu.memory_space<vmem>>, vector<16x32xf32>
    %40 = arith.truncf %28 : vector<64x16xf32> to vector<64x16xbf16>
    %41 = arith.truncf %39 : vector<16x32xf32> to vector<16x32xbf16>
    %cst_19 = arith.constant dense<0.000000e+00> : vector<64x32xf32>
    %42 = tpu.matmul %40, %41, %cst_19 {dimension_numbers = #tpu.dot_dimension_numbers<[1], [0], [0], [1], [0, 0, 1, 1], [], []>} : vector<64x16xbf16>, vector<16x32xbf16>, vector<64x32xf32> -> vector<64x32xf32>
    %c0_20 = arith.constant 0 : index
    %c0_21 = arith.constant 0 : index
    %43 = vector.load %arg13[%c0_20, %c0_21] : memref<1x32xf32, #tpu.memory_space<vmem>>, vector<1x32xf32>
    %44 = vector.broadcast %43 : vector<1x32xf32> to vector<64x32xf32>
    %45 = arith.addf %42, %44 : vector<64x32xf32>
    %46 = arith.negf %45 : vector<64x32xf32>
    %47 = math.exp %46 : vector<64x32xf32>
    %cst_22 = arith.constant 1.000000e+00 : f32
    %48 = vector.broadcast %cst_22 : f32 to vector<64x32xf32>
    %49 = arith.addf %48, %47 : vector<64x32xf32>
    %50 = arith.divf %48, %49 : vector<64x32xf32>
    %51 = arith.mulf %45, %50 : vector<64x32xf32>
    %c0_23 = arith.constant 0 : index
    %c0_24 = arith.constant 0 : index
    %52 = vector.load %arg14[%c0_23, %c0_24] : memref<32x1xf32, #tpu.memory_space<vmem>>, vector<32x1xf32>
    %53 = arith.truncf %51 : vector<64x32xf32> to vector<64x32xbf16>
    %54 = arith.truncf %52 : vector<32x1xf32> to vector<32x1xbf16>
    %cst_25 = arith.constant dense<0.000000e+00> : vector<64x1xf32>
    %55 = tpu.matmul %53, %54, %cst_25 {dimension_numbers = #tpu.dot_dimension_numbers<[1], [0], [0], [1], [0, 0, 1, 1], [], []>} : vector<64x32xbf16>, vector<32x1xbf16>, vector<64x1xf32> -> vector<64x1xf32>
    %c0_26 = arith.constant 0 : index
    %c0_27 = arith.constant 0 : index
    %56 = vector.load %arg15[%c0_26, %c0_27] : memref<1x1xf32, #tpu.memory_space<vmem>>, vector<1x1xf32>
    %57 = vector.broadcast %56 : vector<1x1xf32> to vector<64x1xf32>
    %58 = arith.addf %55, %57 : vector<64x1xf32>
    %c0_28 = arith.constant 0 : index
    %c0_29 = arith.constant 0 : index
    %59 = vector.load %arg3[%c0_28, %c0_29] : memref<64x3xf32, #tpu.memory_space<vmem>>, vector<64x3xf32>
    %60 = vector.broadcast %58 : vector<64x1xf32> to vector<64x3xf32>
    %61 = arith.mulf %59, %60 : vector<64x3xf32>
    %62 = arith.truncf %28 : vector<64x16xf32> to vector<64x16xbf16>
    %63 = arith.truncf %61 : vector<64x3xf32> to vector<64x3xbf16>
    %64 = tpu.concatenate %62, %63 in 1 : vector<64x16xbf16>, vector<64x3xbf16> -> vector<64x19xbf16>
    %c0_30 = arith.constant 0 : index
    %c0_31 = arith.constant 0 : index
    %65 = vector.load %arg22[%c0_30, %c0_31] : memref<32x19xf32, #tpu.memory_space<vmem>>, vector<32x19xf32>
    %cst_32 = arith.constant dense<0.000000e+00> : vector<32x19xf32>
    %66 = tpu.matmul %38, %64, %cst_32 {dimension_numbers = #tpu.dot_dimension_numbers<[1], [0], [0], [1], [0, 0, 1, 1], [], []>} : vector<32x64xbf16>, vector<64x19xbf16>, vector<32x19xf32> -> vector<32x19xf32>
    %67 = arith.addf %65, %66 : vector<32x19xf32>
    %c0_33 = arith.constant 0 : index
    %c0_34 = arith.constant 0 : index
    %68 = vector.load %arg22[%c0_33, %c0_34] : memref<32x19xf32, #tpu.memory_space<vmem>>, vector<32x19xf32>
    tpu.vector_store %arg22[%c0_33, %c0_34], %67 {strides = array<i32>} : memref<32x19xf32, #tpu.memory_space<vmem>>, vector<32x19xf32>,
    %c0_i32_35 = arith.constant 0 : i32
    %69 = arith.cmpi eq, %arg1, %c0_i32_35 : i32
    %70 = arith.extui %69 : i1 to i32
    %c0_i32_36 = arith.constant 0 : i32
    %71 = arith.cmpi ne, %70, %c0_i32_36 : i32
    scf.if %71 {
      %c0_37 = arith.constant 0 : index
      %c0_38 = arith.constant 0 : index
      %72 = vector.load %arg22[%c0_37, %c0_38] : memref<32x19xf32, #tpu.memory_space<vmem>>, vector<32x19xf32>
      %c0_39 = arith.constant 0 : index
      %c0_40 = arith.constant 0 : index
      %73 = vector.load %arg7[%c0_39, %c0_40] : memref<32x8xf32, #tpu.memory_space<vmem>>, vector<32x8xf32>
      %74 = vector.extract_strided_slice %72 {offsets = [0, 0], sizes = [32, 16], strides = [1, 1]} : vector<32x19xf32> to vector<32x16xf32>
      %c0_41 = arith.constant 0 : index
      %c0_42 = arith.constant 0 : index
      %75 = vector.load %arg6[%c0_41, %c0_42] : memref<32x3xf32, #tpu.memory_space<vmem>>, vector<32x3xf32>
      %76 = vector.extract_strided_slice %72 {offsets = [0, 16], sizes = [32, 3], strides = [1, 1]} : vector<32x19xf32> to vector<32x3xf32>
      %77 = arith.addf %75, %76 : vector<32x3xf32>
      %c0_43 = arith.constant 0 : index
      %c0_44 = arith.constant 0 : index
      %78 = vector.load %arg16[%c0_43, %c0_44] : memref<8x32xf32, #tpu.memory_space<vmem>>, vector<8x32xf32>
      %79 = arith.truncf %73 : vector<32x8xf32> to vector<32x8xbf16>
      %80 = arith.truncf %78 : vector<8x32xf32> to vector<8x32xbf16>
      %cst_45 = arith.constant dense<0.000000e+00> : vector<32x32xf32>
      %81 = tpu.matmul %79, %80, %cst_45 {dimension_numbers = #tpu.dot_dimension_numbers<[1], [0], [0], [1], [0, 0, 1, 1], [], []>} : vector<32x8xbf16>, vector<8x32xbf16>, vector<32x32xf32> -> vector<32x32xf32>
      %c0_46 = arith.constant 0 : index
      %c0_47 = arith.constant 0 : index
      %82 = vector.load %arg17[%c0_46, %c0_47] : memref<16x32xf32, #tpu.memory_space<vmem>>, vector<16x32xf32>
      %83 = arith.truncf %74 : vector<32x16xf32> to vector<32x16xbf16>
      %84 = arith.truncf %82 : vector<16x32xf32> to vector<16x32xbf16>
      %cst_48 = arith.constant dense<0.000000e+00> : vector<32x32xf32>
      %85 = tpu.matmul %83, %84, %cst_48 {dimension_numbers = #tpu.dot_dimension_numbers<[1], [0], [0], [1], [0, 0, 1, 1], [], []>} : vector<32x16xbf16>, vector<16x32xbf16>, vector<32x32xf32> -> vector<32x32xf32>
      %86 = arith.addf %81, %85 : vector<32x32xf32>
      %c0_49 = arith.constant 0 : index
      %c0_50 = arith.constant 0 : index
      %87 = vector.load %arg18[%c0_49, %c0_50] : memref<1x32xf32, #tpu.memory_space<vmem>>, vector<1x32xf32>
      %88 = vector.broadcast %87 : vector<1x32xf32> to vector<32x32xf32>
      %89 = arith.addf %86, %88 : vector<32x32xf32>
      %90 = arith.negf %89 : vector<32x32xf32>
      %91 = math.exp %90 : vector<32x32xf32>
      %cst_51 = arith.constant 1.000000e+00 : f32
      %92 = vector.broadcast %cst_51 : f32 to vector<32x32xf32>
      %93 = arith.addf %92, %91 : vector<32x32xf32>
      %94 = arith.divf %92, %93 : vector<32x32xf32>
      %95 = arith.mulf %89, %94 : vector<32x32xf32>
      %c0_52 = arith.constant 0 : index
      %c0_53 = arith.constant 0 : index
      %96 = vector.load %arg19[%c0_52, %c0_53] : memref<32x8xf32, #tpu.memory_space<vmem>>, vector<32x8xf32>
      %97 = arith.truncf %95 : vector<32x32xf32> to vector<32x32xbf16>
      %98 = arith.truncf %96 : vector<32x8xf32> to vector<32x8xbf16>
      %cst_54 = arith.constant dense<0.000000e+00> : vector<32x8xf32>
      %99 = tpu.matmul %97, %98, %cst_54 {dimension_numbers = #tpu.dot_dimension_numbers<[1], [0], [0], [1], [0, 0, 1, 1], [], []>} : vector<32x32xbf16>, vector<32x8xbf16>, vector<32x8xf32> -> vector<32x8xf32>
      %100 = arith.addf %73, %99 : vector<32x8xf32>
      %c0_55 = arith.constant 0 : index
      %c0_56 = arith.constant 0 : index
      %101 = vector.load %arg20[%c0_55, %c0_56] : memref<1x8xf32, #tpu.memory_space<vmem>>, vector<1x8xf32>
      %102 = vector.broadcast %101 : vector<1x8xf32> to vector<32x8xf32>
      %103 = arith.addf %100, %102 : vector<32x8xf32>
      %104 = tpu.concatenate %77, %103 in 1 : vector<32x3xf32>, vector<32x8xf32> -> vector<32x11xf32>
      %c0_57 = arith.constant 0 : index
      %c0_58 = arith.constant 0 : index
      %105 = vector.load %arg21[%c0_57, %c0_58] : memref<32x11xf32, #tpu.memory_space<vmem>>, vector<32x11xf32>
      tpu.vector_store %arg21[%c0_57, %c0_58], %104 {strides = array<i32>} : memref<32x11xf32, #tpu.memory_space<vmem>>, vector<32x11xf32>,
    } else {
    }
    return
  }
  func.func @transform_0(%arg0: i32, %arg1: i32) -> (i32, i32) {
    %c0_i32 = arith.constant 0 : i32
    %c0_i32_0 = arith.constant 0 : i32
    return %arg1, %c0_i32 : i32, i32
  }
  func.func @transform_1(%arg0: i32, %arg1: i32) -> (i32, i32) {
    %c0_i32 = arith.constant 0 : i32
    %c0_i32_0 = arith.constant 0 : i32
    return %arg1, %c0_i32 : i32, i32
  }
  func.func @transform_2(%arg0: i32, %arg1: i32) -> (i32, i32) {
    %c0_i32 = arith.constant 0 : i32
    %c0_i32_0 = arith.constant 0 : i32
    return %c0_i32, %arg1 : i32, i32
  }
  func.func @transform_3(%arg0: i32, %arg1: i32) -> (i32, i32) {
    %c0_i32 = arith.constant 0 : i32
    %c0_i32_0 = arith.constant 0 : i32
    return %arg0, %c0_i32 : i32, i32
  }
  func.func @transform_4(%arg0: i32, %arg1: i32) -> (i32, i32) {
    %c0_i32 = arith.constant 0 : i32
    %c0_i32_0 = arith.constant 0 : i32
    return %arg0, %c0_i32 : i32, i32
  }
  func.func @transform_5(%arg0: i32, %arg1: i32) -> (i32, i32) {
    %c0_i32 = arith.constant 0 : i32
    %c0_i32_0 = arith.constant 0 : i32
    return %arg0, %c0_i32 : i32, i32
  }
  func.func @transform_6(%arg0: i32, %arg1: i32) -> (i32, i32) {
    %c0_i32 = arith.constant 0 : i32
    %c0_i32_0 = arith.constant 0 : i32
    %c0_i32_1 = arith.constant 0 : i32
    return %c0_i32, %c0_i32_0 : i32, i32
  }
  func.func @transform_7(%arg0: i32, %arg1: i32) -> (i32, i32) {
    %c0_i32 = arith.constant 0 : i32
    %c0_i32_0 = arith.constant 0 : i32
    %c0_i32_1 = arith.constant 0 : i32
    return %c0_i32, %c0_i32_0 : i32, i32
  }
  func.func @transform_8(%arg0: i32, %arg1: i32) -> (i32, i32) {
    %c0_i32 = arith.constant 0 : i32
    %c0_i32_0 = arith.constant 0 : i32
    %c0_i32_1 = arith.constant 0 : i32
    return %c0_i32, %c0_i32_0 : i32, i32
  }
  func.func @transform_9(%arg0: i32, %arg1: i32) -> (i32, i32) {
    %c0_i32 = arith.constant 0 : i32
    %c0_i32_0 = arith.constant 0 : i32
    %c0_i32_1 = arith.constant 0 : i32
    return %c0_i32, %c0_i32_0 : i32, i32
  }
  func.func @transform_10(%arg0: i32, %arg1: i32) -> (i32, i32) {
    %c0_i32 = arith.constant 0 : i32
    %c0_i32_0 = arith.constant 0 : i32
    %c0_i32_1 = arith.constant 0 : i32
    return %c0_i32, %c0_i32_0 : i32, i32
  }
  func.func @transform_11(%arg0: i32, %arg1: i32) -> (i32, i32) {
    %c0_i32 = arith.constant 0 : i32
    %c0_i32_0 = arith.constant 0 : i32
    %c0_i32_1 = arith.constant 0 : i32
    return %c0_i32, %c0_i32_0 : i32, i32
  }
  func.func @transform_12(%arg0: i32, %arg1: i32) -> (i32, i32) {
    %c0_i32 = arith.constant 0 : i32
    %c0_i32_0 = arith.constant 0 : i32
    %c0_i32_1 = arith.constant 0 : i32
    return %c0_i32, %c0_i32_0 : i32, i32
  }
  func.func @transform_13(%arg0: i32, %arg1: i32) -> (i32, i32) {
    %c0_i32 = arith.constant 0 : i32
    %c0_i32_0 = arith.constant 0 : i32
    %c0_i32_1 = arith.constant 0 : i32
    return %c0_i32, %c0_i32_0 : i32, i32
  }
  func.func @transform_14(%arg0: i32, %arg1: i32) -> (i32, i32) {
    %c0_i32 = arith.constant 0 : i32
    %c0_i32_0 = arith.constant 0 : i32
    %c0_i32_1 = arith.constant 0 : i32
    return %c0_i32, %c0_i32_0 : i32, i32
  }
  func.func @transform_15(%arg0: i32, %arg1: i32) -> (i32, i32) {
    %c0_i32 = arith.constant 0 : i32
    %c0_i32_0 = arith.constant 0 : i32
    %c0_i32_1 = arith.constant 0 : i32
    return %c0_i32, %c0_i32_0 : i32, i32
  }
  func.func @transform_16(%arg0: i32, %arg1: i32) -> (i32, i32) {
    %c0_i32 = arith.constant 0 : i32
    %c0_i32_0 = arith.constant 0 : i32
    %c0_i32_1 = arith.constant 0 : i32
    return %c0_i32, %c0_i32_0 : i32, i32
  }
  func.func @transform_17(%arg0: i32, %arg1: i32) -> (i32, i32) {
    %c0_i32 = arith.constant 0 : i32
    %c0_i32_0 = arith.constant 0 : i32
    %c0_i32_1 = arith.constant 0 : i32
    return %c0_i32, %c0_i32_0 : i32, i32
  }
  func.func @transform_18(%arg0: i32, %arg1: i32) -> (i32, i32) {
    %c0_i32 = arith.constant 0 : i32
    %c0_i32_0 = arith.constant 0 : i32
    %c0_i32_1 = arith.constant 0 : i32
    return %c0_i32, %c0_i32_0 : i32, i32
  }
  func.func @transform_19(%arg0: i32, %arg1: i32) -> (i32, i32) {
    %c0_i32 = arith.constant 0 : i32
    %c0_i32_0 = arith.constant 0 : i32
    return %arg0, %c0_i32 : i32, i32
  }
}

module attributes {stable_mosaic.version = 11 : i64} {
  func.func @_egnn_layer_kernel(%arg0: i32, %arg1: i32, %arg2: memref<64x21xbf16, #tpu.memory_space<vmem>>, %arg3: memref<64x3xf32, #tpu.memory_space<vmem>>, %arg4: memref<1x64xi32, #tpu.memory_space<vmem>>, %arg5: memref<16x1xi32, #tpu.memory_space<vmem>>, %arg6: memref<16x3xf32, #tpu.memory_space<vmem>>, %arg7: memref<16x8xf32, #tpu.memory_space<vmem>>, %arg8: memref<21x32xf32, #tpu.memory_space<vmem>>, %arg9: memref<1x32xf32, #tpu.memory_space<vmem>>, %arg10: memref<32x16xf32, #tpu.memory_space<vmem>>, %arg11: memref<1x16xf32, #tpu.memory_space<vmem>>, %arg12: memref<16x32xf32, #tpu.memory_space<vmem>>, %arg13: memref<1x32xf32, #tpu.memory_space<vmem>>, %arg14: memref<32x1xf32, #tpu.memory_space<vmem>>, %arg15: memref<1x1xf32, #tpu.memory_space<vmem>>, %arg16: memref<8x32xf32, #tpu.memory_space<vmem>>, %arg17: memref<16x32xf32, #tpu.memory_space<vmem>>, %arg18: memref<1x32xf32, #tpu.memory_space<vmem>>, %arg19: memref<32x8xf32, #tpu.memory_space<vmem>>, %arg20: memref<1x8xf32, #tpu.memory_space<vmem>>, %arg21: memref<16x11xf32, #tpu.memory_space<vmem>>, %arg22: memref<16x19xf32, #tpu.memory_space<vmem>>) attributes {dimension_semantics = [#tpu.dimension_semantics<parallel>, #tpu.dimension_semantics<arbitrary>], iteration_bounds = array<i64: 1, 1>, scalar_prefetch = 0 : i64, scratch_operands = 1 : i64, tpu.core_type = #tpu.core_type<tc>, window_params = [{transform_indices = @transform_0, window_bounds = array<i64: 64, 21>}, {transform_indices = @transform_1, window_bounds = array<i64: 64, 3>}, {transform_indices = @transform_2, window_bounds = array<i64: 1, 64>}, {transform_indices = @transform_3, window_bounds = array<i64: 16, 1>}, {transform_indices = @transform_4, window_bounds = array<i64: 16, 3>}, {transform_indices = @transform_5, window_bounds = array<i64: 16, 8>}, {pipeline_mode = #tpu.pipeline_mode<synchronous>, transform_indices = @transform_6, window_bounds = array<i64: 21, 32>}, {pipeline_mode = #tpu.pipeline_mode<synchronous>, transform_indices = @transform_7, window_bounds = array<i64: 1, 32>}, {pipeline_mode = #tpu.pipeline_mode<synchronous>, transform_indices = @transform_8, window_bounds = array<i64: 32, 16>}, {pipeline_mode = #tpu.pipeline_mode<synchronous>, transform_indices = @transform_9, window_bounds = array<i64: 1, 16>}, {pipeline_mode = #tpu.pipeline_mode<synchronous>, transform_indices = @transform_10, window_bounds = array<i64: 16, 32>}, {pipeline_mode = #tpu.pipeline_mode<synchronous>, transform_indices = @transform_11, window_bounds = array<i64: 1, 32>}, {pipeline_mode = #tpu.pipeline_mode<synchronous>, transform_indices = @transform_12, window_bounds = array<i64: 32, 1>}, {pipeline_mode = #tpu.pipeline_mode<synchronous>, transform_indices = @transform_13, window_bounds = array<i64: 1, 1>}, {pipeline_mode = #tpu.pipeline_mode<synchronous>, transform_indices = @transform_14, window_bounds = array<i64: 8, 32>}, {pipeline_mode = #tpu.pipeline_mode<synchronous>, transform_indices = @transform_15, window_bounds = array<i64: 16, 32>}, {pipeline_mode = #tpu.pipeline_mode<synchronous>, transform_indices = @transform_16, window_bounds = array<i64: 1, 32>}, {pipeline_mode = #tpu.pipeline_mode<synchronous>, transform_indices = @transform_17, window_bounds = array<i64: 32, 8>}, {pipeline_mode = #tpu.pipeline_mode<synchronous>, transform_indices = @transform_18, window_bounds = array<i64: 1, 8>}, {transform_indices = @transform_19, window_bounds = array<i64: 16, 11>}]} {
    %c0_i32 = arith.constant 0 : i32
    %0 = arith.cmpi eq, %arg1, %c0_i32 : i32
    %1 = arith.extui %0 : i1 to i32
    %c0_i32_0 = arith.constant 0 : i32
    %2 = arith.cmpi ne, %1, %c0_i32_0 : i32
    scf.if %2 {
      %cst_37 = arith.constant 0.000000e+00 : f32
      %72 = vector.broadcast %cst_37 : f32 to vector<16x19xf32>
      %c0_38 = arith.constant 0 : index
      %c0_39 = arith.constant 0 : index
      %73 = vector.load %arg22[%c0_38, %c0_39] : memref<16x19xf32, #tpu.memory_space<vmem>>, vector<16x19xf32>
      tpu.vector_store %arg22[%c0_38, %c0_39], %72 {strides = array<i32>} : memref<16x19xf32, #tpu.memory_space<vmem>>, vector<16x19xf32>,
    } else {
    }
    %c0 = arith.constant 0 : index
    %c0_1 = arith.constant 0 : index
    %3 = vector.load %arg2[%c0, %c0_1] : memref<64x21xbf16, #tpu.memory_space<vmem>>, vector<64x21xbf16>
    %c0_2 = arith.constant 0 : index
    %c0_3 = arith.constant 0 : index
    %4 = vector.load %arg8[%c0_2, %c0_3] : memref<21x32xf32, #tpu.memory_space<vmem>>, vector<21x32xf32>
    %5 = arith.truncf %4 : vector<21x32xf32> to vector<21x32xbf16>
    %cst = arith.constant dense<0.000000e+00> : vector<64x32xf32>
    %6 = tpu.matmul %3, %5, %cst {dimension_numbers = #tpu.dot_dimension_numbers<[1], [0], [0], [1], [0, 0, 1, 1], [], []>} : vector<64x21xbf16>, vector<21x32xbf16>, vector<64x32xf32> -> vector<64x32xf32>
    %c0_4 = arith.constant 0 : index
    %c0_5 = arith.constant 0 : index
    %7 = vector.load %arg9[%c0_4, %c0_5] : memref<1x32xf32, #tpu.memory_space<vmem>>, vector<1x32xf32>
    %8 = vector.broadcast %7 : vector<1x32xf32> to vector<64x32xf32>
    %9 = arith.addf %6, %8 : vector<64x32xf32>
    %10 = arith.negf %9 : vector<64x32xf32>
    %11 = math.exp %10 : vector<64x32xf32>
    %cst_6 = arith.constant 1.000000e+00 : f32
    %12 = vector.broadcast %cst_6 : f32 to vector<64x32xf32>
    %13 = arith.addf %12, %11 : vector<64x32xf32>
    %14 = arith.divf %12, %13 : vector<64x32xf32>
    %15 = arith.mulf %9, %14 : vector<64x32xf32>
    %c0_7 = arith.constant 0 : index
    %c0_8 = arith.constant 0 : index
    %16 = vector.load %arg10[%c0_7, %c0_8] : memref<32x16xf32, #tpu.memory_space<vmem>>, vector<32x16xf32>
    %17 = arith.truncf %15 : vector<64x32xf32> to vector<64x32xbf16>
    %18 = arith.truncf %16 : vector<32x16xf32> to vector<32x16xbf16>
    %cst_9 = arith.constant dense<0.000000e+00> : vector<64x16xf32>
    %19 = tpu.matmul %17, %18, %cst_9 {dimension_numbers = #tpu.dot_dimension_numbers<[1], [0], [0], [1], [0, 0, 1, 1], [], []>} : vector<64x32xbf16>, vector<32x16xbf16>, vector<64x16xf32> -> vector<64x16xf32>
    %c0_10 = arith.constant 0 : index
    %c0_11 = arith.constant 0 : index
    %20 = vector.load %arg11[%c0_10, %c0_11] : memref<1x16xf32, #tpu.memory_space<vmem>>, vector<1x16xf32>
    %21 = vector.broadcast %20 : vector<1x16xf32> to vector<64x16xf32>
    %22 = arith.addf %19, %21 : vector<64x16xf32>
    %23 = arith.negf %22 : vector<64x16xf32>
    %24 = math.exp %23 : vector<64x16xf32>
    %cst_12 = arith.constant 1.000000e+00 : f32
    %25 = vector.broadcast %cst_12 : f32 to vector<64x16xf32>
    %26 = arith.addf %25, %24 : vector<64x16xf32>
    %27 = arith.divf %25, %26 : vector<64x16xf32>
    %28 = arith.mulf %22, %27 : vector<64x16xf32>
    %c0_13 = arith.constant 0 : index
    %c0_14 = arith.constant 0 : index
    %29 = vector.load %arg5[%c0_13, %c0_14] : memref<16x1xi32, #tpu.memory_space<vmem>>, vector<16x1xi32>
    %30 = vector.shape_cast %29 : vector<16x1xi32> to vector<16x1xi32>
    %31 = vector.broadcast %30 : vector<16x1xi32> to vector<16x64xi32>
    %c0_15 = arith.constant 0 : index
    %c0_16 = arith.constant 0 : index
    %32 = vector.load %arg4[%c0_15, %c0_16] : memref<1x64xi32, #tpu.memory_space<vmem>>, vector<1x64xi32>
    %33 = vector.shape_cast %32 : vector<1x64xi32> to vector<1x64xi32>
    %34 = vector.broadcast %33 : vector<1x64xi32> to vector<16x64xi32>
    %35 = arith.cmpi eq, %31, %34 : vector<16x64xi32>
    %36 = arith.extui %35 : vector<16x64xi1> to vector<16x64xi32>
    %37 = arith.sitofp %36 : vector<16x64xi32> to vector<16x64xf32>
    %38 = arith.truncf %37 : vector<16x64xf32> to vector<16x64xbf16>
    %c0_17 = arith.constant 0 : index
    %c0_18 = arith.constant 0 : index
    %39 = vector.load %arg12[%c0_17, %c0_18] : memref<16x32xf32, #tpu.memory_space<vmem>>, vector<16x32xf32>
    %40 = arith.truncf %28 : vector<64x16xf32> to vector<64x16xbf16>
    %41 = arith.truncf %39 : vector<16x32xf32> to vector<16x32xbf16>
    %cst_19 = arith.constant dense<0.000000e+00> : vector<64x32xf32>
    %42 = tpu.matmul %40, %41, %cst_19 {dimension_numbers = #tpu.dot_dimension_numbers<[1], [0], [0], [1], [0, 0, 1, 1], [], []>} : vector<64x16xbf16>, vector<16x32xbf16>, vector<64x32xf32> -> vector<64x32xf32>
    %c0_20 = arith.constant 0 : index
    %c0_21 = arith.constant 0 : index
    %43 = vector.load %arg13[%c0_20, %c0_21] : memref<1x32xf32, #tpu.memory_space<vmem>>, vector<1x32xf32>
    %44 = vector.broadcast %43 : vector<1x32xf32> to vector<64x32xf32>
    %45 = arith.addf %42, %44 : vector<64x32xf32>
    %46 = arith.negf %45 : vector<64x32xf32>
    %47 = math.exp %46 : vector<64x32xf32>
    %cst_22 = arith.constant 1.000000e+00 : f32
    %48 = vector.broadcast %cst_22 : f32 to vector<64x32xf32>
    %49 = arith.addf %48, %47 : vector<64x32xf32>
    %50 = arith.divf %48, %49 : vector<64x32xf32>
    %51 = arith.mulf %45, %50 : vector<64x32xf32>
    %c0_23 = arith.constant 0 : index
    %c0_24 = arith.constant 0 : index
    %52 = vector.load %arg14[%c0_23, %c0_24] : memref<32x1xf32, #tpu.memory_space<vmem>>, vector<32x1xf32>
    %53 = arith.truncf %51 : vector<64x32xf32> to vector<64x32xbf16>
    %54 = arith.truncf %52 : vector<32x1xf32> to vector<32x1xbf16>
    %cst_25 = arith.constant dense<0.000000e+00> : vector<64x1xf32>
    %55 = tpu.matmul %53, %54, %cst_25 {dimension_numbers = #tpu.dot_dimension_numbers<[1], [0], [0], [1], [0, 0, 1, 1], [], []>} : vector<64x32xbf16>, vector<32x1xbf16>, vector<64x1xf32> -> vector<64x1xf32>
    %c0_26 = arith.constant 0 : index
    %c0_27 = arith.constant 0 : index
    %56 = vector.load %arg15[%c0_26, %c0_27] : memref<1x1xf32, #tpu.memory_space<vmem>>, vector<1x1xf32>
    %57 = vector.broadcast %56 : vector<1x1xf32> to vector<64x1xf32>
    %58 = arith.addf %55, %57 : vector<64x1xf32>
    %c0_28 = arith.constant 0 : index
    %c0_29 = arith.constant 0 : index
    %59 = vector.load %arg3[%c0_28, %c0_29] : memref<64x3xf32, #tpu.memory_space<vmem>>, vector<64x3xf32>
    %60 = vector.broadcast %58 : vector<64x1xf32> to vector<64x3xf32>
    %61 = arith.mulf %59, %60 : vector<64x3xf32>
    %62 = arith.truncf %28 : vector<64x16xf32> to vector<64x16xbf16>
    %63 = arith.truncf %61 : vector<64x3xf32> to vector<64x3xbf16>
    %64 = tpu.concatenate %62, %63 in 1 : vector<64x16xbf16>, vector<64x3xbf16> -> vector<64x19xbf16>
    %c0_30 = arith.constant 0 : index
    %c0_31 = arith.constant 0 : index
    %65 = vector.load %arg22[%c0_30, %c0_31] : memref<16x19xf32, #tpu.memory_space<vmem>>, vector<16x19xf32>
    %cst_32 = arith.constant dense<0.000000e+00> : vector<16x19xf32>
    %66 = tpu.matmul %38, %64, %cst_32 {dimension_numbers = #tpu.dot_dimension_numbers<[1], [0], [0], [1], [0, 0, 1, 1], [], []>} : vector<16x64xbf16>, vector<64x19xbf16>, vector<16x19xf32> -> vector<16x19xf32>
    %67 = arith.addf %65, %66 : vector<16x19xf32>
    %c0_33 = arith.constant 0 : index
    %c0_34 = arith.constant 0 : index
    %68 = vector.load %arg22[%c0_33, %c0_34] : memref<16x19xf32, #tpu.memory_space<vmem>>, vector<16x19xf32>
    tpu.vector_store %arg22[%c0_33, %c0_34], %67 {strides = array<i32>} : memref<16x19xf32, #tpu.memory_space<vmem>>, vector<16x19xf32>,
    %c0_i32_35 = arith.constant 0 : i32
    %69 = arith.cmpi eq, %arg1, %c0_i32_35 : i32
    %70 = arith.extui %69 : i1 to i32
    %c0_i32_36 = arith.constant 0 : i32
    %71 = arith.cmpi ne, %70, %c0_i32_36 : i32
    scf.if %71 {
      %c0_37 = arith.constant 0 : index
      %c0_38 = arith.constant 0 : index
      %72 = vector.load %arg22[%c0_37, %c0_38] : memref<16x19xf32, #tpu.memory_space<vmem>>, vector<16x19xf32>
      %c0_39 = arith.constant 0 : index
      %c0_40 = arith.constant 0 : index
      %73 = vector.load %arg7[%c0_39, %c0_40] : memref<16x8xf32, #tpu.memory_space<vmem>>, vector<16x8xf32>
      %74 = vector.extract_strided_slice %72 {offsets = [0, 0], sizes = [16, 16], strides = [1, 1]} : vector<16x19xf32> to vector<16x16xf32>
      %c0_41 = arith.constant 0 : index
      %c0_42 = arith.constant 0 : index
      %75 = vector.load %arg6[%c0_41, %c0_42] : memref<16x3xf32, #tpu.memory_space<vmem>>, vector<16x3xf32>
      %76 = vector.extract_strided_slice %72 {offsets = [0, 16], sizes = [16, 3], strides = [1, 1]} : vector<16x19xf32> to vector<16x3xf32>
      %77 = arith.addf %75, %76 : vector<16x3xf32>
      %c0_43 = arith.constant 0 : index
      %c0_44 = arith.constant 0 : index
      %78 = vector.load %arg16[%c0_43, %c0_44] : memref<8x32xf32, #tpu.memory_space<vmem>>, vector<8x32xf32>
      %79 = arith.truncf %73 : vector<16x8xf32> to vector<16x8xbf16>
      %80 = arith.truncf %78 : vector<8x32xf32> to vector<8x32xbf16>
      %cst_45 = arith.constant dense<0.000000e+00> : vector<16x32xf32>
      %81 = tpu.matmul %79, %80, %cst_45 {dimension_numbers = #tpu.dot_dimension_numbers<[1], [0], [0], [1], [0, 0, 1, 1], [], []>} : vector<16x8xbf16>, vector<8x32xbf16>, vector<16x32xf32> -> vector<16x32xf32>
      %c0_46 = arith.constant 0 : index
      %c0_47 = arith.constant 0 : index
      %82 = vector.load %arg17[%c0_46, %c0_47] : memref<16x32xf32, #tpu.memory_space<vmem>>, vector<16x32xf32>
      %83 = arith.truncf %74 : vector<16x16xf32> to vector<16x16xbf16>
      %84 = arith.truncf %82 : vector<16x32xf32> to vector<16x32xbf16>
      %cst_48 = arith.constant dense<0.000000e+00> : vector<16x32xf32>
      %85 = tpu.matmul %83, %84, %cst_48 {dimension_numbers = #tpu.dot_dimension_numbers<[1], [0], [0], [1], [0, 0, 1, 1], [], []>} : vector<16x16xbf16>, vector<16x32xbf16>, vector<16x32xf32> -> vector<16x32xf32>
      %86 = arith.addf %81, %85 : vector<16x32xf32>
      %c0_49 = arith.constant 0 : index
      %c0_50 = arith.constant 0 : index
      %87 = vector.load %arg18[%c0_49, %c0_50] : memref<1x32xf32, #tpu.memory_space<vmem>>, vector<1x32xf32>
      %88 = vector.broadcast %87 : vector<1x32xf32> to vector<16x32xf32>
      %89 = arith.addf %86, %88 : vector<16x32xf32>
      %90 = arith.negf %89 : vector<16x32xf32>
      %91 = math.exp %90 : vector<16x32xf32>
      %cst_51 = arith.constant 1.000000e+00 : f32
      %92 = vector.broadcast %cst_51 : f32 to vector<16x32xf32>
      %93 = arith.addf %92, %91 : vector<16x32xf32>
      %94 = arith.divf %92, %93 : vector<16x32xf32>
      %95 = arith.mulf %89, %94 : vector<16x32xf32>
      %c0_52 = arith.constant 0 : index
      %c0_53 = arith.constant 0 : index
      %96 = vector.load %arg19[%c0_52, %c0_53] : memref<32x8xf32, #tpu.memory_space<vmem>>, vector<32x8xf32>
      %97 = arith.truncf %95 : vector<16x32xf32> to vector<16x32xbf16>
      %98 = arith.truncf %96 : vector<32x8xf32> to vector<32x8xbf16>
      %cst_54 = arith.constant dense<0.000000e+00> : vector<16x8xf32>
      %99 = tpu.matmul %97, %98, %cst_54 {dimension_numbers = #tpu.dot_dimension_numbers<[1], [0], [0], [1], [0, 0, 1, 1], [], []>} : vector<16x32xbf16>, vector<32x8xbf16>, vector<16x8xf32> -> vector<16x8xf32>
      %100 = arith.addf %73, %99 : vector<16x8xf32>
      %c0_55 = arith.constant 0 : index
      %c0_56 = arith.constant 0 : index
      %101 = vector.load %arg20[%c0_55, %c0_56] : memref<1x8xf32, #tpu.memory_space<vmem>>, vector<1x8xf32>
      %102 = vector.broadcast %101 : vector<1x8xf32> to vector<16x8xf32>
      %103 = arith.addf %100, %102 : vector<16x8xf32>
      %104 = tpu.concatenate %77, %103 in 1 : vector<16x3xf32>, vector<16x8xf32> -> vector<16x11xf32>
      %c0_57 = arith.constant 0 : index
      %c0_58 = arith.constant 0 : index
      %105 = vector.load %arg21[%c0_57, %c0_58] : memref<16x11xf32, #tpu.memory_space<vmem>>, vector<16x11xf32>
      tpu.vector_store %arg21[%c0_57, %c0_58], %104 {strides = array<i32>} : memref<16x11xf32, #tpu.memory_space<vmem>>, vector<16x11xf32>,
    } else {
    }
    return
  }
  func.func @transform_0(%arg0: i32, %arg1: i32) -> (i32, i32) {
    %c0_i32 = arith.constant 0 : i32
    %c0_i32_0 = arith.constant 0 : i32
    return %arg1, %c0_i32 : i32, i32
  }
  func.func @transform_1(%arg0: i32, %arg1: i32) -> (i32, i32) {
    %c0_i32 = arith.constant 0 : i32
    %c0_i32_0 = arith.constant 0 : i32
    return %arg1, %c0_i32 : i32, i32
  }
  func.func @transform_2(%arg0: i32, %arg1: i32) -> (i32, i32) {
    %c0_i32 = arith.constant 0 : i32
    %c0_i32_0 = arith.constant 0 : i32
    return %c0_i32, %arg1 : i32, i32
  }
  func.func @transform_3(%arg0: i32, %arg1: i32) -> (i32, i32) {
    %c0_i32 = arith.constant 0 : i32
    %c0_i32_0 = arith.constant 0 : i32
    return %arg0, %c0_i32 : i32, i32
  }
  func.func @transform_4(%arg0: i32, %arg1: i32) -> (i32, i32) {
    %c0_i32 = arith.constant 0 : i32
    %c0_i32_0 = arith.constant 0 : i32
    return %arg0, %c0_i32 : i32, i32
  }
  func.func @transform_5(%arg0: i32, %arg1: i32) -> (i32, i32) {
    %c0_i32 = arith.constant 0 : i32
    %c0_i32_0 = arith.constant 0 : i32
    return %arg0, %c0_i32 : i32, i32
  }
  func.func @transform_6(%arg0: i32, %arg1: i32) -> (i32, i32) {
    %c0_i32 = arith.constant 0 : i32
    %c0_i32_0 = arith.constant 0 : i32
    %c0_i32_1 = arith.constant 0 : i32
    return %c0_i32, %c0_i32_0 : i32, i32
  }
  func.func @transform_7(%arg0: i32, %arg1: i32) -> (i32, i32) {
    %c0_i32 = arith.constant 0 : i32
    %c0_i32_0 = arith.constant 0 : i32
    %c0_i32_1 = arith.constant 0 : i32
    return %c0_i32, %c0_i32_0 : i32, i32
  }
  func.func @transform_8(%arg0: i32, %arg1: i32) -> (i32, i32) {
    %c0_i32 = arith.constant 0 : i32
    %c0_i32_0 = arith.constant 0 : i32
    %c0_i32_1 = arith.constant 0 : i32
    return %c0_i32, %c0_i32_0 : i32, i32
  }
  func.func @transform_9(%arg0: i32, %arg1: i32) -> (i32, i32) {
    %c0_i32 = arith.constant 0 : i32
    %c0_i32_0 = arith.constant 0 : i32
    %c0_i32_1 = arith.constant 0 : i32
    return %c0_i32, %c0_i32_0 : i32, i32
  }
  func.func @transform_10(%arg0: i32, %arg1: i32) -> (i32, i32) {
    %c0_i32 = arith.constant 0 : i32
    %c0_i32_0 = arith.constant 0 : i32
    %c0_i32_1 = arith.constant 0 : i32
    return %c0_i32, %c0_i32_0 : i32, i32
  }
  func.func @transform_11(%arg0: i32, %arg1: i32) -> (i32, i32) {
    %c0_i32 = arith.constant 0 : i32
    %c0_i32_0 = arith.constant 0 : i32
    %c0_i32_1 = arith.constant 0 : i32
    return %c0_i32, %c0_i32_0 : i32, i32
  }
  func.func @transform_12(%arg0: i32, %arg1: i32) -> (i32, i32) {
    %c0_i32 = arith.constant 0 : i32
    %c0_i32_0 = arith.constant 0 : i32
    %c0_i32_1 = arith.constant 0 : i32
    return %c0_i32, %c0_i32_0 : i32, i32
  }
  func.func @transform_13(%arg0: i32, %arg1: i32) -> (i32, i32) {
    %c0_i32 = arith.constant 0 : i32
    %c0_i32_0 = arith.constant 0 : i32
    %c0_i32_1 = arith.constant 0 : i32
    return %c0_i32, %c0_i32_0 : i32, i32
  }
  func.func @transform_14(%arg0: i32, %arg1: i32) -> (i32, i32) {
    %c0_i32 = arith.constant 0 : i32
    %c0_i32_0 = arith.constant 0 : i32
    %c0_i32_1 = arith.constant 0 : i32
    return %c0_i32, %c0_i32_0 : i32, i32
  }
  func.func @transform_15(%arg0: i32, %arg1: i32) -> (i32, i32) {
    %c0_i32 = arith.constant 0 : i32
    %c0_i32_0 = arith.constant 0 : i32
    %c0_i32_1 = arith.constant 0 : i32
    return %c0_i32, %c0_i32_0 : i32, i32
  }
  func.func @transform_16(%arg0: i32, %arg1: i32) -> (i32, i32) {
    %c0_i32 = arith.constant 0 : i32
    %c0_i32_0 = arith.constant 0 : i32
    %c0_i32_1 = arith.constant 0 : i32
    return %c0_i32, %c0_i32_0 : i32, i32
  }
  func.func @transform_17(%arg0: i32, %arg1: i32) -> (i32, i32) {
    %c0_i32 = arith.constant 0 : i32
    %c0_i32_0 = arith.constant 0 : i32
    %c0_i32_1 = arith.constant 0 : i32
    return %c0_i32, %c0_i32_0 : i32, i32
  }
  func.func @transform_18(%arg0: i32, %arg1: i32) -> (i32, i32) {
    %c0_i32 = arith.constant 0 : i32
    %c0_i32_0 = arith.constant 0 : i32
    %c0_i32_1 = arith.constant 0 : i32
    return %c0_i32, %c0_i32_0 : i32, i32
  }
  func.func @transform_19(%arg0: i32, %arg1: i32) -> (i32, i32) {
    %c0_i32 = arith.constant 0 : i32
    %c0_i32_0 = arith.constant 0 : i32
    return %arg0, %c0_i32 : i32, i32
  }
}

module attributes {stable_mosaic.version = 11 : i64} {
  func.func @_knn_interp_kernel(%arg0: i32, %arg1: memref<32x3xf32, #tpu.memory_space<vmem>>, %arg2: memref<32x8xf32, #tpu.memory_space<vmem>>, %arg3: memref<32x1xf32, #tpu.memory_space<vmem>>, %arg4: memref<32x1xi32, #tpu.memory_space<vmem>>, %arg5: memref<10x3xf32, #tpu.memory_space<vmem>>, %arg6: memref<10x8xf32, #tpu.memory_space<vmem>>, %arg7: memref<3x10xf32, #tpu.memory_space<vmem>>, %arg8: memref<8x10xf32, #tpu.memory_space<vmem>>, %arg9: memref<1x10xf32, #tpu.memory_space<vmem>>, %arg10: memref<1x10xi32, #tpu.memory_space<vmem>>, %arg11: memref<32x11xf32, #tpu.memory_space<vmem>>) attributes {dimension_semantics = [#tpu.dimension_semantics<parallel>], iteration_bounds = array<i64: 1>, scalar_prefetch = 0 : i64, scratch_operands = 0 : i64, tpu.core_type = #tpu.core_type<tc>, window_params = [{transform_indices = @transform_0, window_bounds = array<i64: 32, 3>}, {transform_indices = @transform_1, window_bounds = array<i64: 32, 8>}, {transform_indices = @transform_2, window_bounds = array<i64: 32, 1>}, {transform_indices = @transform_3, window_bounds = array<i64: 32, 1>}, {pipeline_mode = #tpu.pipeline_mode<synchronous>, transform_indices = @transform_4, window_bounds = array<i64: 10, 3>}, {pipeline_mode = #tpu.pipeline_mode<synchronous>, transform_indices = @transform_5, window_bounds = array<i64: 10, 8>}, {pipeline_mode = #tpu.pipeline_mode<synchronous>, transform_indices = @transform_6, window_bounds = array<i64: 3, 10>}, {pipeline_mode = #tpu.pipeline_mode<synchronous>, transform_indices = @transform_7, window_bounds = array<i64: 8, 10>}, {pipeline_mode = #tpu.pipeline_mode<synchronous>, transform_indices = @transform_8, window_bounds = array<i64: 1, 10>}, {pipeline_mode = #tpu.pipeline_mode<synchronous>, transform_indices = @transform_9, window_bounds = array<i64: 1, 10>}, {transform_indices = @transform_10, window_bounds = array<i64: 32, 11>}]} {
    %c0 = arith.constant 0 : index
    %c0_0 = arith.constant 0 : index
    %0 = vector.load %arg1[%c0, %c0_0] : memref<32x3xf32, #tpu.memory_space<vmem>>, vector<32x3xf32>
    %c0_1 = arith.constant 0 : index
    %c0_2 = arith.constant 0 : index
    %1 = vector.load %arg7[%c0_1, %c0_2] : memref<3x10xf32, #tpu.memory_space<vmem>>, vector<3x10xf32>
    %cst = arith.constant dense<0.000000e+00> : vector<32x10xf32>
    %2 = tpu.matmul %0, %1, %cst {dimension_numbers = #tpu.dot_dimension_numbers<[1], [0], [0], [1], [0, 0, 1, 1], [], []>} : vector<32x3xf32>, vector<3x10xf32>, vector<32x10xf32> -> vector<32x10xf32>
    %c0_3 = arith.constant 0 : index
    %c0_4 = arith.constant 0 : index
    %3 = vector.load %arg2[%c0_3, %c0_4] : memref<32x8xf32, #tpu.memory_space<vmem>>, vector<32x8xf32>
    %c0_5 = arith.constant 0 : index
    %c0_6 = arith.constant 0 : index
    %4 = vector.load %arg8[%c0_5, %c0_6] : memref<8x10xf32, #tpu.memory_space<vmem>>, vector<8x10xf32>
    %cst_7 = arith.constant dense<0.000000e+00> : vector<32x10xf32>
    %5 = tpu.matmul %3, %4, %cst_7 {dimension_numbers = #tpu.dot_dimension_numbers<[1], [0], [0], [1], [0, 0, 1, 1], [], []>} : vector<32x8xf32>, vector<8x10xf32>, vector<32x10xf32> -> vector<32x10xf32>
    %6 = arith.addf %2, %5 : vector<32x10xf32>
    %c0_8 = arith.constant 0 : index
    %c0_9 = arith.constant 0 : index
    %7 = vector.load %arg3[%c0_8, %c0_9] : memref<32x1xf32, #tpu.memory_space<vmem>>, vector<32x1xf32>
    %c0_10 = arith.constant 0 : index
    %c0_11 = arith.constant 0 : index
    %8 = vector.load %arg9[%c0_10, %c0_11] : memref<1x10xf32, #tpu.memory_space<vmem>>, vector<1x10xf32>
    %9 = vector.broadcast %7 : vector<32x1xf32> to vector<32x10xf32>
    %10 = vector.broadcast %8 : vector<1x10xf32> to vector<32x10xf32>
    %11 = arith.addf %9, %10 : vector<32x10xf32>
    %cst_12 = arith.constant 2.000000e+00 : f32
    %12 = vector.broadcast %cst_12 : f32 to vector<32x10xf32>
    %13 = arith.mulf %12, %6 : vector<32x10xf32>
    %14 = arith.subf %11, %13 : vector<32x10xf32>
    %c0_13 = arith.constant 0 : index
    %c0_14 = arith.constant 0 : index
    %15 = vector.load %arg4[%c0_13, %c0_14] : memref<32x1xi32, #tpu.memory_space<vmem>>, vector<32x1xi32>
    %c0_15 = arith.constant 0 : index
    %c0_16 = arith.constant 0 : index
    %16 = vector.load %arg10[%c0_15, %c0_16] : memref<1x10xi32, #tpu.memory_space<vmem>>, vector<1x10xi32>
    %17 = vector.broadcast %15 : vector<32x1xi32> to vector<32x10xi32>
    %18 = vector.broadcast %16 : vector<1x10xi32> to vector<32x10xi32>
    %19 = arith.cmpi eq, %17, %18 : vector<32x10xi32>
    %cst_17 = arith.constant 1.000000e-16 : f32
    %20 = vector.broadcast %cst_17 : f32 to vector<32x10xf32>
    %21 = arith.maximumf %14, %20 : vector<32x10xf32>
    %cst_18 = arith.constant 1.000000e+00 : f32
    %22 = vector.broadcast %cst_18 : f32 to vector<32x10xf32>
    %23 = arith.divf %22, %21 : vector<32x10xf32>
    %cst_19 = arith.constant 0.000000e+00 : f32
    %24 = vector.broadcast %cst_19 : f32 to vector<32x10xf32>
    %25 = arith.select %19, %23, %24 : vector<32x10xi1>, vector<32x10xf32>
    %cst_20 = arith.constant dense<0.000000e+00> : vector<32xf32>
    %26 = vector.multi_reduction <add>, %25, %cst_20 [1] : vector<32x10xf32> to vector<32xf32>
    %27 = vector.shape_cast %26 : vector<32xf32> to vector<32x1xf32>
    %cst_21 = arith.constant 1.000000e-30 : f32
    %28 = vector.broadcast %cst_21 : f32 to vector<32x1xf32>
    %29 = arith.maximumf %27, %28 : vector<32x1xf32>
    %30 = tpu.reciprocal %29 : vector<32x1xf32> -> vector<32x1xf32>
    %c0_22 = arith.constant 0 : index
    %c0_23 = arith.constant 0 : index
    %31 = vector.load %arg5[%c0_22, %c0_23] : memref<10x3xf32, #tpu.memory_space<vmem>>, vector<10x3xf32>
    %cst_24 = arith.constant dense<0.000000e+00> : vector<32x3xf32>
    %32 = tpu.matmul %25, %31, %cst_24 {dimension_numbers = #tpu.dot_dimension_numbers<[1], [0], [0], [1], [0, 0, 1, 1], [], []>} : vector<32x10xf32>, vector<10x3xf32>, vector<32x3xf32> -> vector<32x3xf32>
    %33 = vector.broadcast %30 : vector<32x1xf32> to vector<32x3xf32>
    %34 = arith.mulf %32, %33 : vector<32x3xf32>
    %c0_25 = arith.constant 0 : index
    %c0_26 = arith.constant 0 : index
    %35 = vector.load %arg6[%c0_25, %c0_26] : memref<10x8xf32, #tpu.memory_space<vmem>>, vector<10x8xf32>
    %cst_27 = arith.constant dense<0.000000e+00> : vector<32x8xf32>
    %36 = tpu.matmul %25, %35, %cst_27 {dimension_numbers = #tpu.dot_dimension_numbers<[1], [0], [0], [1], [0, 0, 1, 1], [], []>} : vector<32x10xf32>, vector<10x8xf32>, vector<32x8xf32> -> vector<32x8xf32>
    %37 = vector.broadcast %30 : vector<32x1xf32> to vector<32x8xf32>
    %38 = arith.mulf %36, %37 : vector<32x8xf32>
    %39 = tpu.concatenate %34, %38 in 1 : vector<32x3xf32>, vector<32x8xf32> -> vector<32x11xf32>
    %c0_28 = arith.constant 0 : index
    %c0_29 = arith.constant 0 : index
    %40 = vector.load %arg11[%c0_28, %c0_29] : memref<32x11xf32, #tpu.memory_space<vmem>>, vector<32x11xf32>
    tpu.vector_store %arg11[%c0_28, %c0_29], %39 {strides = array<i32>} : memref<32x11xf32, #tpu.memory_space<vmem>>, vector<32x11xf32>,
    return
  }
  func.func @transform_0(%arg0: i32) -> (i32, i32) {
    %c0_i32 = arith.constant 0 : i32
    %c0_i32_0 = arith.constant 0 : i32
    return %arg0, %c0_i32 : i32, i32
  }
  func.func @transform_1(%arg0: i32) -> (i32, i32) {
    %c0_i32 = arith.constant 0 : i32
    %c0_i32_0 = arith.constant 0 : i32
    return %arg0, %c0_i32 : i32, i32
  }
  func.func @transform_2(%arg0: i32) -> (i32, i32) {
    %c0_i32 = arith.constant 0 : i32
    %c0_i32_0 = arith.constant 0 : i32
    return %arg0, %c0_i32 : i32, i32
  }
  func.func @transform_3(%arg0: i32) -> (i32, i32) {
    %c0_i32 = arith.constant 0 : i32
    %c0_i32_0 = arith.constant 0 : i32
    return %arg0, %c0_i32 : i32, i32
  }
  func.func @transform_4(%arg0: i32) -> (i32, i32) {
    %c0_i32 = arith.constant 0 : i32
    %c0_i32_0 = arith.constant 0 : i32
    %c0_i32_1 = arith.constant 0 : i32
    return %c0_i32, %c0_i32_0 : i32, i32
  }
  func.func @transform_5(%arg0: i32) -> (i32, i32) {
    %c0_i32 = arith.constant 0 : i32
    %c0_i32_0 = arith.constant 0 : i32
    %c0_i32_1 = arith.constant 0 : i32
    return %c0_i32, %c0_i32_0 : i32, i32
  }
  func.func @transform_6(%arg0: i32) -> (i32, i32) {
    %c0_i32 = arith.constant 0 : i32
    %c0_i32_0 = arith.constant 0 : i32
    %c0_i32_1 = arith.constant 0 : i32
    return %c0_i32, %c0_i32_0 : i32, i32
  }
  func.func @transform_7(%arg0: i32) -> (i32, i32) {
    %c0_i32 = arith.constant 0 : i32
    %c0_i32_0 = arith.constant 0 : i32
    %c0_i32_1 = arith.constant 0 : i32
    return %c0_i32, %c0_i32_0 : i32, i32
  }
  func.func @transform_8(%arg0: i32) -> (i32, i32) {
    %c0_i32 = arith.constant 0 : i32
    %c0_i32_0 = arith.constant 0 : i32
    %c0_i32_1 = arith.constant 0 : i32
    return %c0_i32, %c0_i32_0 : i32, i32
  }
  func.func @transform_9(%arg0: i32) -> (i32, i32) {
    %c0_i32 = arith.constant 0 : i32
    %c0_i32_0 = arith.constant 0 : i32
    %c0_i32_1 = arith.constant 0 : i32
    return %c0_i32, %c0_i32_0 : i32, i32
  }
  func.func @transform_10(%arg0: i32) -> (i32, i32) {
    %c0_i32 = arith.constant 0 : i32
    %c0_i32_0 = arith.constant 0 : i32
    return %arg0, %c0_i32 : i32, i32
  }
}

module attributes {stable_mosaic.version = 11 : i64} {
  func.func @_egnn_layer_kernel(%arg0: i32, %arg1: i32, %arg2: memref<64x21xbf16, #tpu.memory_space<vmem>>, %arg3: memref<64x3xf32, #tpu.memory_space<vmem>>, %arg4: memref<1x64xi32, #tpu.memory_space<vmem>>, %arg5: memref<32x1xi32, #tpu.memory_space<vmem>>, %arg6: memref<32x3xf32, #tpu.memory_space<vmem>>, %arg7: memref<32x8xf32, #tpu.memory_space<vmem>>, %arg8: memref<21x32xf32, #tpu.memory_space<vmem>>, %arg9: memref<1x32xf32, #tpu.memory_space<vmem>>, %arg10: memref<32x16xf32, #tpu.memory_space<vmem>>, %arg11: memref<1x16xf32, #tpu.memory_space<vmem>>, %arg12: memref<16x32xf32, #tpu.memory_space<vmem>>, %arg13: memref<1x32xf32, #tpu.memory_space<vmem>>, %arg14: memref<32x1xf32, #tpu.memory_space<vmem>>, %arg15: memref<1x1xf32, #tpu.memory_space<vmem>>, %arg16: memref<8x32xf32, #tpu.memory_space<vmem>>, %arg17: memref<16x32xf32, #tpu.memory_space<vmem>>, %arg18: memref<1x32xf32, #tpu.memory_space<vmem>>, %arg19: memref<32x8xf32, #tpu.memory_space<vmem>>, %arg20: memref<1x8xf32, #tpu.memory_space<vmem>>, %arg21: memref<32x11xf32, #tpu.memory_space<vmem>>, %arg22: memref<32x16xf32, #tpu.memory_space<vmem>>) attributes {dimension_semantics = [#tpu.dimension_semantics<parallel>, #tpu.dimension_semantics<arbitrary>], iteration_bounds = array<i64: 1, 1>, scalar_prefetch = 0 : i64, scratch_operands = 1 : i64, tpu.core_type = #tpu.core_type<tc>, window_params = [{transform_indices = @transform_0, window_bounds = array<i64: 64, 21>}, {transform_indices = @transform_1, window_bounds = array<i64: 64, 3>}, {transform_indices = @transform_2, window_bounds = array<i64: 1, 64>}, {transform_indices = @transform_3, window_bounds = array<i64: 32, 1>}, {transform_indices = @transform_4, window_bounds = array<i64: 32, 3>}, {transform_indices = @transform_5, window_bounds = array<i64: 32, 8>}, {pipeline_mode = #tpu.pipeline_mode<synchronous>, transform_indices = @transform_6, window_bounds = array<i64: 21, 32>}, {pipeline_mode = #tpu.pipeline_mode<synchronous>, transform_indices = @transform_7, window_bounds = array<i64: 1, 32>}, {pipeline_mode = #tpu.pipeline_mode<synchronous>, transform_indices = @transform_8, window_bounds = array<i64: 32, 16>}, {pipeline_mode = #tpu.pipeline_mode<synchronous>, transform_indices = @transform_9, window_bounds = array<i64: 1, 16>}, {pipeline_mode = #tpu.pipeline_mode<synchronous>, transform_indices = @transform_10, window_bounds = array<i64: 16, 32>}, {pipeline_mode = #tpu.pipeline_mode<synchronous>, transform_indices = @transform_11, window_bounds = array<i64: 1, 32>}, {pipeline_mode = #tpu.pipeline_mode<synchronous>, transform_indices = @transform_12, window_bounds = array<i64: 32, 1>}, {pipeline_mode = #tpu.pipeline_mode<synchronous>, transform_indices = @transform_13, window_bounds = array<i64: 1, 1>}, {pipeline_mode = #tpu.pipeline_mode<synchronous>, transform_indices = @transform_14, window_bounds = array<i64: 8, 32>}, {pipeline_mode = #tpu.pipeline_mode<synchronous>, transform_indices = @transform_15, window_bounds = array<i64: 16, 32>}, {pipeline_mode = #tpu.pipeline_mode<synchronous>, transform_indices = @transform_16, window_bounds = array<i64: 1, 32>}, {pipeline_mode = #tpu.pipeline_mode<synchronous>, transform_indices = @transform_17, window_bounds = array<i64: 32, 8>}, {pipeline_mode = #tpu.pipeline_mode<synchronous>, transform_indices = @transform_18, window_bounds = array<i64: 1, 8>}, {transform_indices = @transform_19, window_bounds = array<i64: 32, 11>}]} {
    %c0_i32 = arith.constant 0 : i32
    %0 = arith.cmpi eq, %arg1, %c0_i32 : i32
    %1 = arith.extui %0 : i1 to i32
    %c0_i32_0 = arith.constant 0 : i32
    %2 = arith.cmpi ne, %1, %c0_i32_0 : i32
    scf.if %2 {
      %cst_24 = arith.constant 0.000000e+00 : f32
      %47 = vector.broadcast %cst_24 : f32 to vector<32x16xf32>
      %c0_25 = arith.constant 0 : index
      %c0_26 = arith.constant 0 : index
      %48 = vector.load %arg22[%c0_25, %c0_26] : memref<32x16xf32, #tpu.memory_space<vmem>>, vector<32x16xf32>
      tpu.vector_store %arg22[%c0_25, %c0_26], %47 {strides = array<i32>} : memref<32x16xf32, #tpu.memory_space<vmem>>, vector<32x16xf32>,
    } else {
    }
    %c0 = arith.constant 0 : index
    %c0_1 = arith.constant 0 : index
    %3 = vector.load %arg2[%c0, %c0_1] : memref<64x21xbf16, #tpu.memory_space<vmem>>, vector<64x21xbf16>
    %c0_2 = arith.constant 0 : index
    %c0_3 = arith.constant 0 : index
    %4 = vector.load %arg8[%c0_2, %c0_3] : memref<21x32xf32, #tpu.memory_space<vmem>>, vector<21x32xf32>
    %5 = arith.truncf %4 : vector<21x32xf32> to vector<21x32xbf16>
    %cst = arith.constant dense<0.000000e+00> : vector<64x32xf32>
    %6 = tpu.matmul %3, %5, %cst {dimension_numbers = #tpu.dot_dimension_numbers<[1], [0], [0], [1], [0, 0, 1, 1], [], []>} : vector<64x21xbf16>, vector<21x32xbf16>, vector<64x32xf32> -> vector<64x32xf32>
    %c0_4 = arith.constant 0 : index
    %c0_5 = arith.constant 0 : index
    %7 = vector.load %arg9[%c0_4, %c0_5] : memref<1x32xf32, #tpu.memory_space<vmem>>, vector<1x32xf32>
    %8 = vector.broadcast %7 : vector<1x32xf32> to vector<64x32xf32>
    %9 = arith.addf %6, %8 : vector<64x32xf32>
    %10 = arith.negf %9 : vector<64x32xf32>
    %11 = math.exp %10 : vector<64x32xf32>
    %cst_6 = arith.constant 1.000000e+00 : f32
    %12 = vector.broadcast %cst_6 : f32 to vector<64x32xf32>
    %13 = arith.addf %12, %11 : vector<64x32xf32>
    %14 = arith.divf %12, %13 : vector<64x32xf32>
    %15 = arith.mulf %9, %14 : vector<64x32xf32>
    %c0_7 = arith.constant 0 : index
    %c0_8 = arith.constant 0 : index
    %16 = vector.load %arg10[%c0_7, %c0_8] : memref<32x16xf32, #tpu.memory_space<vmem>>, vector<32x16xf32>
    %17 = arith.truncf %15 : vector<64x32xf32> to vector<64x32xbf16>
    %18 = arith.truncf %16 : vector<32x16xf32> to vector<32x16xbf16>
    %cst_9 = arith.constant dense<0.000000e+00> : vector<64x16xf32>
    %19 = tpu.matmul %17, %18, %cst_9 {dimension_numbers = #tpu.dot_dimension_numbers<[1], [0], [0], [1], [0, 0, 1, 1], [], []>} : vector<64x32xbf16>, vector<32x16xbf16>, vector<64x16xf32> -> vector<64x16xf32>
    %c0_10 = arith.constant 0 : index
    %c0_11 = arith.constant 0 : index
    %20 = vector.load %arg11[%c0_10, %c0_11] : memref<1x16xf32, #tpu.memory_space<vmem>>, vector<1x16xf32>
    %21 = vector.broadcast %20 : vector<1x16xf32> to vector<64x16xf32>
    %22 = arith.addf %19, %21 : vector<64x16xf32>
    %23 = arith.negf %22 : vector<64x16xf32>
    %24 = math.exp %23 : vector<64x16xf32>
    %cst_12 = arith.constant 1.000000e+00 : f32
    %25 = vector.broadcast %cst_12 : f32 to vector<64x16xf32>
    %26 = arith.addf %25, %24 : vector<64x16xf32>
    %27 = arith.divf %25, %26 : vector<64x16xf32>
    %28 = arith.mulf %22, %27 : vector<64x16xf32>
    %c0_13 = arith.constant 0 : index
    %c0_14 = arith.constant 0 : index
    %29 = vector.load %arg5[%c0_13, %c0_14] : memref<32x1xi32, #tpu.memory_space<vmem>>, vector<32x1xi32>
    %30 = vector.shape_cast %29 : vector<32x1xi32> to vector<32x1xi32>
    %31 = vector.broadcast %30 : vector<32x1xi32> to vector<32x64xi32>
    %c0_15 = arith.constant 0 : index
    %c0_16 = arith.constant 0 : index
    %32 = vector.load %arg4[%c0_15, %c0_16] : memref<1x64xi32, #tpu.memory_space<vmem>>, vector<1x64xi32>
    %33 = vector.shape_cast %32 : vector<1x64xi32> to vector<1x64xi32>
    %34 = vector.broadcast %33 : vector<1x64xi32> to vector<32x64xi32>
    %35 = arith.cmpi eq, %31, %34 : vector<32x64xi32>
    %36 = arith.extui %35 : vector<32x64xi1> to vector<32x64xi32>
    %37 = arith.sitofp %36 : vector<32x64xi32> to vector<32x64xf32>
    %38 = arith.truncf %37 : vector<32x64xf32> to vector<32x64xbf16>
    %39 = arith.truncf %28 : vector<64x16xf32> to vector<64x16xbf16>
    %c0_17 = arith.constant 0 : index
    %c0_18 = arith.constant 0 : index
    %40 = vector.load %arg22[%c0_17, %c0_18] : memref<32x16xf32, #tpu.memory_space<vmem>>, vector<32x16xf32>
    %cst_19 = arith.constant dense<0.000000e+00> : vector<32x16xf32>
    %41 = tpu.matmul %38, %39, %cst_19 {dimension_numbers = #tpu.dot_dimension_numbers<[1], [0], [0], [1], [0, 0, 1, 1], [], []>} : vector<32x64xbf16>, vector<64x16xbf16>, vector<32x16xf32> -> vector<32x16xf32>
    %42 = arith.addf %40, %41 : vector<32x16xf32>
    %c0_20 = arith.constant 0 : index
    %c0_21 = arith.constant 0 : index
    %43 = vector.load %arg22[%c0_20, %c0_21] : memref<32x16xf32, #tpu.memory_space<vmem>>, vector<32x16xf32>
    tpu.vector_store %arg22[%c0_20, %c0_21], %42 {strides = array<i32>} : memref<32x16xf32, #tpu.memory_space<vmem>>, vector<32x16xf32>,
    %c0_i32_22 = arith.constant 0 : i32
    %44 = arith.cmpi eq, %arg1, %c0_i32_22 : i32
    %45 = arith.extui %44 : i1 to i32
    %c0_i32_23 = arith.constant 0 : i32
    %46 = arith.cmpi ne, %45, %c0_i32_23 : i32
    scf.if %46 {
      %c0_24 = arith.constant 0 : index
      %c0_25 = arith.constant 0 : index
      %47 = vector.load %arg22[%c0_24, %c0_25] : memref<32x16xf32, #tpu.memory_space<vmem>>, vector<32x16xf32>
      %c0_26 = arith.constant 0 : index
      %c0_27 = arith.constant 0 : index
      %48 = vector.load %arg7[%c0_26, %c0_27] : memref<32x8xf32, #tpu.memory_space<vmem>>, vector<32x8xf32>
      %c0_28 = arith.constant 0 : index
      %c0_29 = arith.constant 0 : index
      %49 = vector.load %arg6[%c0_28, %c0_29] : memref<32x3xf32, #tpu.memory_space<vmem>>, vector<32x3xf32>
      %c0_30 = arith.constant 0 : index
      %c0_31 = arith.constant 0 : index
      %50 = vector.load %arg16[%c0_30, %c0_31] : memref<8x32xf32, #tpu.memory_space<vmem>>, vector<8x32xf32>
      %51 = arith.truncf %48 : vector<32x8xf32> to vector<32x8xbf16>
      %52 = arith.truncf %50 : vector<8x32xf32> to vector<8x32xbf16>
      %cst_32 = arith.constant dense<0.000000e+00> : vector<32x32xf32>
      %53 = tpu.matmul %51, %52, %cst_32 {dimension_numbers = #tpu.dot_dimension_numbers<[1], [0], [0], [1], [0, 0, 1, 1], [], []>} : vector<32x8xbf16>, vector<8x32xbf16>, vector<32x32xf32> -> vector<32x32xf32>
      %c0_33 = arith.constant 0 : index
      %c0_34 = arith.constant 0 : index
      %54 = vector.load %arg17[%c0_33, %c0_34] : memref<16x32xf32, #tpu.memory_space<vmem>>, vector<16x32xf32>
      %55 = arith.truncf %47 : vector<32x16xf32> to vector<32x16xbf16>
      %56 = arith.truncf %54 : vector<16x32xf32> to vector<16x32xbf16>
      %cst_35 = arith.constant dense<0.000000e+00> : vector<32x32xf32>
      %57 = tpu.matmul %55, %56, %cst_35 {dimension_numbers = #tpu.dot_dimension_numbers<[1], [0], [0], [1], [0, 0, 1, 1], [], []>} : vector<32x16xbf16>, vector<16x32xbf16>, vector<32x32xf32> -> vector<32x32xf32>
      %58 = arith.addf %53, %57 : vector<32x32xf32>
      %c0_36 = arith.constant 0 : index
      %c0_37 = arith.constant 0 : index
      %59 = vector.load %arg18[%c0_36, %c0_37] : memref<1x32xf32, #tpu.memory_space<vmem>>, vector<1x32xf32>
      %60 = vector.broadcast %59 : vector<1x32xf32> to vector<32x32xf32>
      %61 = arith.addf %58, %60 : vector<32x32xf32>
      %62 = arith.negf %61 : vector<32x32xf32>
      %63 = math.exp %62 : vector<32x32xf32>
      %cst_38 = arith.constant 1.000000e+00 : f32
      %64 = vector.broadcast %cst_38 : f32 to vector<32x32xf32>
      %65 = arith.addf %64, %63 : vector<32x32xf32>
      %66 = arith.divf %64, %65 : vector<32x32xf32>
      %67 = arith.mulf %61, %66 : vector<32x32xf32>
      %c0_39 = arith.constant 0 : index
      %c0_40 = arith.constant 0 : index
      %68 = vector.load %arg19[%c0_39, %c0_40] : memref<32x8xf32, #tpu.memory_space<vmem>>, vector<32x8xf32>
      %69 = arith.truncf %67 : vector<32x32xf32> to vector<32x32xbf16>
      %70 = arith.truncf %68 : vector<32x8xf32> to vector<32x8xbf16>
      %cst_41 = arith.constant dense<0.000000e+00> : vector<32x8xf32>
      %71 = tpu.matmul %69, %70, %cst_41 {dimension_numbers = #tpu.dot_dimension_numbers<[1], [0], [0], [1], [0, 0, 1, 1], [], []>} : vector<32x32xbf16>, vector<32x8xbf16>, vector<32x8xf32> -> vector<32x8xf32>
      %72 = arith.addf %48, %71 : vector<32x8xf32>
      %c0_42 = arith.constant 0 : index
      %c0_43 = arith.constant 0 : index
      %73 = vector.load %arg20[%c0_42, %c0_43] : memref<1x8xf32, #tpu.memory_space<vmem>>, vector<1x8xf32>
      %74 = vector.broadcast %73 : vector<1x8xf32> to vector<32x8xf32>
      %75 = arith.addf %72, %74 : vector<32x8xf32>
      %76 = tpu.concatenate %49, %75 in 1 : vector<32x3xf32>, vector<32x8xf32> -> vector<32x11xf32>
      %c0_44 = arith.constant 0 : index
      %c0_45 = arith.constant 0 : index
      %77 = vector.load %arg21[%c0_44, %c0_45] : memref<32x11xf32, #tpu.memory_space<vmem>>, vector<32x11xf32>
      tpu.vector_store %arg21[%c0_44, %c0_45], %76 {strides = array<i32>} : memref<32x11xf32, #tpu.memory_space<vmem>>, vector<32x11xf32>,
    } else {
    }
    return
  }
  func.func @transform_0(%arg0: i32, %arg1: i32) -> (i32, i32) {
    %c0_i32 = arith.constant 0 : i32
    %c0_i32_0 = arith.constant 0 : i32
    return %arg1, %c0_i32 : i32, i32
  }
  func.func @transform_1(%arg0: i32, %arg1: i32) -> (i32, i32) {
    %c0_i32 = arith.constant 0 : i32
    %c0_i32_0 = arith.constant 0 : i32
    return %arg1, %c0_i32 : i32, i32
  }
  func.func @transform_2(%arg0: i32, %arg1: i32) -> (i32, i32) {
    %c0_i32 = arith.constant 0 : i32
    %c0_i32_0 = arith.constant 0 : i32
    return %c0_i32, %arg1 : i32, i32
  }
  func.func @transform_3(%arg0: i32, %arg1: i32) -> (i32, i32) {
    %c0_i32 = arith.constant 0 : i32
    %c0_i32_0 = arith.constant 0 : i32
    return %arg0, %c0_i32 : i32, i32
  }
  func.func @transform_4(%arg0: i32, %arg1: i32) -> (i32, i32) {
    %c0_i32 = arith.constant 0 : i32
    %c0_i32_0 = arith.constant 0 : i32
    return %arg0, %c0_i32 : i32, i32
  }
  func.func @transform_5(%arg0: i32, %arg1: i32) -> (i32, i32) {
    %c0_i32 = arith.constant 0 : i32
    %c0_i32_0 = arith.constant 0 : i32
    return %arg0, %c0_i32 : i32, i32
  }
  func.func @transform_6(%arg0: i32, %arg1: i32) -> (i32, i32) {
    %c0_i32 = arith.constant 0 : i32
    %c0_i32_0 = arith.constant 0 : i32
    %c0_i32_1 = arith.constant 0 : i32
    return %c0_i32, %c0_i32_0 : i32, i32
  }
  func.func @transform_7(%arg0: i32, %arg1: i32) -> (i32, i32) {
    %c0_i32 = arith.constant 0 : i32
    %c0_i32_0 = arith.constant 0 : i32
    %c0_i32_1 = arith.constant 0 : i32
    return %c0_i32, %c0_i32_0 : i32, i32
  }
  func.func @transform_8(%arg0: i32, %arg1: i32) -> (i32, i32) {
    %c0_i32 = arith.constant 0 : i32
    %c0_i32_0 = arith.constant 0 : i32
    %c0_i32_1 = arith.constant 0 : i32
    return %c0_i32, %c0_i32_0 : i32, i32
  }
  func.func @transform_9(%arg0: i32, %arg1: i32) -> (i32, i32) {
    %c0_i32 = arith.constant 0 : i32
    %c0_i32_0 = arith.constant 0 : i32
    %c0_i32_1 = arith.constant 0 : i32
    return %c0_i32, %c0_i32_0 : i32, i32
  }
  func.func @transform_10(%arg0: i32, %arg1: i32) -> (i32, i32) {
    %c0_i32 = arith.constant 0 : i32
    %c0_i32_0 = arith.constant 0 : i32
    %c0_i32_1 = arith.constant 0 : i32
    return %c0_i32, %c0_i32_0 : i32, i32
  }
  func.func @transform_11(%arg0: i32, %arg1: i32) -> (i32, i32) {
    %c0_i32 = arith.constant 0 : i32
    %c0_i32_0 = arith.constant 0 : i32
    %c0_i32_1 = arith.constant 0 : i32
    return %c0_i32, %c0_i32_0 : i32, i32
  }
  func.func @transform_12(%arg0: i32, %arg1: i32) -> (i32, i32) {
    %c0_i32 = arith.constant 0 : i32
    %c0_i32_0 = arith.constant 0 : i32
    %c0_i32_1 = arith.constant 0 : i32
    return %c0_i32, %c0_i32_0 : i32, i32
  }
  func.func @transform_13(%arg0: i32, %arg1: i32) -> (i32, i32) {
    %c0_i32 = arith.constant 0 : i32
    %c0_i32_0 = arith.constant 0 : i32
    %c0_i32_1 = arith.constant 0 : i32
    return %c0_i32, %c0_i32_0 : i32, i32
  }
  func.func @transform_14(%arg0: i32, %arg1: i32) -> (i32, i32) {
    %c0_i32 = arith.constant 0 : i32
    %c0_i32_0 = arith.constant 0 : i32
    %c0_i32_1 = arith.constant 0 : i32
    return %c0_i32, %c0_i32_0 : i32, i32
  }
  func.func @transform_15(%arg0: i32, %arg1: i32) -> (i32, i32) {
    %c0_i32 = arith.constant 0 : i32
    %c0_i32_0 = arith.constant 0 : i32
    %c0_i32_1 = arith.constant 0 : i32
    return %c0_i32, %c0_i32_0 : i32, i32
  }
  func.func @transform_16(%arg0: i32, %arg1: i32) -> (i32, i32) {
    %c0_i32 = arith.constant 0 : i32
    %c0_i32_0 = arith.constant 0 : i32
    %c0_i32_1 = arith.constant 0 : i32
    return %c0_i32, %c0_i32_0 : i32, i32
  }
  func.func @transform_17(%arg0: i32, %arg1: i32) -> (i32, i32) {
    %c0_i32 = arith.constant 0 : i32
    %c0_i32_0 = arith.constant 0 : i32
    %c0_i32_1 = arith.constant 0 : i32
    return %c0_i32, %c0_i32_0 : i32, i32
  }
  func.func @transform_18(%arg0: i32, %arg1: i32) -> (i32, i32) {
    %c0_i32 = arith.constant 0 : i32
    %c0_i32_0 = arith.constant 0 : i32
    %c0_i32_1 = arith.constant 0 : i32
    return %c0_i32, %c0_i32_0 : i32, i32
  }
  func.func @transform_19(%arg0: i32, %arg1: i32) -> (i32, i32) {
    %c0_i32 = arith.constant 0 : i32
    %c0_i32_0 = arith.constant 0 : i32
    return %arg0, %c0_i32 : i32, i32
  }
}

module attributes {stable_mosaic.version = 11 : i64} {
  func.func @_mlp_kernel(%arg0: i32, %arg1: memref<32x8xbf16, #tpu.memory_space<vmem>>, %arg2: memref<8x32xf32, #tpu.memory_space<vmem>>, %arg3: memref<1x32xf32, #tpu.memory_space<vmem>>, %arg4: memref<32x32xf32, #tpu.memory_space<vmem>>, %arg5: memref<1x32xf32, #tpu.memory_space<vmem>>, %arg6: memref<32x3xf32, #tpu.memory_space<vmem>>, %arg7: memref<1x3xf32, #tpu.memory_space<vmem>>, %arg8: memref<32x3xf32, #tpu.memory_space<vmem>>) attributes {dimension_semantics = [#tpu.dimension_semantics<parallel>], iteration_bounds = array<i64: 1>, scalar_prefetch = 0 : i64, scratch_operands = 0 : i64, tpu.core_type = #tpu.core_type<tc>, window_params = [{transform_indices = @transform_0, window_bounds = array<i64: 32, 8>}, {pipeline_mode = #tpu.pipeline_mode<synchronous>, transform_indices = @transform_1, window_bounds = array<i64: 8, 32>}, {pipeline_mode = #tpu.pipeline_mode<synchronous>, transform_indices = @transform_2, window_bounds = array<i64: 1, 32>}, {pipeline_mode = #tpu.pipeline_mode<synchronous>, transform_indices = @transform_3, window_bounds = array<i64: 32, 32>}, {pipeline_mode = #tpu.pipeline_mode<synchronous>, transform_indices = @transform_4, window_bounds = array<i64: 1, 32>}, {pipeline_mode = #tpu.pipeline_mode<synchronous>, transform_indices = @transform_5, window_bounds = array<i64: 32, 3>}, {pipeline_mode = #tpu.pipeline_mode<synchronous>, transform_indices = @transform_6, window_bounds = array<i64: 1, 3>}, {transform_indices = @transform_7, window_bounds = array<i64: 32, 3>}]} {
    %c0 = arith.constant 0 : index
    %c0_0 = arith.constant 0 : index
    %0 = vector.load %arg1[%c0, %c0_0] : memref<32x8xbf16, #tpu.memory_space<vmem>>, vector<32x8xbf16>
    %c0_1 = arith.constant 0 : index
    %c0_2 = arith.constant 0 : index
    %1 = vector.load %arg2[%c0_1, %c0_2] : memref<8x32xf32, #tpu.memory_space<vmem>>, vector<8x32xf32>
    %2 = arith.truncf %1 : vector<8x32xf32> to vector<8x32xbf16>
    %cst = arith.constant dense<0.000000e+00> : vector<32x32xf32>
    %3 = tpu.matmul %0, %2, %cst {dimension_numbers = #tpu.dot_dimension_numbers<[1], [0], [0], [1], [0, 0, 1, 1], [], []>} : vector<32x8xbf16>, vector<8x32xbf16>, vector<32x32xf32> -> vector<32x32xf32>
    %c0_3 = arith.constant 0 : index
    %c0_4 = arith.constant 0 : index
    %4 = vector.load %arg3[%c0_3, %c0_4] : memref<1x32xf32, #tpu.memory_space<vmem>>, vector<1x32xf32>
    %5 = vector.broadcast %4 : vector<1x32xf32> to vector<32x32xf32>
    %6 = arith.addf %3, %5 : vector<32x32xf32>
    %cst_5 = arith.constant 0.000000e+00 : f32
    %7 = vector.broadcast %cst_5 : f32 to vector<32x32xf32>
    %8 = arith.maximumf %6, %7 : vector<32x32xf32>
    %c0_6 = arith.constant 0 : index
    %c0_7 = arith.constant 0 : index
    %9 = vector.load %arg4[%c0_6, %c0_7] : memref<32x32xf32, #tpu.memory_space<vmem>>, vector<32x32xf32>
    %10 = arith.truncf %8 : vector<32x32xf32> to vector<32x32xbf16>
    %11 = arith.truncf %9 : vector<32x32xf32> to vector<32x32xbf16>
    %cst_8 = arith.constant dense<0.000000e+00> : vector<32x32xf32>
    %12 = tpu.matmul %10, %11, %cst_8 {dimension_numbers = #tpu.dot_dimension_numbers<[1], [0], [0], [1], [0, 0, 1, 1], [], []>} : vector<32x32xbf16>, vector<32x32xbf16>, vector<32x32xf32> -> vector<32x32xf32>
    %c0_9 = arith.constant 0 : index
    %c0_10 = arith.constant 0 : index
    %13 = vector.load %arg5[%c0_9, %c0_10] : memref<1x32xf32, #tpu.memory_space<vmem>>, vector<1x32xf32>
    %14 = vector.broadcast %13 : vector<1x32xf32> to vector<32x32xf32>
    %15 = arith.addf %12, %14 : vector<32x32xf32>
    %cst_11 = arith.constant 0.000000e+00 : f32
    %16 = vector.broadcast %cst_11 : f32 to vector<32x32xf32>
    %17 = arith.maximumf %15, %16 : vector<32x32xf32>
    %c0_12 = arith.constant 0 : index
    %c0_13 = arith.constant 0 : index
    %18 = vector.load %arg6[%c0_12, %c0_13] : memref<32x3xf32, #tpu.memory_space<vmem>>, vector<32x3xf32>
    %19 = arith.truncf %17 : vector<32x32xf32> to vector<32x32xbf16>
    %20 = arith.truncf %18 : vector<32x3xf32> to vector<32x3xbf16>
    %cst_14 = arith.constant dense<0.000000e+00> : vector<32x3xf32>
    %21 = tpu.matmul %19, %20, %cst_14 {dimension_numbers = #tpu.dot_dimension_numbers<[1], [0], [0], [1], [0, 0, 1, 1], [], []>} : vector<32x32xbf16>, vector<32x3xbf16>, vector<32x3xf32> -> vector<32x3xf32>
    %c0_15 = arith.constant 0 : index
    %c0_16 = arith.constant 0 : index
    %22 = vector.load %arg7[%c0_15, %c0_16] : memref<1x3xf32, #tpu.memory_space<vmem>>, vector<1x3xf32>
    %23 = vector.broadcast %22 : vector<1x3xf32> to vector<32x3xf32>
    %24 = arith.addf %21, %23 : vector<32x3xf32>
    %c0_17 = arith.constant 0 : index
    %c0_18 = arith.constant 0 : index
    %25 = vector.load %arg8[%c0_17, %c0_18] : memref<32x3xf32, #tpu.memory_space<vmem>>, vector<32x3xf32>
    tpu.vector_store %arg8[%c0_17, %c0_18], %24 {strides = array<i32>} : memref<32x3xf32, #tpu.memory_space<vmem>>, vector<32x3xf32>,
    return
  }
  func.func @transform_0(%arg0: i32) -> (i32, i32) {
    %c0_i32 = arith.constant 0 : i32
    %c0_i32_0 = arith.constant 0 : i32
    return %arg0, %c0_i32 : i32, i32
  }
  func.func @transform_1(%arg0: i32) -> (i32, i32) {
    %c0_i32 = arith.constant 0 : i32
    %c0_i32_0 = arith.constant 0 : i32
    %c0_i32_1 = arith.constant 0 : i32
    return %c0_i32, %c0_i32_0 : i32, i32
  }
  func.func @transform_2(%arg0: i32) -> (i32, i32) {
    %c0_i32 = arith.constant 0 : i32
    %c0_i32_0 = arith.constant 0 : i32
    %c0_i32_1 = arith.constant 0 : i32
    return %c0_i32, %c0_i32_0 : i32, i32
  }
  func.func @transform_3(%arg0: i32) -> (i32, i32) {
    %c0_i32 = arith.constant 0 : i32
    %c0_i32_0 = arith.constant 0 : i32
    %c0_i32_1 = arith.constant 0 : i32
    return %c0_i32, %c0_i32_0 : i32, i32
  }
  func.func @transform_4(%arg0: i32) -> (i32, i32) {
    %c0_i32 = arith.constant 0 : i32
    %c0_i32_0 = arith.constant 0 : i32
    %c0_i32_1 = arith.constant 0 : i32
    return %c0_i32, %c0_i32_0 : i32, i32
  }
  func.func @transform_5(%arg0: i32) -> (i32, i32) {
    %c0_i32 = arith.constant 0 : i32
    %c0_i32_0 = arith.constant 0 : i32
    %c0_i32_1 = arith.constant 0 : i32
    return %c0_i32, %c0_i32_0 : i32, i32
  }
  func.func @transform_6(%arg0: i32) -> (i32, i32) {
    %c0_i32 = arith.constant 0 : i32
    %c0_i32_0 = arith.constant 0 : i32
    %c0_i32_1 = arith.constant 0 : i32
    return %c0_i32, %c0_i32_0 : i32, i32
  }
  func.func @transform_7(%arg0: i32) -> (i32, i32) {
    %c0_i32 = arith.constant 0 : i32
    %c0_i32_0 = arith.constant 0 : i32
    return %arg0, %c0_i32 : i32, i32
  }
}

</mosaic_0001>

<bundles_post_ra>
// kernel: mul.26
= control target key start
LH: loop header
LB: loop body
LE: loop exit
PB: predicated region body
PF: predicated region fallthrough
CT: control target
= control target key end

     0   :  { %vm7_vm0 = vcmask 39936   ;;  %vm13_vm1 = vcmask 80936   ;;  %s39_s0 = inlined_call_operand.vmem [shape: f32[2,5], index: 0, kind: input, shape index: {}]   ;;  %s40_s1 = inlined_call_operand.vmem [shape: f32[10], index: 1, kind: output, shape index: {}]  }
   0x1   :  { %v4_v0 = vld [vmem:[%s39_s0] sm:$0x3]  ;;  %s22_s0 = smov 5  }
   0x2   :  { %5 = vst [vmem:[#allocation1] sm:$0x3] %v4_v0 }
   0x9   :  { %v10_v1 = vld [vmem:[#allocation1 + $0x1] sm:$0x1]   ;;  %v6_v2 = vld [vmem:[#allocation1] sm:$0x1]  }
   0xa   :  { %11 = vrot.lane.b32.xlu0 %v10_v1, %s22_s0  ;;  %8 = vst.msk [vmem:[#allocation0] sm:$0x1] %vm7_vm0, %v6_v2  }
  0x7c   :  { %v12_v3 = vpop.permute.xlu0 %11  }
  0x7d   :  { %14 = vst.msk [vmem:[#allocation0] sm:$0x1] %vm13_vm1, %v12_v3  }
  0x84   :  { %v18_v4 = vld [vmem:[#allocation0] sm:$0x1] }
  0x85   :  { %20 = vst [vmem:[%s40_s1] sm:$0x1] %v18_v4 }

// kernel: ehgn_forward.8
= control target key start
LH: loop header
LB: loop body
LE: loop exit
PB: predicated region body
PF: predicated region fallthrough
CT: control target
= control target key end

     0   :  { %vm127_vm0 = vcmask 1041408   ;;  %vm128_vm1 = vcmask 1042432   ;;  %v1455_v3 = vmov 65535   ;;  %vm114_vm2 = vcmask 171008   ;;  %s1800_s6 = inlined_call_operand.vmem [shape: f32[21,32], index: 6, kind: input, shape index: {}]   ;;  %s1801_s0 = inlined_call_operand.vmem [shape: bf16[64,21], index: 0, kind: input, shape index: {}]   ;;  %s1802_s8 = inlined_call_operand.vmem [shape: f32[32,16], index: 8, kind: input, shape index: {}]   ;;  %s1803_s7 = inlined_call_operand.vmem [shape: f32[1,32], index: 7, kind: input, shape index: {}]   ;;  %s1804_s10 = inlined_call_operand.vmem [shape: f32[16,32], index: 10, kind: input, shape index: {}]   ;;  %s1805_s9 = inlined_call_operand.vmem [shape: f32[1,16], index: 9, kind: input, shape index: {}]   ;;  %s1806_s12 = inlined_call_operand.vmem [shape: f32[32,1], index: 12, kind: input, shape index: {}]   ;;  %s1807_s13 = inlined_call_operand.<no memory space> [shape: f32[1,1], index: 13, kind: input, shape index: {}]   ;;  %s1808_s11 = inlined_call_operand.vmem [shape: f32[1,32], index: 11, kind: input, shape index: {}]   ;;  %s1809_s3 = inlined_call_operand.vmem [shape: s32[32,1], index: 3, kind: input, shape index: {}]   ;;  %s1810_s1 = inlined_call_operand.vmem [shape: f32[64,3], index: 1, kind: input, shape index: {}]   ;;  %s1811_s2 = inlined_call_operand.vmem [shape: s32[1,64], index: 2, kind: input, shape index: {}]   ;;  %s1812_s15 = inlined_call_operand.vmem [shape: f32[16,32], index: 15, kind: input, shape index: {}]   ;;  %s1813_s14 = inlined_call_operand.vmem [shape: f32[8,32], index: 14, kind: input, shape index: {}]   ;;  %s1814_s5 = inlined_call_operand.vmem [shape: f32[32,8], index: 5, kind: input, shape index: {}]   ;;  %s1815_s17 = inlined_call_operand.vmem [shape: f32[32,8], index: 17, kind: input, shape index: {}]   ;;  %s1816_s16 = inlined_call_operand.vmem [shape: f32[1,32], index: 16, kind: input, shape index: {}]   ;;  %s1817_s18 = inlined_call_operand.vmem [shape: f32[1,8], index: 18, kind: input, shape index: {}]   ;;  %s1818_s4 = inlined_call_operand.vmem [shape: f32[32,3], index: 4, kind: input, shape index: {}]   ;;  %s1819_s19 = inlined_call_operand.vmem [shape: f32[32,11], index: 19, kind: output, shape index: {}]  }
   0x1   :  { %1823 = sst [smem:[#allocation4_spill]] %s1800_s6  ;;  %v129_v4 = vsel %vm127_vm0, 4294967295, %v1455_v3  ;;  %vm272_vm3 = vcmask 261120   ;;  %vm455_vm4 = vcmask 130048   ;;  %vm771_vm7 = vcmask 523264  }
   0x2   :  { %1824 = sst [smem:[#allocation5_spill]] %s1801_s0  ;;  %s1827_s20 = sld [smem:[#allocation4_spill]]  ;;  %v130_v7 = vsel %vm128_vm1, %v129_v4, 0  ;;  %vm69_vm8 = vcmask 154624   ;;  %vm942_vm11 = vcmask 1043456   ;;  %vm935_vm12 = vcmask 64512  }
   0x3   :  { %1825 = sst [smem:[#allocation6_spill]] %s1802_s8  ;;  %s1828_s25 = sld [smem:[#allocation5_spill]]  ;;  %vm1128_vm13 = vcmask 23552   ;;  %vm1133_vm14 = vcmask 89088  }
   0x4   :  { %1826 = sst [smem:[#allocation7_spill]] %s1803_s7  ;;  %s1829_s21 = sld [smem:[#allocation6_spill]] }
   0x5   :  { %s1830_s27 = sld [smem:[#allocation7_spill]]  ;;  %s1457_s8 = smov 16  }
   0x8   :  { %v82_v0 = vld [vmem:[%s1827_s20] sm:$0xff]  ;;  %v83_v1 = vld [vmem:[%s1827_s20 + $0x8] sm:$0xff]  ;;  %v84_v2 = vld [vmem:[%s1827_s20 + $0x10] sm:$0x1f]  ;;  %s1460_s20 = smov 3  }
   0x9   :  { %v85_v5 = vpack.c.bf16 %v83_v1, %v82_v0  ;;  %v86_v6 = vpack.c.bf16 %v84_v2, %v84_v2  ;;  %v1339_v8 = vld [vmem:[%s1828_s25] sm:$0xff]   ;;  %v1340_v10 = vld [vmem:[%s1828_s25 + $0x8] sm:$0xff]   ;;  %v1341_v11 = vld [vmem:[%s1828_s25 + $0x10] sm:$0xff]  }
   0xa   :  { %1252 = vmatprep.mubr.msk.bf16.mxu0 %vm114_vm2, %v1339_v8  ;;  %v1342_v12 = vld [vmem:[%s1828_s25 + $0x18] sm:$0xff]   ;;  %v255_v13 = vld [vmem:[%s1829_s21] sm:$0xff]  ;;  %v256_v14 = vld [vmem:[%s1829_s21 + $0x8] sm:$0xff] }
   0xb   :  { %1248 = vmatprep.subr.bf16.mxu0 %v85_v5  ;;  %v132_v9 = vand.u32 %v130_v7, %v86_v6  ;;  %v263_v15 = vpack.c.bf16 %v256_v14, %v255_v13  ;;  %v257_v16 = vld [vmem:[%s1829_s21 + $0x10] sm:$0xff]  ;;  %v258_v17 = vld [vmem:[%s1829_s21 + $0x18] sm:$0xff]  ;;  %v1142_v19 = vld [vmem:[%s1830_s27] ss:$0 sm:$0xff] }
   0xc   :  { %1249 = vmatpush3.bf16.msra.mxu0 %v85_v5  ;;  %v264_v18 = vpack.c.bf16 %v258_v17, %v257_v16  ;;  %v441_v16 = vld [vmem:[%s1804_s10] sm:$0xff]  ;;  %v442_v17 = vld [vmem:[%s1804_s10 + $0x8] sm:$0xff] }
   0xd   :  { %1250 = vmatprep.subr.bf16.mxu0 %v132_v9  ;;  %1260 = vmatprep.subr.bf16.mxu1 %v263_v15 }
   0xe   :  { %1261 = vmatpush3.bf16.msra.mxu1 %v263_v15 }
   0xf   :  { %1262 = vmatprep.subr.bf16.mxu1 %v264_v18 }
  0x10   :  { %1251 = vmatpush3.bf16.msra.mxu0 %v132_v9 }
  0x12   :  { %1263 = vmatpush3.bf16.msra.mxu1 %v264_v18  ;;  %v447_v18 = vpack.c.bf16 %v442_v17, %v441_v16  ;;  %v589_v16 = vld [vmem:[%s1806_s12] sm:$0xff]  ;;  %v590_v17 = vld [vmem:[%s1806_s12 + $0x8] sm:$0xff] }
  0x13   :  { %1253 = vmatmul.mubr.msk.bf16.vlgmr.msra.gmra.mrb[0].mxu0 %vm114_vm2, %v1340_v10 }
  0x14   :  { %1256 = vmatprep.mubr.msk.bf16.mxu0 %vm114_vm2, %v1341_v11  ;;  %1272 = vmatprep.subr.bf16.mxu0 %v447_v18 }
  0x15   :  { %1273 = vmatpush3.bf16.msra.mxu0 %v447_v18  ;;  %v597_v18 = vpack.c.bf16 %v590_v17, %v589_v16 }
  0x17   :  { %1282 = vmatprep.subr.bf16.mxu1 %v597_v18 }
  0x1b   :  { %1257 = vmatmul.mubr.msk.bf16.gmra.mrb[4].mxu0 %vm114_vm2, %v1342_v12 }
  0xe6   :  { %v1254_v20 = vpop.f32.mrb[0].mxu0 }
  0xe7   :  { %v177_v21 = vadd.f32 %v1254_v20, %v1142_v19  ;;  %v168_v22 = vpop.f32.mrb[1].mxu0 }
  0xe8   :  { %v169_v23 = vadd.f32 %v1142_v19, %v168_v22  ;;  %v1255_v24 = vpop.f32.mrb[2].mxu0 }
  0xe9   :  { %v1153_v25 = vmul.f32 -1.442695, %v177_v21  ;;  %v180_v26 = vadd.f32 %v1255_v24, %v1142_v19  ;;  %v171_v27 = vpop.f32.mrb[3].mxu0 }
  0xea   :  { %v1151_v28 = vmul.f32 -1.442695, %v169_v23  ;;  %v172_v29 = vadd.f32 %v1142_v19, %v171_v27 }
  0xeb   :  { %1343 = vpow2.f32 %v1153_v25  ;;  %v1154_v30 = vmul.f32 -1.442695, %v180_v26 }
  0xec   :  { %1345 = vpow2.f32 %v1151_v28  ;;  %v1152_v31 = vmul.f32 -1.442695, %v172_v29 }
  0xed   :  { %1347 = vpow2.f32 %v1154_v30 }
  0xee   :  { %1349 = vpow2.f32 %v1152_v31  ;;  %v1258_v32 = vpop.f32.mrb[4].mxu0 }
  0xef   :  { %v193_v33 = vadd.f32 %v1258_v32, %v1142_v19  ;;  %v184_v34 = vpop.f32.mrb[5].mxu0 }
  0xf0   :  { %v185_v35 = vadd.f32 %v1142_v19, %v184_v34  ;;  %v1259_v36 = vpop.f32.mrb[6].mxu0 }
  0xf1   :  { %v1157_v37 = vmul.f32 -1.442695, %v193_v33  ;;  %v196_v38 = vadd.f32 %v1259_v36, %v1142_v19  ;;  %v187_v39 = vpop.f32.mrb[7].mxu0 }
  0xf2   :  { %v1155_v40 = vmul.f32 -1.442695, %v185_v35  ;;  %v188_v41 = vadd.f32 %v1142_v19, %v187_v39  ;;  %v1159_v19 = vld [vmem:[%s1805_s9] ss:$0 sm:$0xff] }
  0xf3   :  { %1351 = vpow2.f32 %v1157_v37  ;;  %v1158_v42 = vmul.f32 -1.442695, %v196_v38 }
  0xf4   :  { %1353 = vpow2.f32 %v1155_v40  ;;  %v1156_v43 = vmul.f32 -1.442695, %v188_v41 }
  0xf5   :  { %v1344_v44 = vpop.eup %1343  ;;  %1355 = vpow2.f32 %v1158_v42 }
  0xf6   :  { %v1346_v45 = vpop.eup %1345  ;;  %v225_v46 = vadd.f32 1.0, %v1344_v44  ;;  %1357 = vpow2.f32 %v1156_v43 }
  0xf7   :  { %v1348_v47 = vpop.eup %1347  ;;  %v223_v48 = vadd.f32 1.0, %v1346_v45 }
  0xf8   :  { %v1350_v49 = vpop.eup %1349  ;;  %1359 = vrcp.f32 %v225_v46  ;;  %v226_v50 = vadd.f32 1.0, %v1348_v47 }
  0xf9   :  { %1361 = vrcp.f32 %v223_v48  ;;  %v224_v51 = vadd.f32 1.0, %v1350_v49 }
  0xfa   :  { %1363 = vrcp.f32 %v226_v50 }
  0xfb   :  { %1365 = vrcp.f32 %v224_v51 }
  0xfd   :  { %v1352_v52 = vpop.eup %1351 }
  0xfe   :  { %v1354_v53 = vpop.eup %1353  ;;  %v229_v54 = vadd.f32 1.0, %v1352_v52 }
  0xff   :  { %v1356_v55 = vpop.eup %1355  ;;  %v227_v56 = vadd.f32 1.0, %v1354_v53 }
 0x100   :  { %v1358_v57 = vpop.eup %1357  ;;  %1367 = vrcp.f32 %v229_v54  ;;  %v230_v58 = vadd.f32 1.0, %v1356_v55 }
 0x101   :  { %1369 = vrcp.f32 %v227_v56  ;;  %v228_v59 = vadd.f32 1.0, %v1358_v57 }
 0x102   :  { %v1360_v60 = vpop.eup %1359  ;;  %1371 = vrcp.f32 %v230_v58 }
 0x103   :  { %v1362_v61 = vpop.eup %1361  ;;  %1373 = vrcp.f32 %v228_v59  ;;  %v249_v0 = vmul.f32 %v1360_v60, %v177_v21 }
 0x104   :  { %v1364_v62 = vpop.eup %1363  ;;  %v247_v2 = vmul.f32 %v1362_v61, %v169_v23 }
 0x105   :  { %v1366_v63 = vpop.eup %1365  ;;  %v250_v1 = vmul.f32 %v1364_v62, %v180_v26 }
 0x106   :  { %v248_v3 = vmul.f32 %v1366_v63, %v172_v29 }
 0x107   :  { %v260_v4 = vpack.c.bf16 %v250_v1, %v249_v0 }
 0x108   :  { %v259_v5 = vpack.c.bf16 %v248_v3, %v247_v2 }
 0x10a   :  { %v1368_v6 = vpop.eup %1367  ;;  %1264 = vmatprep.mubr.msk.bf16.mxu1 %vm272_vm3, %v259_v5 }
 0x10b   :  { %v1370_v7 = vpop.eup %1369  ;;  %1265 = vmatmul.mubr.msk.bf16.vlgmr.msra.gmra.mrb[0].mxu1 %vm272_vm3, %v260_v4  ;;  %v253_v10 = vmul.f32 %v1368_v6, %v193_v33 }
 0x10c   :  { %v1372_v8 = vpop.eup %1371  ;;  %v251_v12 = vmul.f32 %v1370_v7, %v185_v35  ;;  %1283 = vmatpush3.bf16.msra.mxu1 %v597_v18 }
 0x10d   :  { %v1374_v9 = vpop.eup %1373  ;;  %v254_v11 = vmul.f32 %v1372_v8, %v196_v38 }
 0x10e   :  { %v252_v13 = vmul.f32 %v1374_v9, %v188_v41 }
 0x10f   :  { %v262_v14 = vpack.c.bf16 %v254_v11, %v253_v10 }
 0x110   :  { %v261_v15 = vpack.c.bf16 %v252_v13, %v251_v12 }
 0x112   :  { %1268 = vmatprep.mubr.msk.bf16.mxu1 %vm272_vm3, %v261_v15 }
 0x113   :  { %1269 = vmatmul.mubr.msk.bf16.gmra.mrb[4].mxu1 %vm272_vm3, %v262_v14 }
 0x1de   :  { %v1266_v20 = vpop.f32.mrb[0].mxu1 }
 0x1df   :  { %v328_v21 = vadd.f32 %v1266_v20, %v1159_v19  ;;  %v319_v22 = vpop.f32.mrb[1].mxu1  ;;  %v592_v20 = vld [vmem:[%s1806_s12 + $0x18] sm:$0xff] }
 0x1e0   :  { %v320_v23 = vadd.f32 %v1159_v19, %v319_v22  ;;  %v1267_v24 = vpop.f32.mrb[2].mxu1  ;;  %v24_v22 = vstv %s1807_s13 }
 0x1e1   :  { %v1166_v25 = vmul.f32 -1.442695, %v328_v21  ;;  %v331_v26 = vadd.f32 %v1267_v24, %v1159_v19  ;;  %v322_v27 = vpop.f32.mrb[3].mxu1  ;;  %25 = vst [vmem:[#allocation3] sm:$0x1] %v24_v22 }
 0x1e2   :  { %v1164_v28 = vmul.f32 -1.442695, %v320_v23  ;;  %v323_v29 = vadd.f32 %v1159_v19, %v322_v27 }
 0x1e3   :  { %1375 = vpow2.f32 %v1166_v25  ;;  %v1167_v30 = vmul.f32 -1.442695, %v331_v26 }
 0x1e4   :  { %1377 = vpow2.f32 %v1164_v28  ;;  %v1165_v31 = vmul.f32 -1.442695, %v323_v29 }
 0x1e5   :  { %1379 = vpow2.f32 %v1167_v30 }
 0x1e6   :  { %1381 = vpow2.f32 %v1165_v31  ;;  %v1270_v32 = vpop.f32.mrb[4].mxu1 }
 0x1e7   :  { %v344_v33 = vadd.f32 %v1270_v32, %v1159_v19  ;;  %v335_v34 = vpop.f32.mrb[5].mxu1 }
 0x1e8   :  { %v336_v35 = vadd.f32 %v1159_v19, %v335_v34  ;;  %v1271_v36 = vpop.f32.mrb[6].mxu1 }
 0x1e9   :  { %v1170_v37 = vmul.f32 -1.442695, %v344_v33  ;;  %v347_v38 = vadd.f32 %v1271_v36, %v1159_v19  ;;  %v338_v39 = vpop.f32.mrb[7].mxu1 }
 0x1ea   :  { %v1168_v40 = vmul.f32 -1.442695, %v336_v35  ;;  %v339_v41 = vadd.f32 %v1159_v19, %v338_v39  ;;  %v591_v19 = vld [vmem:[%s1806_s12 + $0x10] sm:$0xff] }
 0x1eb   :  { %1383 = vpow2.f32 %v1170_v37  ;;  %v1171_v42 = vmul.f32 -1.442695, %v347_v38 }
 0x1ec   :  { %1385 = vpow2.f32 %v1168_v40  ;;  %v1169_v43 = vmul.f32 -1.442695, %v339_v41 }
 0x1ed   :  { %v1376_v44 = vpop.eup %1375  ;;  %1387 = vpow2.f32 %v1171_v42 }
 0x1ee   :  { %v1378_v45 = vpop.eup %1377  ;;  %v376_v46 = vadd.f32 1.0, %v1376_v44  ;;  %1389 = vpow2.f32 %v1169_v43 }
 0x1ef   :  { %v1380_v47 = vpop.eup %1379  ;;  %v374_v48 = vadd.f32 1.0, %v1378_v45 }
 0x1f0   :  { %v1382_v49 = vpop.eup %1381  ;;  %1391 = vrcp.f32 %v376_v46  ;;  %v377_v50 = vadd.f32 1.0, %v1380_v47 }
 0x1f1   :  { %1393 = vrcp.f32 %v374_v48  ;;  %v375_v51 = vadd.f32 1.0, %v1382_v49 }
 0x1f2   :  { %1395 = vrcp.f32 %v377_v50 }
 0x1f3   :  { %1397 = vrcp.f32 %v375_v51 }
 0x1f5   :  { %v1384_v52 = vpop.eup %1383 }
 0x1f6   :  { %v1386_v53 = vpop.eup %1385  ;;  %v380_v54 = vadd.f32 1.0, %v1384_v52 }
 0x1f7   :  { %v1388_v55 = vpop.eup %1387  ;;  %v378_v56 = vadd.f32 1.0, %v1386_v53 }
 0x1f8   :  { %v1390_v57 = vpop.eup %1389  ;;  %1399 = vrcp.f32 %v380_v54  ;;  %v381_v58 = vadd.f32 1.0, %v1388_v55 }
 0x1f9   :  { %1401 = vrcp.f32 %v378_v56  ;;  %v379_v59 = vadd.f32 1.0, %v1390_v57 }
 0x1fa   :  { %v1392_v60 = vpop.eup %1391  ;;  %1403 = vrcp.f32 %v381_v58 }
 0x1fb   :  { %v1394_v61 = vpop.eup %1393  ;;  %1405 = vrcp.f32 %v379_v59  ;;  %v400_v0 = vmul.f32 %v1392_v60, %v328_v21  ;;  %v598_v21 = vpack.c.bf16 %v592_v20, %v591_v19 }
 0x1fc   :  { %v1396_v62 = vpop.eup %1395  ;;  %v398_v2 = vmul.f32 %v1394_v61, %v320_v23  ;;  %v1177_v23 = vld [vmem:[%s1808_s11] ss:$0 sm:$0xff] }
 0x1fd   :  { %v1398_v63 = vpop.eup %1397  ;;  %v401_v1 = vmul.f32 %v1396_v62, %v331_v26  ;;  %1284 = vmatprep.subr.bf16.mxu1 %v598_v21 }
 0x1fe   :  { %v399_v3 = vmul.f32 %v1398_v63, %v323_v29  ;;  %1285 = vmatpush3.bf16.msra.mxu1 %v598_v21 }
 0x1ff   :  { %v1614_v4 = vpack.c.bf16 %v401_v1, %v400_v0 }
 0x200   :  { %v1616_v5 = vpack.c.bf16 %v399_v3, %v398_v2 }
 0x202   :  { %v1400_v6 = vpop.eup %1399  ;;  %1274 = vmatprep.mubr.msk.bf16.mxu0 %vm455_vm4, %v1616_v5 }
 0x203   :  { %v1402_v7 = vpop.eup %1401  ;;  %1275 = vmatmul.mubr.msk.bf16.vlgmr.msra.gmra.mrb[8].mxu0 %vm455_vm4, %v1614_v4  ;;  %v404_v10 = vmul.f32 %v1400_v6, %v344_v33 }
 0x204   :  { %v1404_v8 = vpop.eup %1403  ;;  %v402_v12 = vmul.f32 %v1402_v7, %v336_v35 }
 0x205   :  { %v1406_v9 = vpop.eup %1405  ;;  %v405_v11 = vmul.f32 %v1404_v8, %v347_v38 }
 0x206   :  { %v403_v13 = vmul.f32 %v1406_v9, %v339_v41 }
 0x207   :  { %v1622_v14 = vpack.c.bf16 %v405_v11, %v404_v10 }
 0x208   :  { %v1624_v15 = vpack.c.bf16 %v403_v13, %v402_v12 }
 0x20a   :  { %1278 = vmatprep.mubr.msk.bf16.mxu0 %vm455_vm4, %v1624_v15 }
 0x20b   :  { %1279 = vmatmul.mubr.msk.bf16.gmra.mrb[12].mxu0 %vm455_vm4, %v1622_v14 }
 0x2d6   :  { %v1276_v24 = vpop.f32.mrb[8].mxu0 }
 0x2d7   :  { %v511_v25 = vadd.f32 %v1276_v24, %v1177_v23  ;;  %v502_v26 = vpop.f32.mrb[9].mxu0  ;;  %v1456_v24 = vmov 0  }
 0x2d8   :  { %v503_v27 = vadd.f32 %v1177_v23, %v502_v26  ;;  %v1277_v28 = vpop.f32.mrb[10].mxu0  ;;  %1338 = vset.pattern.permute.xlu1 %v1456_v24  ;;  %1337 = vset.pattern.permute.xlu0 %v1456_v24 }
 0x2d9   :  { %v1184_v29 = vmul.f32 -1.442695, %v511_v25  ;;  %v514_v30 = vadd.f32 %v1277_v28, %v1177_v23  ;;  %v505_v31 = vpop.f32.mrb[11].mxu0 }
 0x2da   :  { %v1182_v32 = vmul.f32 -1.442695, %v503_v27  ;;  %v506_v33 = vadd.f32 %v1177_v23, %v505_v31 }
 0x2db   :  { %1407 = vpow2.f32 %v1184_v29  ;;  %v1185_v34 = vmul.f32 -1.442695, %v514_v30 }
 0x2dc   :  { %1409 = vpow2.f32 %v1182_v32  ;;  %v1183_v35 = vmul.f32 -1.442695, %v506_v33 }
 0x2dd   :  { %1411 = vpow2.f32 %v1185_v34 }
 0x2de   :  { %1413 = vpow2.f32 %v1183_v35  ;;  %v1280_v36 = vpop.f32.mrb[12].mxu0 }
 0x2df   :  { %v527_v37 = vadd.f32 %v1280_v36, %v1177_v23  ;;  %v518_v38 = vpop.f32.mrb[13].mxu0 }
 0x2e0   :  { %v519_v39 = vadd.f32 %v1177_v23, %v518_v38  ;;  %v1281_v40 = vpop.f32.mrb[14].mxu0 }
 0x2e1   :  { %v1188_v41 = vmul.f32 -1.442695, %v527_v37  ;;  %v530_v42 = vadd.f32 %v1281_v40, %v1177_v23  ;;  %v521_v43 = vpop.f32.mrb[15].mxu0 }
 0x2e2   :  { %v1186_v44 = vmul.f32 -1.442695, %v519_v39  ;;  %v522_v45 = vadd.f32 %v1177_v23, %v521_v43  ;;  %v407_v43 = vld [vmem:[%s1809_s3 + $0x8] sm:$0xff] }
 0x2e3   :  { %1415 = vpow2.f32 %v1188_v41  ;;  %v1189_v46 = vmul.f32 -1.442695, %v530_v42 }
 0x2e4   :  { %1417 = vpow2.f32 %v1186_v44  ;;  %v1187_v47 = vmul.f32 -1.442695, %v522_v45 }
 0x2e5   :  { %v1408_v48 = vpop.eup %1407  ;;  %1419 = vpow2.f32 %v1189_v46  ;;  %v685_v46 = vld [vmem:[%s1810_s1 + $0x10] sm:$0xff] }
 0x2e6   :  { %v1410_v49 = vpop.eup %1409  ;;  %v559_v50 = vadd.f32 1.0, %v1408_v48  ;;  %1421 = vpow2.f32 %v1187_v47  ;;  %v686_v47 = vld [vmem:[%s1810_s1 + $0x18] sm:$0xff]  ;;  %v683_v48 = vld [vmem:[%s1810_s1] sm:$0xff] }
 0x2e7   :  { %v1412_v51 = vpop.eup %1411  ;;  %v557_v52 = vadd.f32 1.0, %v1410_v49  ;;  %v684_v49 = vld [vmem:[%s1810_s1 + $0x8] sm:$0xff] }
 0x2e8   :  { %v1414_v53 = vpop.eup %1413  ;;  %1423 = vrcp.f32 %v559_v50  ;;  %v560_v54 = vadd.f32 1.0, %v1412_v51 }
 0x2e9   :  { %1425 = vrcp.f32 %v557_v52  ;;  %v558_v55 = vadd.f32 1.0, %v1414_v53 }
 0x2ea   :  { %1427 = vrcp.f32 %v560_v54 }
 0x2eb   :  { %1429 = vrcp.f32 %v558_v55 }
 0x2ed   :  { %v1416_v56 = vpop.eup %1415 }
 0x2ee   :  { %v1418_v57 = vpop.eup %1417  ;;  %v563_v58 = vadd.f32 1.0, %v1416_v56 }
 0x2ef   :  { %v1420_v59 = vpop.eup %1419  ;;  %v561_v60 = vadd.f32 1.0, %v1418_v57 }
 0x2f0   :  { %v1422_v61 = vpop.eup %1421  ;;  %1431 = vrcp.f32 %v563_v58  ;;  %v564_v62 = vadd.f32 1.0, %v1420_v59  ;;  %v688_v59 = vld [vmem:[%s1810_s1 + $0x28] sm:$0xff] }
 0x2f1   :  { %1433 = vrcp.f32 %v561_v60  ;;  %v562_v63 = vadd.f32 1.0, %v1422_v61  ;;  %v409_v60 = vld [vmem:[%s1809_s3 + $0x18] sm:$0xff]  ;;  %v687_v61 = vld [vmem:[%s1810_s1 + $0x20] sm:$0xff] }
 0x2f2   :  { %v1424_v0 = vpop.eup %1423  ;;  %1435 = vrcp.f32 %v564_v62 }
 0x2f3   :  { %v1426_v1 = vpop.eup %1425  ;;  %1437 = vrcp.f32 %v562_v63  ;;  %v583_v6 = vmul.f32 %v1424_v0, %v511_v25  ;;  %v1190_v25 = vld [vmem:[#allocation3] ss:$0 sm:$0xff]  ;;  %v408_v63 = vld [vmem:[%s1809_s3 + $0x10] sm:$0xff] }
 0x2f4   :  { %v1428_v2 = vpop.eup %1427  ;;  %v581_v8 = vmul.f32 %v1426_v1, %v503_v27  ;;  %v689_v1 = vld [vmem:[%s1810_s1 + $0x30] sm:$0xff] }
 0x2f5   :  { %v1430_v3 = vpop.eup %1429  ;;  %v584_v7 = vmul.f32 %v1428_v2, %v514_v30 }
 0x2f6   :  { %v582_v9 = vmul.f32 %v1430_v3, %v506_v33  ;;  %v690_v3 = vld [vmem:[%s1810_s1 + $0x38] sm:$0xff] }
 0x2f7   :  { %v594_v10 = vpack.c.bf16 %v584_v7, %v583_v6 }
 0x2f8   :  { %v593_v11 = vpack.c.bf16 %v582_v9, %v581_v8  ;;  %v1172_v8 = vld [vmem:[%s1811_s2] ss:$0 sm:$0xff] }
 0x2fa   :  { %v1432_v12 = vpop.eup %1431  ;;  %1286 = vmatprep.mubr.msk.bf16.mxu1 %vm272_vm3, %v593_v11 }
 0x2fb   :  { %v1434_v13 = vpop.eup %1433  ;;  %1287 = vmatmul.mubr.msk.bf16.vlgmr.msra.gmra.mrb[8].mxu1 %vm272_vm3, %v594_v10  ;;  %v587_v18 = vmul.f32 %v1432_v12, %v527_v37 }
 0x2fc   :  { %v1436_v16 = vpop.eup %1435  ;;  %v585_v20 = vmul.f32 %v1434_v13, %v519_v39 }
 0x2fd   :  { %v1438_v17 = vpop.eup %1437  ;;  %v588_v19 = vmul.f32 %v1436_v16, %v530_v42  ;;  %v406_v42 = vld [vmem:[%s1809_s3] sm:$0xff] }
 0x2fe   :  { %v586_v21 = vmul.f32 %v1438_v17, %v522_v45  ;;  %v1458_v17 = vmov 0.0  }
 0x2ff   :  { %v596_v22 = vpack.c.bf16 %v588_v19, %v587_v18  ;;  %72 = vst.msk [vmem:[#allocation2 + $0x10] sm:$0xff] %vm69_vm8, %v1458_v17  ;;  %70 = vst.msk [vmem:[#allocation2] sm:$0xff] %vm69_vm8, %v1458_v17 }
 0x300   :  { %v595_v23 = vpack.c.bf16 %v586_v21, %v585_v20  ;;  %71 = vst.msk [vmem:[#allocation2 + $0x8] sm:$0xff] %vm69_vm8, %v1458_v17  ;;  %73 = vst.msk [vmem:[#allocation2 + $0x18] sm:$0xff] %vm69_vm8, %v1458_v17 }
 0x302   :  { %1290 = vmatprep.mubr.msk.bf16.mxu1 %vm272_vm3, %v595_v23 }
 0x303   :  { %1291 = vmatmul.mubr.msk.bf16.gmra.mrb[12].mxu1 %vm272_vm3, %v596_v22 }
 0x3ce   :  { %v1288_v26 = vpop.f32.mrb[8].mxu1 }
 0x3cf   :  { %v661_v27 = vadd.f32 %v1288_v26, %v1190_v25  ;;  %v652_v28 = vpop.f32.mrb[9].mxu1 }
 0x3d0   :  { %v653_v29 = vadd.f32 %v1190_v25, %v652_v28  ;;  %v1289_v30 = vpop.f32.mrb[10].mxu1 }
 0x3d1   :  { %703 = vperm.xlu1 %1338, %v661_v27   ;;  %v655_v31 = vpop.f32.mrb[11].mxu1  ;;  %v664_v32 = vadd.f32 %v1289_v30, %v1190_v25 }
 0x3d2   :  { %693 = vperm.xlu0 %1337, %v653_v29   ;;  %v656_v33 = vadd.f32 %v1190_v25, %v655_v31 }
 0x3d5   :  { %708 = vperm.xlu1 %1338, %v664_v32   ;;  %v875_v32 = vld [vmem:[%s1812_s15] sm:$0xff] }
 0x3d6   :  { %v1292_v34 = vpop.f32.mrb[12].mxu1  ;;  %698 = vperm.xlu0 %1337, %v656_v33  }
 0x3d7   :  { %v668_v35 = vpop.f32.mrb[13].mxu1  ;;  %v677_v40 = vadd.f32 %v1292_v34, %v1190_v25 }
 0x3d8   :  { %v669_v36 = vadd.f32 %v1190_v25, %v668_v35  ;;  %v1293_v37 = vpop.f32.mrb[14].mxu1 }
 0x3d9   :  { %v671_v38 = vpop.f32.mrb[15].mxu1  ;;  %v680_v41 = vadd.f32 %v1293_v37, %v1190_v25  ;;  %v767_v37 = vld [vmem:[#allocation2] sm:$0xff] }
 0x3da   :  { %v672_v39 = vadd.f32 %v1190_v25, %v671_v38  ;;  %713 = vperm.xlu0 %1337, %v669_v36   ;;  %v769_v36 = vld [vmem:[#allocation2 + $0x10] sm:$0xff] }
 0x3dc   :  { %718 = vperm.xlu1 %1338, %v672_v39   ;;  %v770_v39 = vld [vmem:[#allocation2 + $0x18] sm:$0xff] }
 0x3de   :  { %723 = vperm.xlu0 %1337, %v677_v40  }
 0x3e0   :  { %728 = vperm.xlu1 %1338, %v680_v41  }
 0x3e2   :  { %411 = vperm.xlu0 %1337, %v406_v42   ;;  %v768_v42 = vld [vmem:[#allocation2 + $0x8] sm:$0xff] }
 0x3e4   :  { %414 = vperm.xlu1 %1338, %v407_v43  }
 0x450   :  { %v704_v44 = vpop.permute.xlu1 %703 }
 0x451   :  { %v694_v45 = vpop.permute.xlu0 %693  ;;  %v733_v51 = vmul.f32 %v704_v44, %v685_v46 }
 0x452   :  { %v731_v54 = vmul.f32 %v694_v45, %v683_v48 }
 0x454   :  { %v709_v50 = vpop.permute.xlu1 %708 }
 0x455   :  { %v734_v52 = vmul.f32 %v709_v50, %v686_v47  ;;  %v699_v53 = vpop.permute.xlu0 %698  ;;  %v1726_v50 = vld [vmem:[%s1814_s5 + $0x8] sm:$0xff] }
 0x456   :  { %v732_v55 = vmul.f32 %v699_v53, %v684_v49  ;;  %v1721_v49 = vld [vmem:[%s1814_s5] sm:$0xff] }
 0x457   :  { %v740_v56 = vpack.c.bf16 %v734_v52, %v733_v51 }
 0x458   :  { %v739_v57 = vpack.c.bf16 %v732_v55, %v731_v54  ;;  %v872_v55 = vpack.c.bf16 %v1726_v50, %v1721_v49 }
 0x459   :  { %749 = vrot.lane.b32.xlu1 %v740_v56, %s1457_s8  ;;  %v714_v58 = vpop.permute.xlu0 %713 }
 0x45a   :  { %747 = vrot.lane.b32.xlu0 %v739_v57, %s1457_s8  ;;  %v735_v6 = vmul.f32 %v714_v58, %v687_v61  ;;  %v1735_v57 = vld [vmem:[%s1814_s5 + $0x10] sm:$0xff]  ;;  %v1740_v58 = vld [vmem:[%s1814_s5 + $0x18] sm:$0xff]  ;;  %v1035_v61 = vld [vmem:[%s1815_s17 + $0x8] sm:$0xff] }
 0x45b   :  { %v719_v62 = vpop.permute.xlu1 %718 }
 0x45c   :  { %v736_v0 = vmul.f32 %v719_v62, %v688_v59  ;;  %v873_v59 = vpack.c.bf16 %v1740_v58, %v1735_v57 }
 0x45d   :  { %420 = vperm.xlu1 %1338, %v409_v60   ;;  %v724_v2 = vpop.permute.xlu0 %723  ;;  %v1034_v60 = vld [vmem:[%s1815_s17] sm:$0xff] }
 0x45e   :  { %417 = vperm.xlu0 %1337, %v408_v63   ;;  %v741_v9 = vpack.c.bf16 %v736_v0, %v735_v6  ;;  %v737_v10 = vmul.f32 %v724_v2, %v689_v1  ;;  %v1040_v62 = vpack.c.bf16 %v1035_v61, %v1034_v60  ;;  %v1036_v63 = vld [vmem:[%s1815_s17 + $0x10] sm:$0xff]  ;;  %v1037_v0 = vld [vmem:[%s1815_s17 + $0x18] sm:$0xff]  ;;  %v1201_v2 = vld [vmem:[%s1816_s16] ss:$0 sm:$0xff] }
 0x45f   :  { %v729_v7 = vpop.permute.xlu1 %728  ;;  %v1041_v1 = vpack.c.bf16 %v1037_v0, %v1036_v63 }
 0x460   :  { %v738_v11 = vmul.f32 %v729_v7, %v690_v3 }
 0x461   :  { %v412_v12 = vpop.permute.xlu0 %411 }
 0x462   :  { %v742_v13 = vpack.c.bf16 %v738_v11, %v737_v10  ;;  %vm427_vm5 = vcmp.eq.s32.totalorder %v412_v12, %v1172_v8  ;;  %751 = vrot.lane.b32.xlu0 %v741_v9, %s1457_s8 }
 0x463   :  { %v415_v16 = vpop.permute.xlu1 %414  ;;  %v1173_v18 = vsel %vm427_vm5, 1.0, %v1458_v17 }
 0x464   :  { %vm428_vm6 = vcmp.eq.s32.totalorder %v415_v16, %v1172_v8  ;;  %753 = vrot.lane.b32.xlu1 %v742_v13, %s1457_s8 }
 0x465   :  { %v1174_v19 = vsel %vm428_vm6, 1.0, %v1458_v17 }
 0x466   :  { %v439_v20 = vpack.c.bf16 %v1174_v19, %v1173_v18 }
 0x468   :  { %1302 = vmatprep.mubr.msk.bf16.mxu0 %vm771_vm7, %v439_v20 }
 0x4cb   :  { %v750_v21 = vpop.permute.xlu1 %749 }
 0x4cc   :  { %v748_v22 = vpop.permute.xlu0 %747  ;;  %v759_v24 = vsel %vm455_vm4, %v1614_v4, %v750_v21 }
 0x4cd   :  { %v756_v23 = vsel %vm455_vm4, %v1616_v5, %v748_v22 }
 0x4ce   :  { %1294 = vmatprep.subr.bf16.mxu0 %v756_v23 }
 0x4cf   :  { %1295 = vmatpush3.bf16.msra.mxu0 %v756_v23 }
 0x4d0   :  { %1296 = vmatprep.subr.bf16.mxu0 %v759_v24 }
 0x4d3   :  { %1297 = vmatpush3.bf16.msra.mxu0 %v759_v24 }
 0x4dc   :  { %v421_v25 = vpop.permute.xlu1 %420 }
 0x4dd   :  { %v418_v26 = vpop.permute.xlu0 %417  ;;  %vm430_vm9 = vcmp.eq.s32.totalorder %v421_v25, %v1172_v8 }
 0x4de   :  { %vm429_vm10 = vcmp.eq.s32.totalorder %v418_v26, %v1172_v8  ;;  %v1176_v30 = vsel %vm430_vm9, 1.0, %v1458_v17 }
 0x4df   :  { %v1175_v31 = vsel %vm429_vm10, 1.0, %v1458_v17 }
 0x4e0   :  { %v754_v27 = vpop.permute.xlu1 %753  ;;  %v440_v4 = vpack.c.bf16 %v1176_v30, %v1175_v31 }
 0x4e1   :  { %v752_v28 = vpop.permute.xlu0 %751  ;;  %v765_v5 = vsel %vm455_vm4, %v1622_v14, %v754_v27  ;;  %v871_v14 = vld [vmem:[%s1813_s14] sm:$0xff]  ;;  %s1459_s14 = smov 112  }
 0x4e2   :  { %v762_v29 = vsel %vm455_vm4, %v1624_v15, %v752_v28  ;;  %v876_v15 = vld [vmem:[%s1812_s15 + $0x8] sm:$0xff]  ;;  %v874_v34 = vpack.c.bf16 %v871_v14, %v871_v14 }
 0x4e3   :  { %1298 = vmatprep.subr.bf16.mxu0 %v762_v29  ;;  %v879_v33 = vpack.c.bf16 %v876_v15, %v875_v32 }
 0x4e4   :  { %1299 = vmatpush3.bf16.msra.mxu0 %v762_v29  ;;  %v944_v35 = vsel %vm942_vm11, %v874_v34, 0 }
 0x4e5   :  { %1300 = vmatprep.subr.bf16.mxu0 %v765_v5  ;;  %1306 = vmatprep.subr.bf16.mxu1 %v879_v33 }
 0x4e6   :  { %1307 = vmatpush3.bf16.msra.mxu1 %v879_v33 }
 0x4e7   :  { %1330 = vmatprep.subr.msk.bf16.mxu1 %vm942_vm11, %v874_v34  ;;  %v1208_v34 = vld [vmem:[%s1817_s18] ss:$0 sm:$0xff] }
 0x4e8   :  { %1301 = vmatpush3.bf16.msra.mxu0 %v765_v5 }
 0x4e9   :  { %1318 = vmatprep.subr.bf16.mxu0 %v1040_v62 }
 0x4eb   :  { %1303 = vmatmul.mubr.msk.bf16.vlgmr.msra.gmra.mrb[16].mxu0 %vm771_vm7, %v440_v4 }
 0x4ec   :  { %1319 = vmatpush3.bf16.msra.mxu0 %v1040_v62 }
 0x4ed   :  { %1320 = vmatprep.subr.bf16.mxu0 %v1041_v1 }
 0x4f0   :  { %1321 = vmatpush3.bf16.msra.mxu0 %v1041_v1 }
 0x5be   :  { %v1304_v38 = vpop.f32.mrb[16].mxu0 }
 0x5bf   :  { %v829_v40 = vadd.f32 %v1304_v38, %v769_v36  ;;  %v812_v41 = vpop.f32.mrb[17].mxu0 }
 0x5c0   :  { %v827_v43 = vadd.f32 %v812_v41, %v767_v37  ;;  %v1305_v44 = vpop.f32.mrb[18].mxu0 }
 0x5c1   :  { %834 = vst.msk [vmem:[#allocation2 + $0x10] sm:$0xff] %vm69_vm8, %v829_v40  ;;  %v830_v45 = vadd.f32 %v1305_v44, %v770_v39  ;;  %v815_v46 = vpop.f32.mrb[19].mxu0 }
 0x5c2   :  { %832 = vst.msk [vmem:[#allocation2] sm:$0xff] %vm69_vm8, %v827_v43  ;;  %v828_v47 = vadd.f32 %v815_v46, %v768_v42 }
 0x5c3   :  { %835 = vst.msk [vmem:[#allocation2 + $0x18] sm:$0xff] %vm69_vm8, %v830_v45 }
 0x5c4   :  { %833 = vst.msk [vmem:[#allocation2 + $0x8] sm:$0xff] %vm69_vm8, %v828_v47 }
 0x5c8   :  { %v841_v48 = vld [vmem:[#allocation2 + $0x10] sm:$0xff] }
 0x5c9   :  { %859 = vrot.lane.b32.xlu0 %v841_v48, %s1459_s14  ;;  %v839_v52 = vld [vmem:[#allocation2] sm:$0xff] }
 0x5ca   :  { %v842_v51 = vld [vmem:[#allocation2 + $0x18] sm:$0xff] }
 0x5cb   :  { %861 = vrot.lane.b32.xlu1 %v842_v51, %s1459_s14  ;;  %v840_v53 = vld [vmem:[#allocation2 + $0x8] sm:$0xff]  ;;  %v878_v56 = vpack.c.bf16 %v842_v51, %v841_v48  ;;  %v847_v48 = vld [vmem:[%s1818_s4] sm:$0xff] }
 0x5cc   :  { %v877_v54 = vpack.c.bf16 %v840_v53, %v839_v52 }
 0x5cd   :  { %855 = vrot.lane.b32.xlu0 %v839_v52, %s1459_s14 }
 0x5ce   :  { %1308 = vmatprep.mubr.msk.bf16.mxu1 %vm455_vm4, %v877_v54 }
 0x5cf   :  { %857 = vrot.lane.b32.xlu1 %v840_v53, %s1459_s14  ;;  %1309 = vmatmul.mubr.msk.bf16.vlgmr.msra.gmra.mrb[16].mxu1 %vm455_vm4, %v878_v56  ;;  %v849_v53 = vld [vmem:[%s1818_s4 + $0x10] sm:$0xff] }
 0x5d0   :  { %1313 = vmatpush3.bf16.msra.mxu1 %v944_v35  ;;  %1314 = vmatprep.mubr.msk.bf16.mxu1 %vm935_vm12, %v872_v55 }
 0x5db   :  { %1315 = vmatmul.mubr.msk.bf16.vlgmr.msra.gmra.mrb[16].mxu1 %vm935_vm12, %v873_v59 }
 0x63b   :  { %v860_v46 = vpop.permute.xlu0 %859 }
 0x63c   :  { %v869_v59 = vadd.f32 %v860_v46, %v849_v53 }
 0x63d   :  { %v862_v47 = vpop.permute.xlu1 %861 }
 0x641   :  { %v858_v51 = vpop.permute.xlu1 %857 }
 0x6ae   :  { %v1316_v3 = vpop.f32.mrb[16].mxu1 }
 0x6af   :  { %v1004_v6 = vadd.f32 %v1316_v3, %v1201_v2  ;;  %v980_v7 = vpop.f32.mrb[17].mxu1 }
 0x6b0   :  { %v1002_v8 = vadd.f32 %v1201_v2, %v980_v7  ;;  %v1317_v9 = vpop.f32.mrb[18].mxu1 }
 0x6b1   :  { %v1204_v10 = vmul.f32 -1.442695, %v1004_v6  ;;  %v1005_v11 = vadd.f32 %v1317_v9, %v1201_v2  ;;  %v983_v12 = vpop.f32.mrb[19].mxu1 }
 0x6b2   :  { %v1202_v13 = vmul.f32 -1.442695, %v1002_v8  ;;  %v1003_v16 = vadd.f32 %v1201_v2, %v983_v12 }
 0x6b3   :  { %1439 = vpow2.f32 %v1204_v10  ;;  %v1205_v17 = vmul.f32 -1.442695, %v1005_v11 }
 0x6b4   :  { %1441 = vpow2.f32 %v1202_v13  ;;  %v1203_v18 = vmul.f32 -1.442695, %v1003_v16 }
 0x6b5   :  { %1443 = vpow2.f32 %v1205_v17 }
 0x6b6   :  { %1445 = vpow2.f32 %v1203_v18 }
 0x6bd   :  { %v1440_v19 = vpop.eup %1439 }
 0x6be   :  { %v1442_v20 = vpop.eup %1441  ;;  %v1020_v21 = vadd.f32 1.0, %v1440_v19 }
 0x6bf   :  { %v1444_v22 = vpop.eup %1443  ;;  %v1018_v23 = vadd.f32 1.0, %v1442_v20 }
 0x6c0   :  { %v1446_v24 = vpop.eup %1445  ;;  %1447 = vrcp.f32 %v1020_v21  ;;  %v1021_v25 = vadd.f32 1.0, %v1444_v22 }
 0x6c1   :  { %1449 = vrcp.f32 %v1018_v23  ;;  %v1019_v26 = vadd.f32 1.0, %v1446_v24 }
 0x6c2   :  { %1451 = vrcp.f32 %v1021_v25 }
 0x6c3   :  { %1453 = vrcp.f32 %v1019_v26 }
 0x6ca   :  { %v1448_v27 = vpop.eup %1447 }
 0x6cb   :  { %v1450_v28 = vpop.eup %1449  ;;  %v1032_v30 = vmul.f32 %v1448_v27, %v1004_v6 }
 0x6cc   :  { %v1452_v29 = vpop.eup %1451  ;;  %v1030_v4 = vmul.f32 %v1450_v28, %v1002_v8 }
 0x6cd   :  { %v1454_v5 = vpop.eup %1453  ;;  %v1033_v31 = vmul.f32 %v1452_v29, %v1005_v11 }
 0x6ce   :  { %v1031_v32 = vmul.f32 %v1454_v5, %v1003_v16 }
 0x6cf   :  { %v1039_v15 = vpack.c.bf16 %v1033_v31, %v1032_v30 }
 0x6d0   :  { %v1038_v33 = vpack.c.bf16 %v1031_v32, %v1030_v4 }
 0x6d2   :  { %1322 = vmatprep.mubr.msk.bf16.mxu0 %vm272_vm3, %v1038_v33 }
 0x6d3   :  { %1323 = vmatmul.mubr.msk.bf16.vlgmr.msra.gmra.mrb[20].mxu0 %vm272_vm3, %v1039_v15 }
 0x7a6   :  { %v1324_v14 = vpop.f32.mrb[20].mxu0 }
 0x7a7   :  { %v1082_v35 = vpop.f32.mrb[21].mxu0  ;;  %v1099_v39 = vadd.f32 %v1324_v14, %v1735_v57  ;;  %v850_v57 = vld [vmem:[%s1818_s4 + $0x18] sm:$0xff] }
 0x7a8   :  { %v1097_v36 = vadd.f32 %v1082_v35, %v1721_v49  ;;  %v1325_v37 = vpop.f32.mrb[22].mxu0  ;;  %v856_v49 = vpop.permute.xlu0 %855  ;;  %v870_v62 = vadd.f32 %v862_v47, %v850_v57 }
 0x7a9   :  { %v1085_v38 = vpop.f32.mrb[23].mxu0  ;;  %v1100_v42 = vadd.f32 %v1325_v37, %v1740_v58  ;;  %v1110_v44 = vadd.f32 %v1208_v34, %v1099_v39  ;;  %v867_v52 = vadd.f32 %v856_v49, %v847_v48 }
 0x7aa   :  { %v1108_v40 = vadd.f32 %v1208_v34, %v1097_v36  ;;  %v1098_v41 = vadd.f32 %v1085_v38, %v1726_v50  ;;  %v848_v50 = vld [vmem:[%s1818_s4 + $0x8] sm:$0xff] }
 0x7ab   :  { %v1111_v45 = vadd.f32 %v1208_v34, %v1100_v42  ;;  %v868_v55 = vadd.f32 %v858_v51, %v848_v50 }
 0x7ac   :  { %v1109_v43 = vadd.f32 %v1208_v34, %v1098_v41  ;;  %1116 = vrot.lane.b32.xlu0 %v1108_v40, %s1460_s20 }
 0x7ae   :  { %1118 = vrot.lane.b32.xlu1 %v1109_v43, %s1460_s20 }
 0x7b0   :  { %1120 = vrot.lane.b32.xlu0 %v1110_v44, %s1460_s20 }
 0x7b2   :  { %1122 = vrot.lane.b32.xlu1 %v1111_v45, %s1460_s20 }
 0x81e   :  { %v1117_v54 = vpop.permute.xlu0 %1116 }
 0x81f   :  { %v1129_v56 = vsel %vm1128_vm13, %v867_v52, %v1117_v54 }
 0x820   :  { %1134 = vst.msk [vmem:[%s1819_s19] sm:$0xff] %vm1133_vm14, %v1129_v56  ;;  %v1119_v58 = vpop.permute.xlu1 %1118 }
 0x821   :  { %v1130_v60 = vsel %vm1128_vm13, %v868_v55, %v1119_v58 }
 0x822   :  { %1135 = vst.msk [vmem:[%s1819_s19 + $0x8] sm:$0xff] %vm1133_vm14, %v1130_v60  ;;  %v1121_v61 = vpop.permute.xlu0 %1120 }
 0x823   :  { %v1131_v63 = vsel %vm1128_vm13, %v869_v59, %v1121_v61 }
 0x824   :  { %1136 = vst.msk [vmem:[%s1819_s19 + $0x10] sm:$0xff] %vm1133_vm14, %v1131_v63  ;;  %v1123_v0 = vpop.permute.xlu1 %1122 }
 0x825   :  { %v1132_v1 = vsel %vm1128_vm13, %v870_v62, %v1123_v0 }
 0x826   :  { %1137 = vst.msk [vmem:[%s1819_s19 + $0x18] sm:$0xff] %vm1133_vm14, %v1132_v1 }

// kernel: ehgn_forward.10
= control target key start
LH: loop header
LB: loop body
LE: loop exit
PB: predicated region body
PF: predicated region fallthrough
CT: control target
= control target key end

     0   :  { %vm125_vm0 = vcmask 1041408   ;;  %vm126_vm1 = vcmask 1042432   ;;  %v1313_v3 = vmov 65535   ;;  %vm112_vm2 = vcmask 171008   ;;  %s1631_s6 = inlined_call_operand.vmem [shape: f32[21,32], index: 6, kind: input, shape index: {}]   ;;  %s1632_s0 = inlined_call_operand.vmem [shape: bf16[64,21], index: 0, kind: input, shape index: {}]   ;;  %s1633_s8 = inlined_call_operand.vmem [shape: f32[32,16], index: 8, kind: input, shape index: {}]   ;;  %s1634_s7 = inlined_call_operand.vmem [shape: f32[1,32], index: 7, kind: input, shape index: {}]   ;;  %s1635_s10 = inlined_call_operand.vmem [shape: f32[16,32], index: 10, kind: input, shape index: {}]   ;;  %s1636_s9 = inlined_call_operand.vmem [shape: f32[1,16], index: 9, kind: input, shape index: {}]   ;;  %s1637_s12 = inlined_call_operand.vmem [shape: f32[32,1], index: 12, kind: input, shape index: {}]   ;;  %s1638_s13 = inlined_call_operand.<no memory space> [shape: f32[1,1], index: 13, kind: input, shape index: {}]   ;;  %s1639_s11 = inlined_call_operand.vmem [shape: f32[1,32], index: 11, kind: input, shape index: {}]   ;;  %s1640_s1 = inlined_call_operand.vmem [shape: f32[64,3], index: 1, kind: input, shape index: {}]   ;;  %s1641_s3 = inlined_call_operand.vmem [shape: s32[16,1], index: 3, kind: input, shape index: {}]   ;;  %s1642_s2 = inlined_call_operand.vmem [shape: s32[1,64], index: 2, kind: input, shape index: {}]   ;;  %s1643_s15 = inlined_call_operand.vmem [shape: f32[16,32], index: 15, kind: input, shape index: {}]   ;;  %s1644_s14 = inlined_call_operand.vmem [shape: f32[8,32], index: 14, kind: input, shape index: {}]   ;;  %s1645_s5 = inlined_call_operand.vmem [shape: f32[16,8], index: 5, kind: input, shape index: {}]   ;;  %s1646_s17 = inlined_call_operand.vmem [shape: f32[32,8], index: 17, kind: input, shape index: {}]   ;;  %s1647_s16 = inlined_call_operand.vmem [shape: f32[1,32], index: 16, kind: input, shape index: {}]   ;;  %s1648_s18 = inlined_call_operand.vmem [shape: f32[1,8], index: 18, kind: input, shape index: {}]   ;;  %s1649_s4 = inlined_call_operand.vmem [shape: f32[16,3], index: 4, kind: input, shape index: {}]   ;;  %s1650_s19 = inlined_call_operand.vmem [shape: f32[16,11], index: 19, kind: output, shape index: {}]  }
   0x1   :  { %1654 = sst [smem:[#allocation4_spill]] %s1631_s6  ;;  %v127_v4 = vsel %vm125_vm0, 4294967295, %v1313_v3  ;;  %vm270_vm3 = vcmask 261120   ;;  %vm438_vm4 = vcmask 130048   ;;  %vm1317_vm5 = vmmov 0  }
   0x2   :  { %1655 = sst [smem:[#allocation5_spill]] %s1632_s0  ;;  %s1658_s20 = sld [smem:[#allocation4_spill]]  ;;  %v128_v7 = vsel %vm126_vm1, %v127_v4, 0  ;;  %vm69_vm6 = vcmask 154624   ;;  %vm752_vm9 = vcmask 523264   ;;  %vm876_vm10 = vcmask 1043456  }
   0x3   :  { %1656 = sst [smem:[#allocation6_spill]] %s1633_s8  ;;  %s1659_s25 = sld [smem:[#allocation5_spill]]  ;;  %vm872_vm11 = vcmask 64512   ;;  %vm1014_vm12 = vcmask 23552   ;;  %vm1017_vm13 = vcmask 89088  }
   0x4   :  { %1657 = sst [smem:[#allocation7_spill]] %s1634_s7  ;;  %s1660_s21 = sld [smem:[#allocation6_spill]] }
   0x5   :  { %s1661_s27 = sld [smem:[#allocation7_spill]] }
   0x8   :  { %v80_v0 = vld [vmem:[%s1658_s20] sm:$0xff]  ;;  %v81_v1 = vld [vmem:[%s1658_s20 + $0x8] sm:$0xff]  ;;  %v82_v2 = vld [vmem:[%s1658_s20 + $0x10] sm:$0x1f] }
   0x9   :  { %v83_v5 = vpack.c.bf16 %v81_v1, %v80_v0  ;;  %v84_v6 = vpack.c.bf16 %v82_v2, %v82_v2  ;;  %v1205_v8 = vld [vmem:[%s1659_s25] sm:$0xff]   ;;  %v1206_v10 = vld [vmem:[%s1659_s25 + $0x8] sm:$0xff]   ;;  %v1207_v11 = vld [vmem:[%s1659_s25 + $0x10] sm:$0xff]  }
   0xa   :  { %1122 = vmatprep.mubr.msk.bf16.mxu0 %vm112_vm2, %v1205_v8  ;;  %v1208_v12 = vld [vmem:[%s1659_s25 + $0x18] sm:$0xff]   ;;  %v253_v13 = vld [vmem:[%s1660_s21] sm:$0xff]  ;;  %v254_v14 = vld [vmem:[%s1660_s21 + $0x8] sm:$0xff] }
   0xb   :  { %1118 = vmatprep.subr.bf16.mxu0 %v83_v5  ;;  %v130_v9 = vand.u32 %v128_v7, %v84_v6  ;;  %v261_v15 = vpack.c.bf16 %v254_v14, %v253_v13  ;;  %v255_v16 = vld [vmem:[%s1660_s21 + $0x10] sm:$0xff]  ;;  %v256_v17 = vld [vmem:[%s1660_s21 + $0x18] sm:$0xff]  ;;  %v1024_v19 = vld [vmem:[%s1661_s27] ss:$0 sm:$0xff]  ;;  %s1319_s27 = smov 3  }
   0xc   :  { %1119 = vmatpush3.bf16.msra.mxu0 %v83_v5  ;;  %v262_v18 = vpack.c.bf16 %v256_v17, %v255_v16  ;;  %v424_v16 = vld [vmem:[%s1635_s10] sm:$0xff]  ;;  %v425_v17 = vld [vmem:[%s1635_s10 + $0x8] sm:$0xff] }
   0xd   :  { %1120 = vmatprep.subr.bf16.mxu0 %v130_v9  ;;  %1130 = vmatprep.subr.bf16.mxu1 %v261_v15 }
   0xe   :  { %1131 = vmatpush3.bf16.msra.mxu1 %v261_v15 }
   0xf   :  { %1132 = vmatprep.subr.bf16.mxu1 %v262_v18 }
  0x10   :  { %1121 = vmatpush3.bf16.msra.mxu0 %v130_v9 }
  0x12   :  { %1133 = vmatpush3.bf16.msra.mxu1 %v262_v18  ;;  %v430_v18 = vpack.c.bf16 %v425_v17, %v424_v16  ;;  %v572_v16 = vld [vmem:[%s1637_s12] sm:$0xff]  ;;  %v573_v17 = vld [vmem:[%s1637_s12 + $0x8] sm:$0xff] }
  0x13   :  { %1123 = vmatmul.mubr.msk.bf16.vlgmr.msra.gmra.mrb[0].mxu0 %vm112_vm2, %v1206_v10 }
  0x14   :  { %1126 = vmatprep.mubr.msk.bf16.mxu0 %vm112_vm2, %v1207_v11  ;;  %1142 = vmatprep.subr.bf16.mxu0 %v430_v18 }
  0x15   :  { %1143 = vmatpush3.bf16.msra.mxu0 %v430_v18  ;;  %v580_v18 = vpack.c.bf16 %v573_v17, %v572_v16 }
  0x17   :  { %1152 = vmatprep.subr.bf16.mxu1 %v580_v18 }
  0x1b   :  { %1127 = vmatmul.mubr.msk.bf16.gmra.mrb[4].mxu0 %vm112_vm2, %v1208_v12 }
  0xe6   :  { %v1124_v20 = vpop.f32.mrb[0].mxu0 }
  0xe7   :  { %v175_v21 = vadd.f32 %v1124_v20, %v1024_v19  ;;  %v166_v22 = vpop.f32.mrb[1].mxu0 }
  0xe8   :  { %v167_v23 = vadd.f32 %v1024_v19, %v166_v22  ;;  %v1125_v24 = vpop.f32.mrb[2].mxu0 }
  0xe9   :  { %v1035_v25 = vmul.f32 -1.442695, %v175_v21  ;;  %v178_v26 = vadd.f32 %v1125_v24, %v1024_v19  ;;  %v169_v27 = vpop.f32.mrb[3].mxu0 }
  0xea   :  { %v1033_v28 = vmul.f32 -1.442695, %v167_v23  ;;  %v170_v29 = vadd.f32 %v1024_v19, %v169_v27 }
  0xeb   :  { %1209 = vpow2.f32 %v1035_v25  ;;  %v1036_v30 = vmul.f32 -1.442695, %v178_v26 }
  0xec   :  { %1211 = vpow2.f32 %v1033_v28  ;;  %v1034_v31 = vmul.f32 -1.442695, %v170_v29 }
  0xed   :  { %1213 = vpow2.f32 %v1036_v30 }
  0xee   :  { %1215 = vpow2.f32 %v1034_v31  ;;  %v1128_v32 = vpop.f32.mrb[4].mxu0 }
  0xef   :  { %v191_v33 = vadd.f32 %v1128_v32, %v1024_v19  ;;  %v182_v34 = vpop.f32.mrb[5].mxu0 }
  0xf0   :  { %v183_v35 = vadd.f32 %v1024_v19, %v182_v34  ;;  %v1129_v36 = vpop.f32.mrb[6].mxu0 }
  0xf1   :  { %v1039_v37 = vmul.f32 -1.442695, %v191_v33  ;;  %v194_v38 = vadd.f32 %v1129_v36, %v1024_v19  ;;  %v185_v39 = vpop.f32.mrb[7].mxu0 }
  0xf2   :  { %v1037_v40 = vmul.f32 -1.442695, %v183_v35  ;;  %v186_v41 = vadd.f32 %v1024_v19, %v185_v39  ;;  %v1041_v19 = vld [vmem:[%s1636_s9] ss:$0 sm:$0xff]  ;;  %s1316_s9 = smov 16  }
  0xf3   :  { %1217 = vpow2.f32 %v1039_v37  ;;  %v1040_v42 = vmul.f32 -1.442695, %v194_v38 }
  0xf4   :  { %1219 = vpow2.f32 %v1037_v40  ;;  %v1038_v43 = vmul.f32 -1.442695, %v186_v41 }
  0xf5   :  { %v1210_v44 = vpop.eup %1209  ;;  %1221 = vpow2.f32 %v1040_v42 }
  0xf6   :  { %v1212_v45 = vpop.eup %1211  ;;  %v223_v46 = vadd.f32 1.0, %v1210_v44  ;;  %1223 = vpow2.f32 %v1038_v43 }
  0xf7   :  { %v1214_v47 = vpop.eup %1213  ;;  %v221_v48 = vadd.f32 1.0, %v1212_v45 }
  0xf8   :  { %v1216_v49 = vpop.eup %1215  ;;  %1225 = vrcp.f32 %v223_v46  ;;  %v224_v50 = vadd.f32 1.0, %v1214_v47 }
  0xf9   :  { %1227 = vrcp.f32 %v221_v48  ;;  %v222_v51 = vadd.f32 1.0, %v1216_v49 }
  0xfa   :  { %1229 = vrcp.f32 %v224_v50 }
  0xfb   :  { %1231 = vrcp.f32 %v222_v51 }
  0xfd   :  { %v1218_v52 = vpop.eup %1217 }
  0xfe   :  { %v1220_v53 = vpop.eup %1219  ;;  %v227_v54 = vadd.f32 1.0, %v1218_v52 }
  0xff   :  { %v1222_v55 = vpop.eup %1221  ;;  %v225_v56 = vadd.f32 1.0, %v1220_v53 }
 0x100   :  { %v1224_v57 = vpop.eup %1223  ;;  %1233 = vrcp.f32 %v227_v54  ;;  %v228_v58 = vadd.f32 1.0, %v1222_v55 }
 0x101   :  { %1235 = vrcp.f32 %v225_v56  ;;  %v226_v59 = vadd.f32 1.0, %v1224_v57 }
 0x102   :  { %v1226_v60 = vpop.eup %1225  ;;  %1237 = vrcp.f32 %v228_v58 }
 0x103   :  { %v1228_v61 = vpop.eup %1227  ;;  %1239 = vrcp.f32 %v226_v59  ;;  %v247_v0 = vmul.f32 %v1226_v60, %v175_v21 }
 0x104   :  { %v1230_v62 = vpop.eup %1229  ;;  %v245_v2 = vmul.f32 %v1228_v61, %v167_v23 }
 0x105   :  { %v1232_v63 = vpop.eup %1231  ;;  %v248_v1 = vmul.f32 %v1230_v62, %v178_v26 }
 0x106   :  { %v246_v3 = vmul.f32 %v1232_v63, %v170_v29 }
 0x107   :  { %v258_v4 = vpack.c.bf16 %v248_v1, %v247_v0 }
 0x108   :  { %v257_v5 = vpack.c.bf16 %v246_v3, %v245_v2 }
 0x10a   :  { %v1234_v6 = vpop.eup %1233  ;;  %1134 = vmatprep.mubr.msk.bf16.mxu1 %vm270_vm3, %v257_v5 }
 0x10b   :  { %v1236_v7 = vpop.eup %1235  ;;  %1135 = vmatmul.mubr.msk.bf16.vlgmr.msra.gmra.mrb[0].mxu1 %vm270_vm3, %v258_v4  ;;  %v251_v10 = vmul.f32 %v1234_v6, %v191_v33 }
 0x10c   :  { %v1238_v8 = vpop.eup %1237  ;;  %v249_v12 = vmul.f32 %v1236_v7, %v183_v35  ;;  %1153 = vmatpush3.bf16.msra.mxu1 %v580_v18 }
 0x10d   :  { %v1240_v9 = vpop.eup %1239  ;;  %v252_v11 = vmul.f32 %v1238_v8, %v194_v38 }
 0x10e   :  { %v250_v13 = vmul.f32 %v1240_v9, %v186_v41 }
 0x10f   :  { %v260_v14 = vpack.c.bf16 %v252_v11, %v251_v10 }
 0x110   :  { %v259_v15 = vpack.c.bf16 %v250_v13, %v249_v12 }
 0x112   :  { %1138 = vmatprep.mubr.msk.bf16.mxu1 %vm270_vm3, %v259_v15 }
 0x113   :  { %1139 = vmatmul.mubr.msk.bf16.gmra.mrb[4].mxu1 %vm270_vm3, %v260_v14 }
 0x1de   :  { %v1136_v20 = vpop.f32.mrb[0].mxu1 }
 0x1df   :  { %v326_v21 = vadd.f32 %v1136_v20, %v1041_v19  ;;  %v317_v22 = vpop.f32.mrb[1].mxu1  ;;  %v575_v20 = vld [vmem:[%s1637_s12 + $0x18] sm:$0xff] }
 0x1e0   :  { %v318_v23 = vadd.f32 %v1041_v19, %v317_v22  ;;  %v1137_v24 = vpop.f32.mrb[2].mxu1  ;;  %v24_v22 = vstv %s1638_s13 }
 0x1e1   :  { %v1048_v25 = vmul.f32 -1.442695, %v326_v21  ;;  %v329_v26 = vadd.f32 %v1137_v24, %v1041_v19  ;;  %v320_v27 = vpop.f32.mrb[3].mxu1  ;;  %25 = vst [vmem:[#allocation3] sm:$0x1] %v24_v22 }
 0x1e2   :  { %v1046_v28 = vmul.f32 -1.442695, %v318_v23  ;;  %v321_v29 = vadd.f32 %v1041_v19, %v320_v27 }
 0x1e3   :  { %1241 = vpow2.f32 %v1048_v25  ;;  %v1049_v30 = vmul.f32 -1.442695, %v329_v26 }
 0x1e4   :  { %1243 = vpow2.f32 %v1046_v28  ;;  %v1047_v31 = vmul.f32 -1.442695, %v321_v29 }
 0x1e5   :  { %1245 = vpow2.f32 %v1049_v30 }
 0x1e6   :  { %1247 = vpow2.f32 %v1047_v31  ;;  %v1140_v32 = vpop.f32.mrb[4].mxu1 }
 0x1e7   :  { %v342_v33 = vadd.f32 %v1140_v32, %v1041_v19  ;;  %v333_v34 = vpop.f32.mrb[5].mxu1 }
 0x1e8   :  { %v334_v35 = vadd.f32 %v1041_v19, %v333_v34  ;;  %v1141_v36 = vpop.f32.mrb[6].mxu1 }
 0x1e9   :  { %v1052_v37 = vmul.f32 -1.442695, %v342_v33  ;;  %v345_v38 = vadd.f32 %v1141_v36, %v1041_v19  ;;  %v336_v39 = vpop.f32.mrb[7].mxu1 }
 0x1ea   :  { %v1050_v40 = vmul.f32 -1.442695, %v334_v35  ;;  %v337_v41 = vadd.f32 %v1041_v19, %v336_v39  ;;  %v574_v19 = vld [vmem:[%s1637_s12 + $0x10] sm:$0xff] }
 0x1eb   :  { %1249 = vpow2.f32 %v1052_v37  ;;  %v1053_v42 = vmul.f32 -1.442695, %v345_v38 }
 0x1ec   :  { %1251 = vpow2.f32 %v1050_v40  ;;  %v1051_v43 = vmul.f32 -1.442695, %v337_v41 }
 0x1ed   :  { %v1242_v44 = vpop.eup %1241  ;;  %1253 = vpow2.f32 %v1053_v42 }
 0x1ee   :  { %v1244_v45 = vpop.eup %1243  ;;  %v374_v46 = vadd.f32 1.0, %v1242_v44  ;;  %1255 = vpow2.f32 %v1051_v43 }
 0x1ef   :  { %v1246_v47 = vpop.eup %1245  ;;  %v372_v48 = vadd.f32 1.0, %v1244_v45 }
 0x1f0   :  { %v1248_v49 = vpop.eup %1247  ;;  %1257 = vrcp.f32 %v374_v46  ;;  %v375_v50 = vadd.f32 1.0, %v1246_v47 }
 0x1f1   :  { %1259 = vrcp.f32 %v372_v48  ;;  %v373_v51 = vadd.f32 1.0, %v1248_v49 }
 0x1f2   :  { %1261 = vrcp.f32 %v375_v50 }
 0x1f3   :  { %1263 = vrcp.f32 %v373_v51 }
 0x1f5   :  { %v1250_v52 = vpop.eup %1249 }
 0x1f6   :  { %v1252_v53 = vpop.eup %1251  ;;  %v378_v54 = vadd.f32 1.0, %v1250_v52 }
 0x1f7   :  { %v1254_v55 = vpop.eup %1253  ;;  %v376_v56 = vadd.f32 1.0, %v1252_v53 }
 0x1f8   :  { %v1256_v57 = vpop.eup %1255  ;;  %1265 = vrcp.f32 %v378_v54  ;;  %v379_v58 = vadd.f32 1.0, %v1254_v55 }
 0x1f9   :  { %1267 = vrcp.f32 %v376_v56  ;;  %v377_v59 = vadd.f32 1.0, %v1256_v57 }
 0x1fa   :  { %v1258_v60 = vpop.eup %1257  ;;  %1269 = vrcp.f32 %v379_v58 }
 0x1fb   :  { %v1260_v61 = vpop.eup %1259  ;;  %1271 = vrcp.f32 %v377_v59  ;;  %v398_v0 = vmul.f32 %v1258_v60, %v326_v21  ;;  %v581_v21 = vpack.c.bf16 %v575_v20, %v574_v19 }
 0x1fc   :  { %v1262_v62 = vpop.eup %1261  ;;  %v396_v2 = vmul.f32 %v1260_v61, %v318_v23  ;;  %v1057_v23 = vld [vmem:[%s1639_s11] ss:$0 sm:$0xff] }
 0x1fd   :  { %v1264_v63 = vpop.eup %1263  ;;  %v399_v1 = vmul.f32 %v1262_v62, %v329_v26  ;;  %1154 = vmatprep.subr.bf16.mxu1 %v581_v21 }
 0x1fe   :  { %v397_v3 = vmul.f32 %v1264_v63, %v321_v29  ;;  %1155 = vmatpush3.bf16.msra.mxu1 %v581_v21 }
 0x1ff   :  { %v1473_v4 = vpack.c.bf16 %v399_v1, %v398_v0 }
 0x200   :  { %v1475_v5 = vpack.c.bf16 %v397_v3, %v396_v2 }
 0x202   :  { %v1266_v6 = vpop.eup %1265  ;;  %1144 = vmatprep.mubr.msk.bf16.mxu0 %vm438_vm4, %v1475_v5 }
 0x203   :  { %v1268_v7 = vpop.eup %1267  ;;  %1145 = vmatmul.mubr.msk.bf16.vlgmr.msra.gmra.mrb[8].mxu0 %vm438_vm4, %v1473_v4  ;;  %v402_v10 = vmul.f32 %v1266_v6, %v342_v33 }
 0x204   :  { %v1270_v8 = vpop.eup %1269  ;;  %v400_v12 = vmul.f32 %v1268_v7, %v334_v35 }
 0x205   :  { %v1272_v9 = vpop.eup %1271  ;;  %v403_v11 = vmul.f32 %v1270_v8, %v345_v38 }
 0x206   :  { %v401_v13 = vmul.f32 %v1272_v9, %v337_v41 }
 0x207   :  { %v1481_v14 = vpack.c.bf16 %v403_v11, %v402_v10 }
 0x208   :  { %v1483_v15 = vpack.c.bf16 %v401_v13, %v400_v12 }
 0x20a   :  { %1148 = vmatprep.mubr.msk.bf16.mxu0 %vm438_vm4, %v1483_v15 }
 0x20b   :  { %1149 = vmatmul.mubr.msk.bf16.gmra.mrb[12].mxu0 %vm438_vm4, %v1481_v14 }
 0x2d6   :  { %v1146_v24 = vpop.f32.mrb[8].mxu0 }
 0x2d7   :  { %v494_v25 = vadd.f32 %v1146_v24, %v1057_v23  ;;  %v485_v26 = vpop.f32.mrb[9].mxu0  ;;  %v1314_v24 = vmov 0  }
 0x2d8   :  { %v486_v27 = vadd.f32 %v1057_v23, %v485_v26  ;;  %v1147_v28 = vpop.f32.mrb[10].mxu0  ;;  %1204 = vset.pattern.permute.xlu1 %v1314_v24  ;;  %1203 = vset.pattern.permute.xlu0 %v1314_v24 }
 0x2d9   :  { %v1064_v29 = vmul.f32 -1.442695, %v494_v25  ;;  %v497_v30 = vadd.f32 %v1147_v28, %v1057_v23  ;;  %v488_v31 = vpop.f32.mrb[11].mxu0 }
 0x2da   :  { %v1062_v32 = vmul.f32 -1.442695, %v486_v27  ;;  %v489_v33 = vadd.f32 %v1057_v23, %v488_v31 }
 0x2db   :  { %1273 = vpow2.f32 %v1064_v29  ;;  %v1065_v34 = vmul.f32 -1.442695, %v497_v30 }
 0x2dc   :  { %1275 = vpow2.f32 %v1062_v32  ;;  %v1063_v35 = vmul.f32 -1.442695, %v489_v33 }
 0x2dd   :  { %1277 = vpow2.f32 %v1065_v34 }
 0x2de   :  { %1279 = vpow2.f32 %v1063_v35  ;;  %v1150_v36 = vpop.f32.mrb[12].mxu0 }
 0x2df   :  { %v510_v37 = vadd.f32 %v1150_v36, %v1057_v23  ;;  %v501_v38 = vpop.f32.mrb[13].mxu0 }
 0x2e0   :  { %v502_v39 = vadd.f32 %v1057_v23, %v501_v38  ;;  %v1151_v40 = vpop.f32.mrb[14].mxu0 }
 0x2e1   :  { %v1068_v41 = vmul.f32 -1.442695, %v510_v37  ;;  %v513_v42 = vadd.f32 %v1151_v40, %v1057_v23  ;;  %v504_v43 = vpop.f32.mrb[15].mxu0 }
 0x2e2   :  { %v1066_v44 = vmul.f32 -1.442695, %v502_v39  ;;  %v505_v45 = vadd.f32 %v1057_v23, %v504_v43 }
 0x2e3   :  { %1281 = vpow2.f32 %v1068_v41  ;;  %v1069_v46 = vmul.f32 -1.442695, %v513_v42 }
 0x2e4   :  { %1283 = vpow2.f32 %v1066_v44  ;;  %v1067_v47 = vmul.f32 -1.442695, %v505_v45 }
 0x2e5   :  { %v1274_v48 = vpop.eup %1273  ;;  %1285 = vpow2.f32 %v1069_v46  ;;  %v669_v46 = vld [vmem:[%s1640_s1 + $0x18] sm:$0xff] }
 0x2e6   :  { %v1276_v49 = vpop.eup %1275  ;;  %v542_v50 = vadd.f32 1.0, %v1274_v48  ;;  %1287 = vpow2.f32 %v1067_v47  ;;  %v666_v47 = vld [vmem:[%s1640_s1] sm:$0xff]  ;;  %v667_v48 = vld [vmem:[%s1640_s1 + $0x8] sm:$0xff] }
 0x2e7   :  { %v1278_v51 = vpop.eup %1277  ;;  %v540_v52 = vadd.f32 1.0, %v1276_v49 }
 0x2e8   :  { %v1280_v53 = vpop.eup %1279  ;;  %1289 = vrcp.f32 %v542_v50  ;;  %v543_v54 = vadd.f32 1.0, %v1278_v51 }
 0x2e9   :  { %1291 = vrcp.f32 %v540_v52  ;;  %v541_v55 = vadd.f32 1.0, %v1280_v53 }
 0x2ea   :  { %1293 = vrcp.f32 %v543_v54 }
 0x2eb   :  { %1295 = vrcp.f32 %v541_v55 }
 0x2ed   :  { %v1282_v56 = vpop.eup %1281 }
 0x2ee   :  { %v1284_v57 = vpop.eup %1283  ;;  %v546_v58 = vadd.f32 1.0, %v1282_v56 }
 0x2ef   :  { %v1286_v59 = vpop.eup %1285  ;;  %v544_v60 = vadd.f32 1.0, %v1284_v57 }
 0x2f0   :  { %v1288_v61 = vpop.eup %1287  ;;  %1297 = vrcp.f32 %v546_v58  ;;  %v547_v62 = vadd.f32 1.0, %v1286_v59  ;;  %v671_v58 = vld [vmem:[%s1640_s1 + $0x28] sm:$0xff] }
 0x2f1   :  { %1299 = vrcp.f32 %v544_v60  ;;  %v545_v63 = vadd.f32 1.0, %v1288_v61  ;;  %v405_v59 = vld [vmem:[%s1641_s3 + $0x8] sm:$0xff]  ;;  %v670_v60 = vld [vmem:[%s1640_s1 + $0x20] sm:$0xff] }
 0x2f2   :  { %v1290_v0 = vpop.eup %1289  ;;  %1301 = vrcp.f32 %v547_v62  ;;  %v404_v62 = vld [vmem:[%s1641_s3] sm:$0xff] }
 0x2f3   :  { %v1292_v1 = vpop.eup %1291  ;;  %1303 = vrcp.f32 %v545_v63  ;;  %v566_v6 = vmul.f32 %v1290_v0, %v494_v25  ;;  %v1070_v25 = vld [vmem:[#allocation3] ss:$0 sm:$0xff] }
 0x2f4   :  { %v1294_v2 = vpop.eup %1293  ;;  %v564_v8 = vmul.f32 %v1292_v1, %v486_v27  ;;  %v672_v0 = vld [vmem:[%s1640_s1 + $0x30] sm:$0xff] }
 0x2f5   :  { %v1296_v3 = vpop.eup %1295  ;;  %v567_v7 = vmul.f32 %v1294_v2, %v497_v30  ;;  %v673_v2 = vld [vmem:[%s1640_s1 + $0x38] sm:$0xff] }
 0x2f6   :  { %v565_v9 = vmul.f32 %v1296_v3, %v489_v33 }
 0x2f7   :  { %v577_v10 = vpack.c.bf16 %v567_v7, %v566_v6 }
 0x2f8   :  { %v576_v11 = vpack.c.bf16 %v565_v9, %v564_v8 }
 0x2fa   :  { %v1298_v12 = vpop.eup %1297  ;;  %1156 = vmatprep.mubr.msk.bf16.mxu1 %vm270_vm3, %v576_v11 }
 0x2fb   :  { %v1300_v13 = vpop.eup %1299  ;;  %1157 = vmatmul.mubr.msk.bf16.vlgmr.msra.gmra.mrb[8].mxu1 %vm270_vm3, %v577_v10  ;;  %v570_v18 = vmul.f32 %v1298_v12, %v510_v37 }
 0x2fc   :  { %v1302_v16 = vpop.eup %1301  ;;  %v568_v20 = vmul.f32 %v1300_v13, %v502_v39 }
 0x2fd   :  { %v1304_v17 = vpop.eup %1303  ;;  %v571_v19 = vmul.f32 %v1302_v16, %v513_v42  ;;  %v1315_v42 = vmov 0.0  }
 0x2fe   :  { %v569_v21 = vmul.f32 %v1304_v17, %v505_v45  ;;  %1164 = vmatprep.subr.bf16.mxu0 %v1315_v42  ;;  %1176 = vmatprep.subr.bf16.mxu1 %v1315_v42  ;;  %v668_v45 = vld [vmem:[%s1640_s1 + $0x10] sm:$0xff]  ;;  %70 = vst.msk [vmem:[#allocation2] sm:$0xff] %vm69_vm6, %v1315_v42  ;;  %71 = vst.msk [vmem:[#allocation2 + $0x8] sm:$0xff] %vm69_vm6, %v1315_v42 }
 0x2ff   :  { %v579_v22 = vpack.c.bf16 %v571_v19, %v570_v18  ;;  %1172 = vmatprep.mubr.msk.bf16.mxu0 %vm1317_vm5, %v1315_v42  ;;  %v1054_v19 = vld [vmem:[%s1642_s2] ss:$0 sm:$0xff] }
 0x300   :  { %v578_v23 = vpack.c.bf16 %v569_v21, %v568_v20 }
 0x302   :  { %1160 = vmatprep.mubr.msk.bf16.mxu1 %vm270_vm3, %v578_v23 }
 0x303   :  { %1161 = vmatmul.mubr.msk.bf16.gmra.mrb[12].mxu1 %vm270_vm3, %v579_v22 }
 0x304   :  { %1178 = vmatprep.mubr.msk.bf16.mxu1 %vm1317_vm5, %v1315_v42 }
 0x3ce   :  { %v1158_v26 = vpop.f32.mrb[8].mxu1 }
 0x3cf   :  { %v644_v27 = vadd.f32 %v1158_v26, %v1070_v25  ;;  %v635_v28 = vpop.f32.mrb[9].mxu1 }
 0x3d0   :  { %v636_v29 = vadd.f32 %v1070_v25, %v635_v28  ;;  %v1159_v30 = vpop.f32.mrb[10].mxu1 }
 0x3d1   :  { %686 = vperm.xlu1 %1204, %v644_v27   ;;  %v638_v31 = vpop.f32.mrb[11].mxu1  ;;  %v647_v32 = vadd.f32 %v1159_v30, %v1070_v25  ;;  %v1588_v30 = vld [vmem:[%s1645_s5 + $0x8] sm:$0xff] }
 0x3d2   :  { %676 = vperm.xlu0 %1203, %v636_v29   ;;  %v639_v33 = vadd.f32 %v1070_v25, %v638_v31  ;;  %v1583_v29 = vld [vmem:[%s1645_s5] sm:$0xff]  ;;  %s1318_s5 = smov 112  }
 0x3d3   :  { %v822_v31 = vpack.c.bf16 %v1588_v30, %v1583_v29 }
 0x3d5   :  { %691 = vperm.xlu1 %1204, %v647_v32   ;;  %v750_v32 = vld [vmem:[#allocation2] sm:$0xff] }
 0x3d6   :  { %v1162_v34 = vpop.f32.mrb[12].mxu1  ;;  %681 = vperm.xlu0 %1203, %v639_v33  }
 0x3d7   :  { %v651_v35 = vpop.f32.mrb[13].mxu1  ;;  %v660_v40 = vadd.f32 %v1162_v34, %v1070_v25  ;;  %v751_v34 = vld [vmem:[#allocation2 + $0x8] sm:$0xff] }
 0x3d8   :  { %v652_v36 = vadd.f32 %v1070_v25, %v651_v35  ;;  %v1163_v37 = vpop.f32.mrb[14].mxu1 }
 0x3d9   :  { %v654_v38 = vpop.f32.mrb[15].mxu1  ;;  %v663_v41 = vadd.f32 %v1163_v37, %v1070_v25 }
 0x3da   :  { %v655_v39 = vadd.f32 %v1070_v25, %v654_v38  ;;  %696 = vperm.xlu0 %1203, %v652_v36   ;;  %v825_v25 = vld [vmem:[%s1643_s15 + $0x8] sm:$0xff] }
 0x3dc   :  { %701 = vperm.xlu1 %1204, %v655_v39  }
 0x3de   :  { %706 = vperm.xlu0 %1203, %v660_v40  }
 0x3e0   :  { %711 = vperm.xlu1 %1204, %v663_v41  }
 0x450   :  { %v687_v43 = vpop.permute.xlu1 %686 }
 0x451   :  { %v677_v44 = vpop.permute.xlu0 %676  ;;  %v716_v50 = vmul.f32 %v687_v43, %v668_v45 }
 0x452   :  { %v714_v53 = vmul.f32 %v677_v44, %v666_v47 }
 0x454   :  { %v692_v49 = vpop.permute.xlu1 %691 }
 0x455   :  { %v717_v51 = vmul.f32 %v692_v49, %v669_v46  ;;  %v682_v52 = vpop.permute.xlu0 %681  ;;  %v945_v49 = vld [vmem:[%s1646_s17 + $0x8] sm:$0xff] }
 0x456   :  { %v715_v54 = vmul.f32 %v682_v52, %v667_v48  ;;  %v944_v48 = vld [vmem:[%s1646_s17] sm:$0xff]  ;;  %v947_v52 = vld [vmem:[%s1646_s17 + $0x18] sm:$0xff] }
 0x457   :  { %v723_v55 = vpack.c.bf16 %v717_v51, %v716_v50  ;;  %v949_v50 = vpack.c.bf16 %v945_v49, %v944_v48  ;;  %v946_v51 = vld [vmem:[%s1646_s17 + $0x10] sm:$0xff] }
 0x458   :  { %v722_v56 = vpack.c.bf16 %v715_v54, %v714_v53  ;;  %v950_v53 = vpack.c.bf16 %v947_v52, %v946_v51 }
 0x459   :  { %732 = vrot.lane.b32.xlu1 %v723_v55, %s1316_s9  ;;  %v697_v57 = vpop.permute.xlu0 %696  ;;  %v1078_v55 = vld [vmem:[%s1647_s16] ss:$0 sm:$0xff] }
 0x45a   :  { %730 = vrot.lane.b32.xlu0 %v722_v56, %s1316_s9  ;;  %v718_v3 = vmul.f32 %v697_v57, %v670_v60 }
 0x45b   :  { %v702_v61 = vpop.permute.xlu1 %701 }
 0x45c   :  { %v719_v63 = vmul.f32 %v702_v61, %v671_v58 }
 0x45d   :  { %410 = vperm.xlu1 %1204, %v405_v59   ;;  %v707_v1 = vpop.permute.xlu0 %706 }
 0x45e   :  { %407 = vperm.xlu0 %1203, %v404_v62   ;;  %v724_v7 = vpack.c.bf16 %v719_v63, %v718_v3  ;;  %v720_v8 = vmul.f32 %v707_v1, %v672_v0 }
 0x45f   :  { %v712_v6 = vpop.permute.xlu1 %711 }
 0x460   :  { %v721_v9 = vmul.f32 %v712_v6, %v673_v2 }
 0x462   :  { %v725_v10 = vpack.c.bf16 %v721_v9, %v720_v8  ;;  %734 = vrot.lane.b32.xlu0 %v724_v7, %s1316_s9 }
 0x464   :  { %736 = vrot.lane.b32.xlu1 %v725_v10, %s1316_s9 }
 0x4cb   :  { %v733_v13 = vpop.permute.xlu1 %732 }
 0x4cc   :  { %v731_v11 = vpop.permute.xlu0 %730  ;;  %v742_v16 = vsel %vm438_vm4, %v1473_v4, %v733_v13 }
 0x4cd   :  { %v739_v12 = vsel %vm438_vm4, %v1475_v5, %v731_v11 }
 0x4ce   :  { %1165 = vmatpush3.bf16.msra.mxu0 %v739_v12  ;;  %v1082_v12 = vld [vmem:[%s1648_s18] ss:$0 sm:$0xff] }
 0x4cf   :  { %1166 = vmatprep.subr.bf16.mxu0 %v1315_v42 }
 0x4d2   :  { %1167 = vmatpush3.bf16.msra.mxu0 %v742_v16 }
 0x4d3   :  { %1168 = vmatprep.subr.bf16.mxu0 %v1315_v42 }
 0x4dc   :  { %v411_v17 = vpop.permute.xlu1 %410 }
 0x4dd   :  { %v408_v18 = vpop.permute.xlu0 %407  ;;  %vm418_vm7 = vcmp.eq.s32.totalorder %v411_v17, %v1054_v19 }
 0x4de   :  { %vm417_vm8 = vcmp.eq.s32.totalorder %v408_v18, %v1054_v19  ;;  %v1056_v4 = vsel %vm418_vm7, 1.0, %v1315_v42 }
 0x4df   :  { %v1055_v22 = vsel %vm417_vm8, 1.0, %v1315_v42 }
 0x4e0   :  { %v737_v21 = vpop.permute.xlu1 %736  ;;  %v423_v24 = vpack.c.bf16 %v1056_v4, %v1055_v22  ;;  %v810_v22 = vld [vmem:[%s1649_s4 + $0x8] sm:$0xff] }
 0x4e1   :  { %v735_v20 = vpop.permute.xlu0 %734  ;;  %v748_v23 = vsel %vm438_vm4, %v1481_v14, %v737_v21  ;;  %v821_v14 = vld [vmem:[%s1644_s14] sm:$0xff] }
 0x4e2   :  { %v745_v5 = vsel %vm438_vm4, %v1483_v15, %v735_v20  ;;  %v824_v15 = vld [vmem:[%s1643_s15] sm:$0xff]  ;;  %v823_v27 = vpack.c.bf16 %v821_v14, %v821_v14 }
 0x4e3   :  { %1169 = vmatpush3.bf16.msra.mxu0 %v745_v5  ;;  %v827_v26 = vpack.c.bf16 %v825_v25, %v824_v15  ;;  %v809_v21 = vld [vmem:[%s1649_s4] sm:$0xff] }
 0x4e4   :  { %1170 = vmatprep.subr.bf16.mxu0 %v1315_v42  ;;  %v878_v28 = vsel %vm876_vm10, %v823_v27, 0 }
 0x4e5   :  { %1177 = vmatpush3.bf16.msra.mxu1 %v827_v26 }
 0x4e6   :  { %1188 = vmatprep.subr.bf16.mxu1 %v1315_v42 }
 0x4e7   :  { %1171 = vmatpush3.bf16.msra.mxu0 %v748_v23 }
 0x4e8   :  { %1182 = vmatprep.subr.bf16.mxu0 %v1315_v42 }
 0x4ea   :  { %1173 = vmatmul.mubr.msk.bf16.vlgmr.msra.gmra.mrb[16].mxu0 %vm752_vm9, %v423_v24 }
 0x4eb   :  { %1184 = vmatprep.mubr.msk.bf16.mxu0 %vm1317_vm5, %v1315_v42  ;;  %1183 = vmatpush3.bf16.msra.mxu0 %v878_v28 }
 0x4f2   :  { %1185 = vmatmul.mubr.msk.bf16.vlgmr.msra.gmra.mrb[20].mxu0 %vm872_vm11, %v822_v31 }
 0x5bd   :  { %v790_v33 = vpop.f32.mrb[16].mxu0 }
 0x5be   :  { %v797_v35 = vadd.f32 %v790_v33, %v750_v32  ;;  %v1174_v36 = vpop.f32.mrb[17].mxu0 }
 0x5bf   :  { %v793_v37 = vpop.f32.mrb[18].mxu0 }
 0x5c0   :  { %800 = vst.msk [vmem:[#allocation2] sm:$0xff] %vm69_vm6, %v797_v35  ;;  %v798_v38 = vadd.f32 %v793_v37, %v751_v34  ;;  %v1175_v39 = vpop.f32.mrb[19].mxu0 }
 0x5c2   :  { %801 = vst.msk [vmem:[#allocation2 + $0x8] sm:$0xff] %vm69_vm6, %v798_v38 }
 0x5c5   :  { %v914_v44 = vpop.f32.mrb[20].mxu0 }
 0x5c6   :  { %v1186_v45 = vpop.f32.mrb[21].mxu0 }
 0x5c7   :  { %v805_v40 = vld [vmem:[#allocation2] sm:$0xff]  ;;  %v917_v46 = vpop.f32.mrb[22].mxu0 }
 0x5c8   :  { %813 = vrot.lane.b32.xlu0 %v805_v40, %s1318_s5  ;;  %v1187_v47 = vpop.f32.mrb[23].mxu0 }
 0x5c9   :  { %v806_v41 = vld [vmem:[#allocation2 + $0x8] sm:$0xff] }
 0x5ca   :  { %815 = vrot.lane.b32.xlu1 %v806_v41, %s1318_s5  ;;  %v826_v43 = vpack.c.bf16 %v806_v41, %v805_v40 }
 0x5cc   :  { %1179 = vmatmul.mubr.msk.bf16.vlgmr.msra.gmra.mrb[16].mxu1 %vm438_vm4, %v826_v43 }
 0x5cd   :  { %1192 = vmatprep.mubr.msk.bf16.mxu1 %vm1317_vm5, %v1315_v42  ;;  %1189 = vmatpush3.bf16.msra.mxu1 %v949_v50 }
 0x5ce   :  { %1190 = vmatprep.subr.bf16.mxu1 %v1315_v42 }
 0x5d1   :  { %1191 = vmatpush3.bf16.msra.mxu1 %v950_v53 }
 0x63a   :  { %v814_v4 = vpop.permute.xlu0 %813 }
 0x63b   :  { %v819_v24 = vadd.f32 %v814_v4, %v809_v21 }
 0x63c   :  { %v816_v23 = vpop.permute.xlu1 %815 }
 0x63d   :  { %v820_v25 = vadd.f32 %v816_v23, %v810_v22 }
 0x69f   :  { %v865_v54 = vpop.f32.mrb[16].mxu1 }
 0x6a0   :  { %v915_v56 = vadd.f32 %v914_v44, %v865_v54  ;;  %v1180_v57 = vpop.f32.mrb[17].mxu1 }
 0x6a1   :  { %v868_v58 = vpop.f32.mrb[18].mxu1 }
 0x6a2   :  { %v928_v59 = vadd.f32 %v1078_v55, %v915_v56  ;;  %v918_v42 = vadd.f32 %v917_v46, %v868_v58  ;;  %v1181_v60 = vpop.f32.mrb[19].mxu1 }
 0x6a4   :  { %v1079_v61 = vmul.f32 -1.442695, %v928_v59  ;;  %v929_v62 = vadd.f32 %v1078_v55, %v918_v42 }
 0x6a6   :  { %1305 = vpow2.f32 %v1079_v61  ;;  %v1080_v63 = vmul.f32 -1.442695, %v929_v62 }
 0x6a8   :  { %1307 = vpow2.f32 %v1080_v63 }
 0x6b0   :  { %v1306_v0 = vpop.eup %1305 }
 0x6b1   :  { %v936_v1 = vadd.f32 1.0, %v1306_v0 }
 0x6b2   :  { %v1308_v2 = vpop.eup %1307 }
 0x6b3   :  { %1309 = vrcp.f32 %v936_v1  ;;  %v937_v3 = vadd.f32 1.0, %v1308_v2 }
 0x6b5   :  { %1311 = vrcp.f32 %v937_v3 }
 0x6bd   :  { %v1310_v6 = vpop.eup %1309 }
 0x6be   :  { %v942_v8 = vmul.f32 %v1310_v6, %v928_v59 }
 0x6bf   :  { %v1312_v7 = vpop.eup %1311 }
 0x6c0   :  { %v943_v9 = vmul.f32 %v1312_v7, %v929_v62 }
 0x6c2   :  { %v948_v10 = vpack.c.bf16 %v943_v9, %v942_v8 }
 0x6c4   :  { %1193 = vmatmul.mubr.msk.bf16.vlgmr.msra.gmra.mrb[20].mxu1 %vm270_vm3, %v948_v10 }
 0x797   :  { %v988_v11 = vpop.f32.mrb[20].mxu1 }
 0x798   :  { %v995_v13 = vadd.f32 %v988_v11, %v1583_v29  ;;  %v1194_v16 = vpop.f32.mrb[21].mxu1 }
 0x799   :  { %v991_v17 = vpop.f32.mrb[22].mxu1 }
 0x79a   :  { %v1004_v18 = vadd.f32 %v1082_v12, %v995_v13  ;;  %v996_v19 = vadd.f32 %v991_v17, %v1588_v30  ;;  %v1195_v20 = vpop.f32.mrb[23].mxu1 }
 0x79c   :  { %v1005_v5 = vadd.f32 %v1082_v12, %v996_v19  ;;  %1008 = vrot.lane.b32.xlu0 %v1004_v18, %s1319_s27 }
 0x79e   :  { %1010 = vrot.lane.b32.xlu1 %v1005_v5, %s1319_s27 }
 0x80e   :  { %v1009_v15 = vpop.permute.xlu0 %1008 }
 0x80f   :  { %v1015_v26 = vsel %vm1014_vm12, %v819_v24, %v1009_v15 }
 0x810   :  { %1018 = vst.msk [vmem:[%s1650_s19] sm:$0xff] %vm1017_vm13, %v1015_v26  ;;  %v1011_v14 = vpop.permute.xlu1 %1010 }
 0x811   :  { %v1016_v27 = vsel %vm1014_vm12, %v820_v25, %v1011_v14 }
 0x812   :  { %1019 = vst.msk [vmem:[%s1650_s19 + $0x8] sm:$0xff] %vm1017_vm13, %v1016_v27 }

// kernel: ehgn_forward.15
= control target key start
LH: loop header
LB: loop body
LE: loop exit
PB: predicated region body
PF: predicated region fallthrough
CT: control target
= control target key end

     0   :  { %vm57_vm0 = vcmask 1043456   ;;  %vm50_vm1 = vcmask 64512   ;;  %vm129_vm2 = vcmask 261120   ;;  %vm259_vm3 = vcmask 23552   ;;  %s413_s1 = inlined_call_operand.vmem [shape: f32[8,32], index: 1, kind: input, shape index: {}]   ;;  %s414_s0 = inlined_call_operand.vmem [shape: bf16[32,8], index: 0, kind: input, shape index: {}]   ;;  %s415_s3 = inlined_call_operand.vmem [shape: f32[32,32], index: 3, kind: input, shape index: {}]   ;;  %s416_s2 = inlined_call_operand.vmem [shape: f32[1,32], index: 2, kind: input, shape index: {}]   ;;  %s417_s5 = inlined_call_operand.vmem [shape: f32[32,3], index: 5, kind: input, shape index: {}]   ;;  %s418_s4 = inlined_call_operand.vmem [shape: f32[1,32], index: 4, kind: input, shape index: {}]   ;;  %s419_s6 = inlined_call_operand.vmem [shape: f32[1,3], index: 6, kind: input, shape index: {}]   ;;  %s420_s7 = inlined_call_operand.vmem [shape: f32[32,3], index: 7, kind: output, shape index: {}]  }
   0x1   :  { %v31_v0 = vld [vmem:[%s413_s1] sm:$0xff]  ;;  %v314_v4 = vld [vmem:[%s414_s0 + $0x8] sm:$0xff]   ;;  %v116_v8 = vld [vmem:[%s415_s3 + $0x10] sm:$0xff] }
   0x2   :  { %v32_v1 = vpack.c.bf16 %v31_v0, %v31_v0  ;;  %v313_v2 = vld [vmem:[%s414_s0] sm:$0xff]   ;;  %v115_v6 = vld [vmem:[%s415_s3 + $0x8] sm:$0xff]  ;;  %v117_v9 = vld [vmem:[%s415_s3 + $0x18] sm:$0xff] }
   0x3   :  { %292 = vmatprep.mubr.msk.bf16.mxu0 %vm50_vm1, %v313_v2  ;;  %v114_v5 = vld [vmem:[%s415_s3] sm:$0xff]  ;;  %v121_v10 = vpack.c.bf16 %v117_v9, %v116_v8  ;;  %v190_v27 = vld [vmem:[%s417_s5 + $0x8] sm:$0xff]  ;;  %v191_v29 = vld [vmem:[%s417_s5 + $0x10] sm:$0xff] }
   0x4   :  { %312 = vmatprep.subr.msk.bf16.mxu0 %vm57_vm0, %v32_v1  ;;  %v59_v3 = vsel %vm57_vm0, %v32_v1, 0  ;;  %v120_v7 = vpack.c.bf16 %v115_v6, %v114_v5  ;;  %v268_v11 = vld [vmem:[%s416_s2] ss:$0 sm:$0xff]  ;;  %v192_v30 = vld [vmem:[%s417_s5 + $0x18] sm:$0xff] }
   0x5   :  { %291 = vmatpush3.bf16.msra.mxu0 %v59_v3  ;;  %v189_v26 = vld [vmem:[%s417_s5] sm:$0xff]  ;;  %v196_v31 = vpack.c.bf16 %v192_v30, %v191_v29 }
   0x6   :  { %296 = vmatprep.subr.bf16.mxu1 %v120_v7  ;;  %v195_v28 = vpack.c.bf16 %v190_v27, %v189_v26  ;;  %v273_v32 = vld [vmem:[%s418_s4] ss:$0 sm:$0xff] }
   0x7   :  { %297 = vmatpush3.bf16.msra.mxu1 %v120_v7  ;;  %v276_v47 = vld [vmem:[%s419_s6] ss:$0 sm:$0xff] }
   0x8   :  { %293 = vmatmul.mubr.msk.bf16.vlgmr.msra.gmra.mrb[0].mxu0 %vm50_vm1, %v314_v4  ;;  %298 = vmatprep.subr.bf16.mxu1 %v121_v10 }
   0x9   :  { %304 = vmatprep.subr.bf16.mxu0 %v195_v28 }
   0xa   :  { %305 = vmatpush3.bf16.msra.mxu0 %v195_v28 }
   0xb   :  { %299 = vmatpush3.bf16.msra.mxu1 %v121_v10  ;;  %306 = vmatprep.subr.bf16.mxu0 %v196_v31 }
   0xe   :  { %307 = vmatpush3.bf16.msra.mxu0 %v196_v31 }
  0xdb   :  { %v294_v12 = vpop.f32.mrb[0].mxu0 }
  0xdc   :  { %v104_v13 = vadd.f32 %v294_v12, %v268_v11  ;;  %v95_v14 = vpop.f32.mrb[1].mxu0 }
  0xdd   :  { %v96_v15 = vadd.f32 %v268_v11, %v95_v14  ;;  %v295_v16 = vpop.f32.mrb[2].mxu0 }
  0xde   :  { %v107_v17 = vadd.f32 %v295_v16, %v268_v11  ;;  %v98_v18 = vpop.f32.mrb[3].mxu0  ;;  %v112_v20 = vmax.f32 %v104_v13, 0.0 }
  0xdf   :  { %v99_v19 = vadd.f32 %v268_v11, %v98_v18  ;;  %v110_v22 = vmax.f32 %v96_v15, 0.0 }
  0xe0   :  { %v113_v21 = vmax.f32 %v107_v17, 0.0 }
  0xe1   :  { %v111_v23 = vmax.f32 %v99_v19, 0.0 }
  0xe2   :  { %v119_v24 = vpack.c.bf16 %v113_v21, %v112_v20 }
  0xe3   :  { %v118_v25 = vpack.c.bf16 %v111_v23, %v110_v22 }
  0xe5   :  { %300 = vmatprep.mubr.msk.bf16.mxu1 %vm129_vm2, %v118_v25 }
  0xe6   :  { %301 = vmatmul.mubr.msk.bf16.vlgmr.msra.gmra.mrb[0].mxu1 %vm129_vm2, %v119_v24 }
 0x1b9   :  { %v302_v33 = vpop.f32.mrb[0].mxu1 }
 0x1ba   :  { %v179_v34 = vadd.f32 %v302_v33, %v273_v32  ;;  %v170_v35 = vpop.f32.mrb[1].mxu1 }
 0x1bb   :  { %v171_v36 = vadd.f32 %v273_v32, %v170_v35  ;;  %v303_v37 = vpop.f32.mrb[2].mxu1 }
 0x1bc   :  { %v182_v38 = vadd.f32 %v303_v37, %v273_v32  ;;  %v173_v39 = vpop.f32.mrb[3].mxu1  ;;  %v187_v41 = vmax.f32 %v179_v34, 0.0 }
 0x1bd   :  { %v174_v40 = vadd.f32 %v273_v32, %v173_v39  ;;  %v185_v43 = vmax.f32 %v171_v36, 0.0 }
 0x1be   :  { %v188_v42 = vmax.f32 %v182_v38, 0.0 }
 0x1bf   :  { %v186_v44 = vmax.f32 %v174_v40, 0.0 }
 0x1c0   :  { %v194_v45 = vpack.c.bf16 %v188_v42, %v187_v41 }
 0x1c1   :  { %v193_v46 = vpack.c.bf16 %v186_v44, %v185_v43 }
 0x1c3   :  { %308 = vmatprep.mubr.msk.bf16.mxu0 %vm129_vm2, %v193_v46 }
 0x1c4   :  { %309 = vmatmul.mubr.msk.bf16.vlgmr.msra.gmra.mrb[4].mxu0 %vm129_vm2, %v194_v45 }
 0x297   :  { %v310_v48 = vpop.f32.mrb[4].mxu0 }
 0x298   :  { %v253_v49 = vadd.f32 %v310_v48, %v276_v47  ;;  %v244_v50 = vpop.f32.mrb[5].mxu0 }
 0x299   :  { %v245_v51 = vadd.f32 %v276_v47, %v244_v50  ;;  %v311_v52 = vpop.f32.mrb[6].mxu0 }
 0x29a   :  { %262 = vst.msk [vmem:[%s420_s7 + $0x10] sm:$0xff] %vm259_vm3, %v253_v49  ;;  %v256_v53 = vadd.f32 %v311_v52, %v276_v47  ;;  %v247_v54 = vpop.f32.mrb[7].mxu0 }
 0x29b   :  { %260 = vst.msk [vmem:[%s420_s7] sm:$0xff] %vm259_vm3, %v245_v51  ;;  %v248_v55 = vadd.f32 %v276_v47, %v247_v54 }
 0x29c   :  { %263 = vst.msk [vmem:[%s420_s7 + $0x18] sm:$0xff] %vm259_vm3, %v256_v53 }
 0x29d   :  { %261 = vst.msk [vmem:[%s420_s7 + $0x8] sm:$0xff] %vm259_vm3, %v248_v55 }

// kernel: ehgn_forward.12
= control target key start
LH: loop header
LB: loop body
LE: loop exit
PB: predicated region body
PF: predicated region fallthrough
CT: control target
= control target key end

     0   :  { %vm45_vm0 = vcmask 64512   ;;  %vm156_vm1 = vcmask 1042432   ;;  %v696_v3 = vmov 0   ;;  %vm143_vm2 = vcmask 23552   ;;  %s874_s7 = inlined_call_operand.vmem [shape: f32[8,10], index: 7, kind: input, shape index: {}]   ;;  %s875_s1 = inlined_call_operand.vmem [shape: f32[32,8], index: 1, kind: input, shape index: {}]   ;;  %s876_s6 = inlined_call_operand.vmem [shape: f32[3,10], index: 6, kind: input, shape index: {}]   ;;  %s877_s2 = inlined_call_operand.vmem [shape: f32[32,1], index: 2, kind: input, shape index: {}]   ;;  %s878_s0 = inlined_call_operand.vmem [shape: f32[32,3], index: 0, kind: input, shape index: {}]   ;;  %s879_s3 = inlined_call_operand.vmem [shape: s32[32,1], index: 3, kind: input, shape index: {}]   ;;  %s880_s4 = inlined_call_operand.vmem [shape: f32[10,3], index: 4, kind: input, shape index: {}]   ;;  %s881_s5 = inlined_call_operand.vmem [shape: f32[10,8], index: 5, kind: input, shape index: {}]   ;;  %s882_s8 = inlined_call_operand.vmem [shape: f32[1,10], index: 8, kind: input, shape index: {}]   ;;  %s883_s9 = inlined_call_operand.vmem [shape: s32[1,10], index: 9, kind: input, shape index: {}]   ;;  %s884_s10 = inlined_call_operand.vmem [shape: f32[32,11], index: 10, kind: output, shape index: {}]  }
   0x1   :  { %v44_v0 = vld [vmem:[%s874_s7] sm:$0xff]  ;;  %v41_v2 = vld [vmem:[%s875_s1 + $0x8] sm:$0xff]  ;;  %678 = vset.pattern.permute.xlu0 %v696_v3  ;;  %679 = vset.pattern.permute.xlu1 %v696_v3  ;;  %v42_v5 = vld [vmem:[%s875_s1 + $0x10] sm:$0xff]  ;;  %vm364_vm3 = vcmask 1041408   ;;  %vm697_vm4 = vmmov 1   ;;  %vm329_vm6 = vcmask 80896  }
   0x2   :  { %v40_v1 = vld [vmem:[%s875_s1] sm:$0xff]  ;;  %623 = vmatprep.subr.mxu0 %v44_v0  ;;  %v247_v7 = vld [vmem:[%s877_s2 + $0x10] sm:$0xff]  ;;  %v43_v8 = vld [vmem:[%s875_s1 + $0x18] sm:$0xff]  ;;  %vm571_vm11 = vcmask 89088  }
   0x3   :  { %625 = vmatprep.mubr.msk.f32.mxu0 %vm45_vm0, %v40_v1  ;;  %v39_v4 = vld [vmem:[%s876_s6] sm:$0x7]  ;;  %624 = vmatpush3.msra.mxu0 %v44_v0  ;;  %v246_v10 = vld [vmem:[%s877_s2 + $0x8] sm:$0xff]  ;;  %v248_v11 = vld [vmem:[%s877_s2 + $0x18] sm:$0xff] }
   0x4   :  { %626 = vmatmul.mubr.msk.f32.vlgmr.msra.gmra.mrb[0].mxu0 %vm45_vm0, %v41_v2  ;;  %631 = vmatprep.subr.msk.mxu0 %vm156_vm1, %v39_v4  ;;  %v245_v6 = vld [vmem:[%s877_s2] sm:$0xff]  ;;  %v36_v12 = vld [vmem:[%s878_s0 + $0x8] sm:$0xff]  ;;  %v37_v13 = vld [vmem:[%s878_s0 + $0x10] sm:$0xff] }
   0x5   :  { %632 = vmatpush3.msk.msra.mxu0 %vm156_vm1, %v39_v4  ;;  %628 = vmatprep.mubr.msk.f32.mxu0 %vm45_vm0, %v42_v5  ;;  %v35_v9 = vld [vmem:[%s878_s0] sm:$0xff]  ;;  %v289_v15 = vld [vmem:[%s879_s3 + $0x8] sm:$0xff]  ;;  %v38_v16 = vld [vmem:[%s878_s0 + $0x18] sm:$0xff] }
   0x6   :  { %252 = vperm.xlu0 %678, %v245_v6   ;;  %262 = vperm.xlu1 %679, %v247_v7   ;;  %v288_v14 = vld [vmem:[%s879_s3] sm:$0xff]  ;;  %v290_v17 = vld [vmem:[%s879_s3 + $0x10] sm:$0xff]  ;;  %v291_v18 = vld [vmem:[%s879_s3 + $0x18] sm:$0xff] }
   0x7   :  { %v350_v19 = vld [vmem:[%s880_s4] sm:$0xff]  ;;  %v351_v20 = vld [vmem:[%s880_s4 + $0x8] sm:$0x3]  ;;  %vm822_vm5 = vmpackc.low %vm364_vm3, %vm697_vm4 }
   0x8   :  { %629 = vmatmul.mubr.msk.f32.gmra.mrb[2].mxu0 %vm45_vm0, %v43_v8  ;;  %v659_v22 = vpack.c.bf16 %v351_v20, %v350_v19  ;;  %v457_v23 = vld [vmem:[%s881_s5] sm:$0xff]  ;;  %v458_v24 = vld [vmem:[%s881_s5 + $0x8] sm:$0x3] }
   0x9   :  { %633 = vmatprep.mubr.msk.f32.mxu0 %vm143_vm2, %v35_v9  ;;  %v665_v25 = vpack.c.bf16 %v458_v24, %v457_v23  ;;  %v589_v27 = vld [vmem:[%s882_s8] ss:$0 sm:$0xff] }
   0xa   :  { %257 = vperm.xlu0 %678, %v246_v10   ;;  %267 = vperm.xlu1 %679, %v248_v11   ;;  %v590_v53 = vld [vmem:[%s883_s9] ss:$0 sm:$0xff]  ;;  %s698_s9 = smov 3  }
   0xb   :  { %661 = vmatprep.subr.msk.bf16.mxu1 %vm822_vm5, %v659_v22 }
   0xc   :  { %634 = vmatmul.mubr.msk.f32.vlgmr.msra.gmra.mrb[0].mxu0 %vm143_vm2, %v36_v12  ;;  %664 = vmatpush3.bf16.msk.msra.mxu1 %vm822_vm5, %v659_v22 }
   0xd   :  { %636 = vmatprep.mubr.msk.f32.mxu0 %vm143_vm2, %v37_v13  ;;  %667 = vmatprep.subr.msk.bf16.mxu1 %vm822_vm5, %v665_v25 }
   0xe   :  { %294 = vperm.xlu0 %678, %v288_v14   ;;  %297 = vperm.xlu1 %679, %v289_v15  }
  0x10   :  { %637 = vmatmul.mubr.msk.f32.gmra.mrb[2].mxu0 %vm143_vm2, %v38_v16 }
  0x12   :  { %300 = vperm.xlu0 %678, %v290_v17   ;;  %303 = vperm.xlu1 %679, %v291_v18  }
  0x85   :  { %v253_v26 = vpop.permute.xlu0 %252  ;;  %v263_v28 = vpop.permute.xlu1 %262 }
  0x86   :  { %v276_v34 = vadd.f32 %v589_v27, %v253_v26  ;;  %v278_v44 = vadd.f32 %v589_v27, %v263_v28 }
  0x89   :  { %v258_v29 = vpop.permute.xlu0 %257  ;;  %v268_v37 = vpop.permute.xlu1 %267 }
  0x8a   :  { %v277_v31 = vadd.f32 %v589_v27, %v258_v29  ;;  %v279_v40 = vadd.f32 %v589_v27, %v268_v37 }
  0x8d   :  { %v295_v51 = vpop.permute.xlu0 %294  ;;  %v298_v52 = vpop.permute.xlu1 %297 }
  0x8e   :  { %vm310_vm7 = vcmp.eq.s32.totalorder %v298_v52, %v590_v53  ;;  %vm309_vm8 = vcmp.eq.s32.totalorder %v295_v51, %v590_v53 }
  0x91   :  { %v301_v57 = vpop.permute.xlu0 %300  ;;  %v304_v60 = vpop.permute.xlu1 %303 }
  0x92   :  { %vm311_vm9 = vcmp.eq.s32.totalorder %v301_v57, %v590_v53  ;;  %vm312_vm10 = vcmp.eq.s32.totalorder %v304_v60, %v590_v53 }
  0xdf   :  { %v635_v30 = vpop.f32.mrb[0].mxu0 }
  0xe0   :  { %v281_v32 = vmul.f32 2.0, %v635_v30  ;;  %v226_v33 = vpop.f32.mrb[1].mxu0 }
  0xe1   :  { %v280_v35 = vmul.f32 2.0, %v226_v33 }
  0xe2   :  { %v285_v36 = vsub.f32 %v277_v31, %v281_v32 }
  0xe3   :  { %v284_v38 = vsub.f32 %v276_v34, %v280_v35  ;;  %v638_v39 = vpop.f32.mrb[2].mxu0 }
  0xe4   :  { %v314_v41 = vmax.f32 %v285_v36, 1e-16  ;;  %v283_v42 = vmul.f32 2.0, %v638_v39  ;;  %v236_v43 = vpop.f32.mrb[3].mxu0 }
  0xe5   :  { %v313_v45 = vmax.f32 %v284_v38, 1e-16  ;;  %v282_v46 = vmul.f32 2.0, %v236_v43 }
  0xe6   :  { %680 = vrcp.f32 %v314_v41  ;;  %v287_v47 = vsub.f32 %v279_v40, %v283_v42 }
  0xe7   :  { %682 = vrcp.f32 %v313_v45  ;;  %v286_v48 = vsub.f32 %v278_v44, %v282_v46 }
  0xe8   :  { %v316_v49 = vmax.f32 %v287_v47, 1e-16 }
  0xe9   :  { %v315_v50 = vmax.f32 %v286_v48, 1e-16 }
  0xea   :  { %684 = vrcp.f32 %v316_v49 }
  0xeb   :  { %686 = vrcp.f32 %v315_v50 }
  0xf0   :  { %v681_v54 = vpop.eup %680 }
  0xf1   :  { %v683_v55 = vpop.eup %682  ;;  %v326_v56 = vsel %vm310_vm7, %v681_v54, 0.0 }
  0xf2   :  { %v333_v58 = vsel %vm329_vm6, %v326_v56, 0.0  ;;  %v325_v59 = vsel %vm309_vm8, %v683_v55, 0.0 }
  0xf3   :  { %334 = vadd.xlane.f32.xlu1 %v333_v58  ;;  %643 = vmatprep.mubr.msk.f32.mxu1 %vm329_vm6, %v325_v59  ;;  %v330_v61 = vsel %vm329_vm6, %v325_v59, 0.0 }
  0xf4   :  { %v685_v62 = vpop.eup %684  ;;  %644 = vmatmul.mubr.msk.f32.vlgmr.msra.gmra.mrb[0].mxu1 %vm329_vm6, %v326_v56  ;;  %331 = vadd.xlane.f32.xlu0 %v330_v61 }
  0xf5   :  { %v687_v63 = vpop.eup %686  ;;  %670 = vmatpush3.bf16.msk.msra.mxu1 %vm822_vm5, %v665_v25  ;;  %v328_v1 = vsel %vm312_vm10, %v685_v62, 0.0 }
  0xf6   :  { %v327_v0 = vsel %vm311_vm9, %v687_v63, 0.0  ;;  %v339_v3 = vsel %vm329_vm6, %v328_v1, 0.0 }
  0xf7   :  { %646 = vmatprep.mubr.msk.f32.mxu1 %vm329_vm6, %v327_v0  ;;  %v336_v2 = vsel %vm329_vm6, %v327_v0, 0.0 }
  0xf8   :  { %647 = vmatmul.mubr.msk.f32.gmra.mrb[2].mxu1 %vm329_vm6, %v328_v1  ;;  %337 = vadd.xlane.f32.xlu0 %v336_v2 }
  0xf9   :  { %653 = vmatprep.mubr.msk.f32.mxu1 %vm329_vm6, %v325_v59 }
  0xfc   :  { %654 = vmatmul.mubr.msk.f32.vlgmr.msra.gmra.mrb[4].mxu1 %vm329_vm6, %v326_v56  ;;  %340 = vadd.xlane.f32.xlu0 %v339_v3 }
  0xfd   :  { %656 = vmatprep.mubr.msk.f32.mxu1 %vm329_vm6, %v327_v0 }
 0x100   :  { %657 = vmatmul.mubr.msk.f32.gmra.mrb[6].mxu1 %vm329_vm6, %v328_v1 }
 0x180   :  { %v335_v6 = vpop.xlane.xlu1 %334 }
 0x181   :  { %v332_v4 = vpop.xlane.xlu0 %331  ;;  %v343_v7 = vmax.f32 %v335_v6, 1e-30 }
 0x182   :  { %v342_v8 = vmax.f32 %v332_v4, 1e-30 }
 0x183   :  { %688 = vrcp.f32 %v343_v7 }
 0x184   :  { %690 = vrcp.f32 %v342_v8 }
 0x185   :  { %v338_v5 = vpop.xlane.xlu0 %337 }
 0x186   :  { %v344_v11 = vmax.f32 %v338_v5, 1e-30 }
 0x189   :  { %v341_v9 = vpop.xlane.xlu0 %340 }
 0x18a   :  { %v345_v10 = vmax.f32 %v341_v9, 1e-30 }
 0x18c   :  { %692 = vrcp.f32 %v345_v10 }
 0x18d   :  { %694 = vrcp.f32 %v344_v11  ;;  %v689_v12 = vpop.eup %688 }
 0x18e   :  { %v691_v14 = vpop.eup %690 }
 0x196   :  { %v693_v18 = vpop.eup %692 }
 0x197   :  { %v695_v20 = vpop.eup %694 }
 0x1c7   :  { %v645_v13 = vpop.f32.mrb[0].mxu1 }
 0x1c8   :  { %v454_v15 = vmul.f32 %v689_v12, %v645_v13  ;;  %v434_v16 = vpop.f32.mrb[1].mxu1 }
 0x1c9   :  { %v453_v17 = vmul.f32 %v691_v14, %v434_v16 }
 0x1cb   :  { %v648_v19 = vpop.f32.mrb[2].mxu1 }
 0x1cc   :  { %v456_v21 = vmul.f32 %v693_v18, %v648_v19  ;;  %v444_v22 = vpop.f32.mrb[3].mxu1 }
 0x1cd   :  { %v455_v23 = vmul.f32 %v695_v20, %v444_v22 }
 0x1cf   :  { %v655_v24 = vpop.f32.mrb[4].mxu1 }
 0x1d0   :  { %v548_v25 = vmul.f32 %v689_v12, %v655_v24  ;;  %v528_v26 = vpop.f32.mrb[5].mxu1 }
 0x1d1   :  { %v547_v27 = vmul.f32 %v691_v14, %v528_v26 }
 0x1d2   :  { %557 = vrot.lane.b32.xlu0 %v548_v25, %s698_s9 }
 0x1d3   :  { %555 = vrot.lane.b32.xlu1 %v547_v27, %s698_s9  ;;  %v658_v28 = vpop.f32.mrb[6].mxu1 }
 0x1d4   :  { %v538_v29 = vpop.f32.mrb[7].mxu1  ;;  %v550_v31 = vmul.f32 %v693_v18, %v658_v28 }
 0x1d5   :  { %v549_v30 = vmul.f32 %v695_v20, %v538_v29 }
 0x1d7   :  { %559 = vrot.lane.b32.xlu1 %v549_v30, %s698_s9 }
 0x1db   :  { %561 = vrot.lane.b32.xlu1 %v550_v31, %s698_s9 }
 0x244   :  { %v558_v32 = vpop.permute.xlu0 %557 }
 0x245   :  { %v568_v33 = vsel %vm143_vm2, %v454_v15, %v558_v32  ;;  %v556_v34 = vpop.permute.xlu1 %555 }
 0x246   :  { %573 = vst.msk [vmem:[%s884_s10 + $0x8] sm:$0xff] %vm571_vm11, %v568_v33  ;;  %v567_v35 = vsel %vm143_vm2, %v453_v17, %v556_v34 }
 0x247   :  { %572 = vst.msk [vmem:[%s884_s10] sm:$0xff] %vm571_vm11, %v567_v35 }
 0x249   :  { %v560_v36 = vpop.permute.xlu1 %559 }
 0x24a   :  { %v569_v37 = vsel %vm143_vm2, %v455_v23, %v560_v36 }
 0x24b   :  { %574 = vst.msk [vmem:[%s884_s10 + $0x10] sm:$0xff] %vm571_vm11, %v569_v37 }
 0x24d   :  { %v562_v38 = vpop.permute.xlu1 %561 }
 0x24e   :  { %v570_v39 = vsel %vm143_vm2, %v456_v21, %v562_v38 }
 0x24f   :  { %575 = vst.msk [vmem:[%s884_s10 + $0x18] sm:$0xff] %vm571_vm11, %v570_v39 }

// kernel: ehgn_forward.14
= control target key start
LH: loop header
LB: loop body
LE: loop exit
PB: predicated region body
PF: predicated region fallthrough
CT: control target
= control target key end

     0   :  { %vm127_vm0 = vcmask 1041408   ;;  %vm128_vm1 = vcmask 1042432   ;;  %v1028_v3 = vmov 65535   ;;  %vm114_vm2 = vcmask 171008   ;;  %s1300_s1 = inlined_call_operand.vmem [shape: f32[64,3], index: 1, kind: input, shape index: {}]   ;;  %s1301_s6 = inlined_call_operand.vmem [shape: f32[21,32], index: 6, kind: input, shape index: {}]   ;;  %s1302_s10 = inlined_call_operand.vmem [shape: f32[16,32], index: 10, kind: input, shape index: {}]   ;;  %s1303_s11 = inlined_call_operand.vmem [shape: f32[1,32], index: 11, kind: input, shape index: {}]   ;;  %s1304_s12 = inlined_call_operand.vmem [shape: f32[32,1], index: 12, kind: input, shape index: {}]   ;;  %s1305_s13 = inlined_call_operand.<no memory space> [shape: f32[1,1], index: 13, kind: input, shape index: {}]   ;;  %s1306_s0 = inlined_call_operand.vmem [shape: bf16[64,21], index: 0, kind: input, shape index: {}]   ;;  %s1307_s8 = inlined_call_operand.vmem [shape: f32[32,16], index: 8, kind: input, shape index: {}]   ;;  %s1308_s3 = inlined_call_operand.vmem [shape: s32[32,1], index: 3, kind: input, shape index: {}]   ;;  %s1309_s7 = inlined_call_operand.vmem [shape: f32[1,32], index: 7, kind: input, shape index: {}]   ;;  %s1310_s2 = inlined_call_operand.vmem [shape: s32[1,64], index: 2, kind: input, shape index: {}]   ;;  %s1311_s9 = inlined_call_operand.vmem [shape: f32[1,16], index: 9, kind: input, shape index: {}]   ;;  %s1312_s15 = inlined_call_operand.vmem [shape: f32[16,32], index: 15, kind: input, shape index: {}]   ;;  %s1313_s14 = inlined_call_operand.vmem [shape: f32[8,32], index: 14, kind: input, shape index: {}]   ;;  %s1314_s5 = inlined_call_operand.vmem [shape: f32[32,8], index: 5, kind: input, shape index: {}]   ;;  %s1315_s17 = inlined_call_operand.vmem [shape: f32[32,8], index: 17, kind: input, shape index: {}]   ;;  %s1316_s16 = inlined_call_operand.vmem [shape: f32[1,32], index: 16, kind: input, shape index: {}]   ;;  %s1317_s18 = inlined_call_operand.vmem [shape: f32[1,8], index: 18, kind: input, shape index: {}]   ;;  %s1318_s4 = inlined_call_operand.vmem [shape: f32[32,3], index: 4, kind: input, shape index: {}]   ;;  %s1319_s19 = inlined_call_operand.vmem [shape: f32[32,11], index: 19, kind: output, shape index: {}]  }
   0x1   :  { %1321 = sst [smem:[#allocation4_spill]] %s1301_s6  ;;  %v129_v4 = vsel %vm127_vm0, 4294967295, %v1028_v3  ;;  %v944_v8 = vld [vmem:[%s1306_s0] sm:$0xff]   ;;  %v945_v10 = vld [vmem:[%s1306_s0 + $0x8] sm:$0xff]   ;;  %v946_v11 = vld [vmem:[%s1306_s0 + $0x10] sm:$0xff]   ;;  %v1029_v19 = vmov 0  }
   0x2   :  { %s1322_s13 = sld [smem:[#allocation4_spill]]  ;;  %v130_v7 = vsel %vm128_vm1, %v129_v4, 0  ;;  %881 = vmatprep.mubr.msk.bf16.mxu0 %vm114_vm2, %v944_v8  ;;  %v947_v12 = vld [vmem:[%s1306_s0 + $0x18] sm:$0xff]   ;;  %v255_v13 = vld [vmem:[%s1307_s8] sm:$0xff]  ;;  %v256_v14 = vld [vmem:[%s1307_s8 + $0x8] sm:$0xff]  ;;  %942 = vset.pattern.permute.xlu0 %v1029_v19  ;;  %vm272_vm3 = vcmask 261120  }
   0x3   :  { %v263_v15 = vpack.c.bf16 %v256_v14, %v255_v13  ;;  %v257_v16 = vld [vmem:[%s1307_s8 + $0x10] sm:$0xff]  ;;  %v258_v17 = vld [vmem:[%s1307_s8 + $0x18] sm:$0xff]  ;;  %943 = vset.pattern.permute.xlu1 %v1029_v19  ;;  %v406_v20 = vld [vmem:[%s1308_s3] sm:$0xff]  ;;  %vm449_vm8 = vcmask 523264   ;;  %vm69_vm9 = vcmask 130048   ;;  %vm600_vm10 = vcmask 1043456  }
   0x4   :  { %v264_v18 = vpack.c.bf16 %v258_v17, %v257_v16  ;;  %v408_v21 = vld [vmem:[%s1308_s3 + $0x10] sm:$0xff]  ;;  %411 = vperm.xlu0 %942, %v406_v20   ;;  %v407_v22 = vld [vmem:[%s1308_s3 + $0x8] sm:$0xff]  ;;  %v409_v23 = vld [vmem:[%s1308_s3 + $0x18] sm:$0xff]  ;;  %vm593_vm11 = vcmask 64512   ;;  %vm786_vm12 = vcmask 23552   ;;  %vm791_vm13 = vcmask 89088  }
   0x5   :  { %889 = vmatprep.subr.bf16.mxu1 %v263_v15  ;;  %417 = vperm.xlu1 %943, %v408_v21   ;;  %v800_v24 = vld [vmem:[%s1309_s7] ss:$0 sm:$0xff] }
   0x6   :  { %890 = vmatpush3.bf16.msra.mxu1 %v263_v15 }
   0x7   :  { %891 = vmatprep.subr.bf16.mxu1 %v264_v18 }
   0x8   :  { %v82_v0 = vld [vmem:[%s1322_s13] sm:$0xff]  ;;  %v83_v1 = vld [vmem:[%s1322_s13 + $0x8] sm:$0xff]  ;;  %v84_v2 = vld [vmem:[%s1322_s13 + $0x10] sm:$0x1f]  ;;  %414 = vperm.xlu0 %942, %v407_v22  }
   0x9   :  { %v85_v5 = vpack.c.bf16 %v83_v1, %v82_v0  ;;  %v86_v6 = vpack.c.bf16 %v84_v2, %v84_v2  ;;  %420 = vperm.xlu1 %943, %v409_v23   ;;  %v830_v23 = vld [vmem:[%s1310_s2] ss:$0 sm:$0xff]  ;;  %s1031_s2 = smov 3  }
   0xa   :  { %892 = vmatpush3.bf16.msra.mxu1 %v264_v18 }
   0xb   :  { %877 = vmatprep.subr.bf16.mxu0 %v85_v5  ;;  %v132_v9 = vand.u32 %v130_v7, %v86_v6 }
   0xc   :  { %878 = vmatpush3.bf16.msra.mxu0 %v85_v5 }
   0xd   :  { %879 = vmatprep.subr.bf16.mxu0 %v132_v9 }
  0x10   :  { %880 = vmatpush3.bf16.msra.mxu0 %v132_v9 }
  0x13   :  { %882 = vmatmul.mubr.msk.bf16.vlgmr.msra.gmra.mrb[0].mxu0 %vm114_vm2, %v945_v10 }
  0x14   :  { %885 = vmatprep.mubr.msk.bf16.mxu0 %vm114_vm2, %v946_v11 }
  0x1b   :  { %886 = vmatmul.mubr.msk.bf16.gmra.mrb[4].mxu0 %vm114_vm2, %v947_v12 }
  0x83   :  { %v412_v21 = vpop.permute.xlu0 %411 }
  0x84   :  { %v418_v22 = vpop.permute.xlu1 %417  ;;  %vm427_vm4 = vcmp.eq.s32.totalorder %v412_v21, %v830_v23 }
  0x85   :  { %vm429_vm5 = vcmp.eq.s32.totalorder %v418_v22, %v830_v23 }
  0xe6   :  { %v883_v25 = vpop.f32.mrb[0].mxu0 }
  0xe7   :  { %v177_v26 = vadd.f32 %v883_v25, %v800_v24  ;;  %v168_v27 = vpop.f32.mrb[1].mxu0  ;;  %v1030_v25 = vmov 0.0  }
  0xe8   :  { %v169_v28 = vadd.f32 %v800_v24, %v168_v27  ;;  %v884_v29 = vpop.f32.mrb[2].mxu0  ;;  %v1191_v27 = vsel %vm429_vm5, 1.0, %v1030_v25  ;;  %72 = vst.msk [vmem:[#allocation2 + $0x10] sm:$0xff] %vm69_vm9, %v1030_v25  ;;  %70 = vst.msk [vmem:[#allocation2] sm:$0xff] %vm69_vm9, %v1030_v25 }
  0xe9   :  { %v811_v30 = vmul.f32 -1.442695, %v177_v26  ;;  %v180_v31 = vadd.f32 %v884_v29, %v800_v24  ;;  %v171_v32 = vpop.f32.mrb[3].mxu0  ;;  %71 = vst.msk [vmem:[#allocation2 + $0x8] sm:$0xff] %vm69_vm9, %v1030_v25  ;;  %73 = vst.msk [vmem:[#allocation2 + $0x18] sm:$0xff] %vm69_vm9, %v1030_v25 }
  0xea   :  { %v809_v33 = vmul.f32 -1.442695, %v169_v28  ;;  %v172_v34 = vadd.f32 %v800_v24, %v171_v32 }
  0xeb   :  { %948 = vpow2.f32 %v811_v30  ;;  %v812_v35 = vmul.f32 -1.442695, %v180_v31 }
  0xec   :  { %950 = vpow2.f32 %v809_v33  ;;  %v810_v36 = vmul.f32 -1.442695, %v172_v34  ;;  %v817_v33 = vld [vmem:[%s1311_s9] ss:$0 sm:$0xff] }
  0xed   :  { %952 = vpow2.f32 %v812_v35 }
  0xee   :  { %954 = vpow2.f32 %v810_v36  ;;  %v887_v37 = vpop.f32.mrb[4].mxu0 }
  0xef   :  { %v193_v38 = vadd.f32 %v887_v37, %v800_v24  ;;  %v184_v39 = vpop.f32.mrb[5].mxu0 }
  0xf0   :  { %v185_v40 = vadd.f32 %v800_v24, %v184_v39  ;;  %v888_v41 = vpop.f32.mrb[6].mxu0 }
  0xf1   :  { %v815_v42 = vmul.f32 -1.442695, %v193_v38  ;;  %v196_v43 = vadd.f32 %v888_v41, %v800_v24  ;;  %v187_v44 = vpop.f32.mrb[7].mxu0 }
  0xf2   :  { %v813_v45 = vmul.f32 -1.442695, %v185_v40  ;;  %v188_v46 = vadd.f32 %v800_v24, %v187_v44  ;;  %v415_v24 = vpop.permute.xlu0 %414 }
  0xf3   :  { %956 = vpow2.f32 %v815_v42  ;;  %v816_v47 = vmul.f32 -1.442695, %v196_v43  ;;  %vm428_vm6 = vcmp.eq.s32.totalorder %v415_v24, %v830_v23 }
  0xf4   :  { %958 = vpow2.f32 %v813_v45  ;;  %v814_v48 = vmul.f32 -1.442695, %v188_v46  ;;  %v832_v29 = vsel %vm428_vm6, 1.0, %v1030_v25 }
  0xf5   :  { %v949_v49 = vpop.eup %948  ;;  %960 = vpow2.f32 %v816_v47 }
  0xf6   :  { %v951_v50 = vpop.eup %950  ;;  %v225_v51 = vadd.f32 1.0, %v949_v49  ;;  %962 = vpow2.f32 %v814_v48 }
  0xf7   :  { %v953_v52 = vpop.eup %952  ;;  %v223_v53 = vadd.f32 1.0, %v951_v50 }
  0xf8   :  { %v955_v54 = vpop.eup %954  ;;  %964 = vrcp.f32 %v225_v51  ;;  %v226_v55 = vadd.f32 1.0, %v953_v52 }
  0xf9   :  { %966 = vrcp.f32 %v223_v53  ;;  %v224_v56 = vadd.f32 1.0, %v955_v54 }
  0xfa   :  { %968 = vrcp.f32 %v226_v55 }
  0xfb   :  { %970 = vrcp.f32 %v224_v56 }
  0xfd   :  { %v957_v57 = vpop.eup %956 }
  0xfe   :  { %v959_v58 = vpop.eup %958  ;;  %v229_v59 = vadd.f32 1.0, %v957_v57 }
  0xff   :  { %v961_v60 = vpop.eup %960  ;;  %v227_v61 = vadd.f32 1.0, %v959_v58 }
 0x100   :  { %v963_v62 = vpop.eup %962  ;;  %972 = vrcp.f32 %v229_v59  ;;  %v230_v63 = vadd.f32 1.0, %v961_v60 }
 0x101   :  { %974 = vrcp.f32 %v227_v61  ;;  %v228_v0 = vadd.f32 1.0, %v963_v62 }
 0x102   :  { %v965_v1 = vpop.eup %964  ;;  %976 = vrcp.f32 %v230_v63 }
 0x103   :  { %v967_v2 = vpop.eup %966  ;;  %978 = vrcp.f32 %v228_v0  ;;  %v249_v5 = vmul.f32 %v965_v1, %v177_v26  ;;  %v831_v26 = vsel %vm427_vm4, 1.0, %v1030_v25 }
 0x104   :  { %v969_v3 = vpop.eup %968  ;;  %v247_v7 = vmul.f32 %v967_v2, %v169_v28  ;;  %v421_v28 = vpop.permute.xlu1 %420  ;;  %v439_v30 = vpack.c.bf16 %v832_v29, %v831_v26 }
 0x105   :  { %v971_v4 = vpop.eup %970  ;;  %v250_v6 = vmul.f32 %v969_v3, %v180_v31  ;;  %vm430_vm7 = vcmp.eq.s32.totalorder %v421_v28, %v830_v23 }
 0x106   :  { %v248_v8 = vmul.f32 %v971_v4, %v172_v34  ;;  %v1193_v31 = vsel %vm430_vm7, 1.0, %v1030_v25  ;;  %909 = vmatprep.mubr.msk.bf16.mxu0 %vm449_vm8, %v439_v30 }
 0x107   :  { %v260_v9 = vpack.c.bf16 %v250_v6, %v249_v5  ;;  %v440_v32 = vpack.c.bf16 %v1193_v31, %v1191_v27  ;;  %v447_v31 = vld [vmem:[#allocation2 + $0x10] sm:$0xff] }
 0x108   :  { %v259_v10 = vpack.c.bf16 %v248_v8, %v247_v7 }
 0x10a   :  { %v973_v11 = vpop.eup %972  ;;  %893 = vmatprep.mubr.msk.bf16.mxu1 %vm272_vm3, %v259_v10 }
 0x10b   :  { %v975_v12 = vpop.eup %974  ;;  %894 = vmatmul.mubr.msk.bf16.vlgmr.msra.gmra.mrb[0].mxu1 %vm272_vm3, %v260_v9  ;;  %v253_v15 = vmul.f32 %v973_v11, %v193_v38 }
 0x10c   :  { %v977_v13 = vpop.eup %976  ;;  %v251_v17 = vmul.f32 %v975_v12, %v185_v40 }
 0x10d   :  { %v979_v14 = vpop.eup %978  ;;  %v254_v16 = vmul.f32 %v977_v13, %v196_v43 }
 0x10e   :  { %v252_v18 = vmul.f32 %v979_v14, %v188_v46 }
 0x10f   :  { %v262_v19 = vpack.c.bf16 %v254_v16, %v253_v15 }
 0x110   :  { %v261_v20 = vpack.c.bf16 %v252_v18, %v251_v17 }
 0x112   :  { %897 = vmatprep.mubr.msk.bf16.mxu1 %vm272_vm3, %v261_v20 }
 0x113   :  { %898 = vmatmul.mubr.msk.bf16.gmra.mrb[4].mxu1 %vm272_vm3, %v262_v19 }
 0x1de   :  { %v895_v34 = vpop.f32.mrb[0].mxu1 }
 0x1df   :  { %v328_v35 = vadd.f32 %v895_v34, %v817_v33  ;;  %v319_v36 = vpop.f32.mrb[1].mxu1  ;;  %v534_v34 = vld [vmem:[%s1312_s15 + $0x8] sm:$0xff] }
 0x1e0   :  { %v320_v37 = vadd.f32 %v817_v33, %v319_v36  ;;  %v896_v38 = vpop.f32.mrb[2].mxu1  ;;  %v529_v36 = vld [vmem:[%s1313_s14] sm:$0xff] }
 0x1e1   :  { %v824_v39 = vmul.f32 -1.442695, %v328_v35  ;;  %v331_v40 = vadd.f32 %v896_v38, %v817_v33  ;;  %v322_v41 = vpop.f32.mrb[3].mxu1 }
 0x1e2   :  { %v822_v42 = vmul.f32 -1.442695, %v320_v37  ;;  %v323_v43 = vadd.f32 %v817_v33, %v322_v41 }
 0x1e3   :  { %980 = vpow2.f32 %v824_v39  ;;  %v825_v44 = vmul.f32 -1.442695, %v331_v40  ;;  %v448_v39 = vld [vmem:[#allocation2 + $0x18] sm:$0xff] }
 0x1e4   :  { %982 = vpow2.f32 %v822_v42  ;;  %v823_v45 = vmul.f32 -1.442695, %v323_v43  ;;  %v446_v42 = vld [vmem:[#allocation2 + $0x8] sm:$0xff] }
 0x1e5   :  { %984 = vpow2.f32 %v825_v44 }
 0x1e6   :  { %986 = vpow2.f32 %v823_v45  ;;  %v899_v46 = vpop.f32.mrb[4].mxu1 }
 0x1e7   :  { %v344_v47 = vadd.f32 %v899_v46, %v817_v33  ;;  %v335_v48 = vpop.f32.mrb[5].mxu1 }
 0x1e8   :  { %v336_v49 = vadd.f32 %v817_v33, %v335_v48  ;;  %v900_v50 = vpop.f32.mrb[6].mxu1  ;;  %v1225_v48 = vld [vmem:[%s1314_s5] sm:$0xff] }
 0x1e9   :  { %v828_v51 = vmul.f32 -1.442695, %v344_v47  ;;  %v347_v52 = vadd.f32 %v900_v50, %v817_v33  ;;  %v338_v53 = vpop.f32.mrb[7].mxu1 }
 0x1ea   :  { %v826_v54 = vmul.f32 -1.442695, %v336_v49  ;;  %v339_v55 = vadd.f32 %v817_v33, %v338_v53  ;;  %v533_v33 = vld [vmem:[%s1312_s15] sm:$0xff] }
 0x1eb   :  { %988 = vpow2.f32 %v828_v51  ;;  %v829_v56 = vmul.f32 -1.442695, %v347_v52 }
 0x1ec   :  { %990 = vpow2.f32 %v826_v54  ;;  %v827_v57 = vmul.f32 -1.442695, %v339_v55 }
 0x1ed   :  { %v981_v58 = vpop.eup %980  ;;  %992 = vpow2.f32 %v829_v56 }
 0x1ee   :  { %v983_v59 = vpop.eup %982  ;;  %v376_v60 = vadd.f32 1.0, %v981_v58  ;;  %994 = vpow2.f32 %v827_v57  ;;  %v1239_v57 = vld [vmem:[%s1314_s5 + $0x10] sm:$0xff]  ;;  %v1244_v58 = vld [vmem:[%s1314_s5 + $0x18] sm:$0xff] }
 0x1ef   :  { %v985_v61 = vpop.eup %984  ;;  %v374_v62 = vadd.f32 1.0, %v983_v59  ;;  %v531_v59 = vpack.c.bf16 %v1244_v58, %v1239_v57 }
 0x1f0   :  { %v987_v63 = vpop.eup %986  ;;  %996 = vrcp.f32 %v376_v60  ;;  %v377_v0 = vadd.f32 1.0, %v985_v61  ;;  %v692_v60 = vld [vmem:[%s1315_s17] sm:$0xff]  ;;  %v693_v61 = vld [vmem:[%s1315_s17 + $0x8] sm:$0xff] }
 0x1f1   :  { %998 = vrcp.f32 %v374_v62  ;;  %v375_v1 = vadd.f32 1.0, %v987_v63  ;;  %v698_v62 = vpack.c.bf16 %v693_v61, %v692_v60  ;;  %v694_v63 = vld [vmem:[%s1315_s17 + $0x10] sm:$0xff] }
 0x1f2   :  { %1000 = vrcp.f32 %v377_v0  ;;  %v695_v0 = vld [vmem:[%s1315_s17 + $0x18] sm:$0xff] }
 0x1f3   :  { %1002 = vrcp.f32 %v375_v1  ;;  %v699_v1 = vpack.c.bf16 %v695_v0, %v694_v63 }
 0x1f5   :  { %v989_v2 = vpop.eup %988 }
 0x1f6   :  { %v991_v3 = vpop.eup %990  ;;  %v380_v4 = vadd.f32 1.0, %v989_v2  ;;  %v841_v2 = vld [vmem:[%s1316_s16] ss:$0 sm:$0xff] }
 0x1f7   :  { %v993_v5 = vpop.eup %992  ;;  %v378_v6 = vadd.f32 1.0, %v991_v3 }
 0x1f8   :  { %v995_v7 = vpop.eup %994  ;;  %1004 = vrcp.f32 %v380_v4  ;;  %v381_v8 = vadd.f32 1.0, %v993_v5 }
 0x1f9   :  { %1006 = vrcp.f32 %v378_v6  ;;  %v379_v9 = vadd.f32 1.0, %v995_v7 }
 0x1fa   :  { %v997_v10 = vpop.eup %996  ;;  %1008 = vrcp.f32 %v381_v8 }
 0x1fb   :  { %v999_v11 = vpop.eup %998  ;;  %1010 = vrcp.f32 %v379_v9  ;;  %v400_v14 = vmul.f32 %v997_v10, %v328_v35  ;;  %v537_v35 = vpack.c.bf16 %v534_v34, %v533_v33 }
 0x1fc   :  { %v1001_v12 = vpop.eup %1000  ;;  %v398_v16 = vmul.f32 %v999_v11, %v320_v37  ;;  %v532_v37 = vpack.c.bf16 %v529_v36, %v529_v36 }
 0x1fd   :  { %v1003_v13 = vpop.eup %1002  ;;  %v401_v15 = vmul.f32 %v1001_v12, %v331_v40  ;;  %913 = vmatprep.subr.bf16.mxu1 %v537_v35 }
 0x1fe   :  { %v399_v17 = vmul.f32 %v1003_v13, %v323_v43  ;;  %914 = vmatpush3.bf16.msra.mxu1 %v537_v35  ;;  %v602_v27 = vsel %vm600_vm10, %v532_v37, 0 }
 0x1ff   :  { %v442_v18 = vpack.c.bf16 %v401_v15, %v400_v14  ;;  %937 = vmatprep.subr.msk.bf16.mxu1 %vm600_vm10, %v532_v37  ;;  %v848_v37 = vld [vmem:[%s1317_s18] ss:$0 sm:$0xff] }
 0x200   :  { %v441_v19 = vpack.c.bf16 %v399_v17, %v398_v16 }
 0x202   :  { %v1005_v20 = vpop.eup %1004  ;;  %901 = vmatprep.subr.bf16.mxu0 %v441_v19 }
 0x203   :  { %v1007_v21 = vpop.eup %1006  ;;  %902 = vmatpush3.bf16.msra.mxu0 %v441_v19  ;;  %v404_v24 = vmul.f32 %v1005_v20, %v344_v47 }
 0x204   :  { %v1009_v22 = vpop.eup %1008  ;;  %903 = vmatprep.subr.bf16.mxu0 %v442_v18  ;;  %v402_v26 = vmul.f32 %v1007_v21, %v336_v49  ;;  %v1230_v49 = vld [vmem:[%s1314_s5 + $0x8] sm:$0xff] }
 0x205   :  { %v1011_v23 = vpop.eup %1010  ;;  %v405_v25 = vmul.f32 %v1009_v22, %v347_v52 }
 0x206   :  { %v403_v28 = vmul.f32 %v1011_v23, %v339_v55  ;;  %v530_v55 = vpack.c.bf16 %v1230_v49, %v1225_v48 }
 0x207   :  { %904 = vmatpush3.bf16.msra.mxu0 %v442_v18  ;;  %v444_v29 = vpack.c.bf16 %v405_v25, %v404_v24 }
 0x208   :  { %v443_v30 = vpack.c.bf16 %v403_v28, %v402_v26 }
 0x20a   :  { %905 = vmatprep.subr.bf16.mxu0 %v443_v30 }
 0x20b   :  { %906 = vmatpush3.bf16.msra.mxu0 %v443_v30 }
 0x20c   :  { %907 = vmatprep.subr.bf16.mxu0 %v444_v29 }
 0x20f   :  { %908 = vmatpush3.bf16.msra.mxu0 %v444_v29 }
 0x210   :  { %925 = vmatprep.subr.bf16.mxu0 %v698_v62 }
 0x212   :  { %910 = vmatmul.mubr.msk.bf16.vlgmr.msra.gmra.mrb[8].mxu0 %vm449_vm8, %v440_v32  ;;  %v445_v32 = vld [vmem:[#allocation2] sm:$0xff] }
 0x213   :  { %926 = vmatpush3.bf16.msra.mxu0 %v698_v62 }
 0x214   :  { %927 = vmatprep.subr.bf16.mxu0 %v699_v1 }
 0x217   :  { %928 = vmatpush3.bf16.msra.mxu0 %v699_v1 }
 0x2e5   :  { %v911_v38 = vpop.f32.mrb[8].mxu0 }
 0x2e6   :  { %v507_v40 = vadd.f32 %v911_v38, %v447_v31  ;;  %v490_v41 = vpop.f32.mrb[9].mxu0 }
 0x2e7   :  { %v505_v43 = vadd.f32 %v490_v41, %v445_v32  ;;  %v912_v44 = vpop.f32.mrb[10].mxu0 }
 0x2e8   :  { %512 = vst.msk [vmem:[#allocation2 + $0x10] sm:$0xff] %vm69_vm9, %v507_v40  ;;  %v508_v45 = vadd.f32 %v912_v44, %v448_v39  ;;  %v493_v46 = vpop.f32.mrb[11].mxu0 }
 0x2e9   :  { %510 = vst.msk [vmem:[#allocation2] sm:$0xff] %vm69_vm9, %v505_v43  ;;  %v506_v47 = vadd.f32 %v493_v46, %v446_v42  ;;  %v525_v46 = vld [vmem:[%s1318_s4] sm:$0xff] }
 0x2ea   :  { %513 = vst.msk [vmem:[#allocation2 + $0x18] sm:$0xff] %vm69_vm9, %v508_v45 }
 0x2eb   :  { %511 = vst.msk [vmem:[#allocation2 + $0x8] sm:$0xff] %vm69_vm9, %v506_v47 }
 0x2ef   :  { %v519_v54 = vld [vmem:[#allocation2 + $0x10] sm:$0xff] }
 0x2f0   :  { %v517_v51 = vld [vmem:[#allocation2] sm:$0xff] }
 0x2f1   :  { %v520_v50 = vld [vmem:[#allocation2 + $0x18] sm:$0xff] }
 0x2f2   :  { %v518_v52 = vld [vmem:[#allocation2 + $0x8] sm:$0xff]  ;;  %v536_v56 = vpack.c.bf16 %v520_v50, %v519_v54  ;;  %v528_v54 = vld [vmem:[%s1318_s4 + $0x18] sm:$0xff] }
 0x2f3   :  { %v535_v53 = vpack.c.bf16 %v518_v52, %v517_v51  ;;  %v527_v51 = vld [vmem:[%s1318_s4 + $0x10] sm:$0xff] }
 0x2f5   :  { %915 = vmatprep.mubr.msk.bf16.mxu1 %vm69_vm9, %v535_v53 }
 0x2f6   :  { %916 = vmatmul.mubr.msk.bf16.vlgmr.msra.gmra.mrb[8].mxu1 %vm69_vm9, %v536_v56 }
 0x2f7   :  { %920 = vmatpush3.bf16.msra.mxu1 %v602_v27  ;;  %921 = vmatprep.mubr.msk.bf16.mxu1 %vm593_vm11, %v530_v55 }
 0x302   :  { %922 = vmatmul.mubr.msk.bf16.vlgmr.msra.gmra.mrb[8].mxu1 %vm593_vm11, %v531_v59 }
 0x3d5   :  { %v923_v3 = vpop.f32.mrb[8].mxu1 }
 0x3d6   :  { %v662_v4 = vadd.f32 %v923_v3, %v841_v2  ;;  %v638_v5 = vpop.f32.mrb[9].mxu1 }
 0x3d7   :  { %v660_v6 = vadd.f32 %v841_v2, %v638_v5  ;;  %v924_v7 = vpop.f32.mrb[10].mxu1 }
 0x3d8   :  { %v844_v8 = vmul.f32 -1.442695, %v662_v4  ;;  %v663_v9 = vadd.f32 %v924_v7, %v841_v2  ;;  %v641_v10 = vpop.f32.mrb[11].mxu1 }
 0x3d9   :  { %v842_v11 = vmul.f32 -1.442695, %v660_v6  ;;  %v661_v12 = vadd.f32 %v841_v2, %v641_v10 }
 0x3da   :  { %1012 = vpow2.f32 %v844_v8  ;;  %v845_v13 = vmul.f32 -1.442695, %v663_v9 }
 0x3db   :  { %1014 = vpow2.f32 %v842_v11  ;;  %v843_v14 = vmul.f32 -1.442695, %v661_v12 }
 0x3dc   :  { %1016 = vpow2.f32 %v845_v13 }
 0x3dd   :  { %1018 = vpow2.f32 %v843_v14 }
 0x3e4   :  { %v1013_v15 = vpop.eup %1012 }
 0x3e5   :  { %v1015_v16 = vpop.eup %1014  ;;  %v678_v17 = vadd.f32 1.0, %v1013_v15 }
 0x3e6   :  { %v1017_v18 = vpop.eup %1016  ;;  %v676_v19 = vadd.f32 1.0, %v1015_v16 }
 0x3e7   :  { %v1019_v20 = vpop.eup %1018  ;;  %1020 = vrcp.f32 %v678_v17  ;;  %v679_v21 = vadd.f32 1.0, %v1017_v18 }
 0x3e8   :  { %1022 = vrcp.f32 %v676_v19  ;;  %v677_v22 = vadd.f32 1.0, %v1019_v20 }
 0x3e9   :  { %1024 = vrcp.f32 %v679_v21 }
 0x3ea   :  { %1026 = vrcp.f32 %v677_v22 }
 0x3f1   :  { %v1021_v23 = vpop.eup %1020 }
 0x3f2   :  { %v1023_v24 = vpop.eup %1022  ;;  %v690_v28 = vmul.f32 %v1021_v23, %v662_v4 }
 0x3f3   :  { %v1025_v25 = vpop.eup %1024  ;;  %v688_v30 = vmul.f32 %v1023_v24, %v660_v6 }
 0x3f4   :  { %v1027_v26 = vpop.eup %1026  ;;  %v691_v29 = vmul.f32 %v1025_v25, %v663_v9 }
 0x3f5   :  { %v689_v33 = vmul.f32 %v1027_v26, %v661_v12 }
 0x3f6   :  { %v697_v34 = vpack.c.bf16 %v691_v29, %v690_v28 }
 0x3f7   :  { %v696_v35 = vpack.c.bf16 %v689_v33, %v688_v30 }
 0x3f9   :  { %929 = vmatprep.mubr.msk.bf16.mxu0 %vm272_vm3, %v696_v35 }
 0x3fa   :  { %930 = vmatmul.mubr.msk.bf16.vlgmr.msra.gmra.mrb[12].mxu0 %vm272_vm3, %v697_v34 }
 0x4cd   :  { %v931_v36 = vpop.f32.mrb[12].mxu0 }
 0x4ce   :  { %v740_v27 = vpop.f32.mrb[13].mxu0  ;;  %v757_v39 = vadd.f32 %v931_v36, %v1239_v57 }
 0x4cf   :  { %v755_v31 = vadd.f32 %v740_v27, %v1225_v48  ;;  %v932_v32 = vpop.f32.mrb[14].mxu0  ;;  %v526_v48 = vld [vmem:[%s1318_s4 + $0x8] sm:$0xff] }
 0x4d0   :  { %v743_v38 = vpop.f32.mrb[15].mxu0  ;;  %v758_v42 = vadd.f32 %v932_v32, %v1244_v58  ;;  %v768_v44 = vadd.f32 %v848_v37, %v757_v39 }
 0x4d1   :  { %v766_v40 = vadd.f32 %v848_v37, %v755_v31  ;;  %v756_v41 = vadd.f32 %v743_v38, %v1230_v49 }
 0x4d2   :  { %v769_v45 = vadd.f32 %v848_v37, %v758_v42 }
 0x4d3   :  { %v767_v43 = vadd.f32 %v848_v37, %v756_v41  ;;  %774 = vrot.lane.b32.xlu0 %v766_v40, %s1031_s2 }
 0x4d5   :  { %776 = vrot.lane.b32.xlu1 %v767_v43, %s1031_s2 }
 0x4d7   :  { %778 = vrot.lane.b32.xlu0 %v768_v44, %s1031_s2 }
 0x4d9   :  { %780 = vrot.lane.b32.xlu1 %v769_v45, %s1031_s2 }
 0x545   :  { %v775_v47 = vpop.permute.xlu0 %774 }
 0x546   :  { %v787_v49 = vsel %vm786_vm12, %v525_v46, %v775_v47 }
 0x547   :  { %792 = vst.msk [vmem:[%s1319_s19] sm:$0xff] %vm791_vm13, %v787_v49  ;;  %v777_v50 = vpop.permute.xlu1 %776 }
 0x548   :  { %v788_v52 = vsel %vm786_vm12, %v526_v48, %v777_v50 }
 0x549   :  { %793 = vst.msk [vmem:[%s1319_s19 + $0x8] sm:$0xff] %vm791_vm13, %v788_v52  ;;  %v779_v53 = vpop.permute.xlu0 %778 }
 0x54a   :  { %v789_v55 = vsel %vm786_vm12, %v527_v51, %v779_v53 }
 0x54b   :  { %794 = vst.msk [vmem:[%s1319_s19 + $0x10] sm:$0xff] %vm791_vm13, %v789_v55  ;;  %v781_v56 = vpop.permute.xlu1 %780 }
 0x54c   :  { %v790_v57 = vsel %vm786_vm12, %v528_v54, %v781_v56 }
 0x54d   :  { %795 = vst.msk [vmem:[%s1319_s19 + $0x18] sm:$0xff] %vm791_vm13, %v790_v57 }

</bundles_post_ra>
